<compile_context>
chip_gen: v7x
topology: tpu7x:2x2x1
jax: 0.10.0
libtpu: 0.0.40
codegen_flags: <defaults>
</compile_context>

<pallas_src>
import functools
import math

import jax
import jax.numpy as jnp
import numpy as np
from jax.experimental import pallas as pl
from jax.experimental.pallas import tpu as pltpu


def _softmax(x, axis):
    m = jnp.max(x, axis=axis, keepdims=True)
    e = jnp.exp(x - m)
    # Approximate reciprocal lowers to the EUP slot (separate VLIW slot);
    # the multiply rides the VPU — cheaper than a divide on the hot path.
    return e * pl.reciprocal(jnp.sum(e, axis=axis, keepdims=True), approx=True)


def _fused_attn_kernel(x_ref, w_ref, b_ref, o_ref, qkv_ref, *, E, scale):
    """Per-batch fused 1x1-conv QKV projection + dual-softmax attention.

    x_ref   : [1, C, H, W]  VMEM input block (one batch element)
    w_ref   : [3E, C]       SMEM stacked (Wq; Wk; Wv) 1x1-conv weights
    b_ref   : [3E]          SMEM stacked biases
    o_ref   : [1, E, H, W]  VMEM output block
    qkv_ref : [3E, H, W]    VMEM scratch holding Q/K/V (never touches HBM)
    """
    _, C, H, W = x_ref.shape

    # ---- QKV projection (1x1 conv == per-pixel channel mixing) ------------
    # C is tiny, so do it as C scalar-broadcast multiply-adds on the VPU with
    # weights/biases read from SMEM; results are written directly into the
    # [3E, H, W] scratch layout the attention matmuls want (no reshapes).
    x_c = [x_ref[0, c] for c in range(C)]                 # C x [H, W]
    for m in range(3 * E):                                # static unroll (3E = 24)
        acc = x_c[0] * w_ref[m, 0] + b_ref[m]
        for c in range(1, C):
            acc = acc + x_c[c] * w_ref[m, c]
        qkv_ref[m] = acc

    q = qkv_ref[0:E]                                      # [E, H, W]
    k = qkv_ref[E:2 * E]
    v = qkv_ref[2 * E:3 * E]

    # ---- attention ---------------------------------------------------------
    # a1 = softmax(Q @ K^T / sqrt(E), -1)        -> [E, H, H]
    s1 = jnp.einsum('ehw,egw->ehg', q, k,
                    preferred_element_type=jnp.float32) * scale
    a1 = _softmax(s1, axis=-1)

    # a2 = softmax(Q^T @ K / sqrt(E), -2)        -> [E, W, W]
    # (explicit swapaxes kept: it's a cheap XLU transpose with a known-good
    #  lowering; contracting the non-minor dim directly is riskier to lower.)
    qt = jnp.swapaxes(q, 1, 2)                            # [E, W, H]
    s2 = jnp.einsum('ewh,ehv->ewv', qt, k,
                    preferred_element_type=jnp.float32) * scale
    a2 = _softmax(s2, axis=-2)

    # out = a1 @ V @ a2                          -> [E, H, W]
    t = jnp.einsum('ehg,egw->ehw', a1, v,
                   preferred_element_type=jnp.float32)
    o = jnp.einsum('ehw,ewv->ehv', t, a2,
                   preferred_element_type=jnp.float32)
    o_ref[0] = o.astype(o_ref.dtype)


def self_attention_forward(x, params):
    B, C, H, W = x.shape
    E = params['wq'].shape[0]
    scale = 1.0 / math.sqrt(E)

    # Stack the three 1x1-conv weights/biases into single SMEM-resident tables.
    w_stk = jnp.concatenate([params['wq'], params['wk'], params['wv']], axis=0)  # [3E, C]
    b_stk = jnp.concatenate([params['bq'], params['bk'], params['bv']], axis=0)  # [3E]

    kernel = functools.partial(_fused_attn_kernel, E=E, scale=scale)
    return pl.pallas_call(
        kernel,
        out_shape=jax.ShapeDtypeStruct((B, E, H, W), jnp.float32),
        grid=(B,),
        in_specs=[
            pl.BlockSpec((1, C, H, W), lambda b: (b, 0, 0, 0)),
            pl.BlockSpec(memory_space=pltpu.MemorySpace.SMEM),   # stacked W
            pl.BlockSpec(memory_space=pltpu.MemorySpace.SMEM),   # stacked bias
        ],
        out_specs=pl.BlockSpec((1, E, H, W), lambda b: (b, 0, 0, 0)),
        scratch_shapes=[pltpu.VMEM((3 * E, H, W), jnp.float32)],
        compiler_params=pltpu.CompilerParams(
            dimension_semantics=("parallel",)),   # 2 parallel steps -> both v7x TCs
    )(x, w_stk, b_stk)


# Pure-JAX reference for correctness checking (same eval-mode semantics).
def reference(x, params):
    E = params['wq'].shape[0]
    q = jnp.einsum('ec,bchw->behw', params['wq'], x) + params['bq'][None, :, None, None]
    k = jnp.einsum('ec,bchw->behw', params['wk'], x) + params['bk'][None, :, None, None]
    v = jnp.einsum('ec,bchw->behw', params['wv'], x) + params['bv'][None, :, None, None]
    scale = 1.0 / math.sqrt(E)
    a1 = jax.nn.softmax(jnp.einsum('behw,begw->behg', q, k) * scale, axis=-1)
    a2 = jax.nn.softmax(jnp.einsum('behw,behv->bewv', q, k) * scale, axis=-2)
    t = jnp.einsum('behg,begw->behw', a1, v)
    return jnp.einsum('behw,bewv->behv', t, a2)


if __name__ == "__main__":
    B, C, E, H, W = 2, 4, 8, 16, 16          # dim=4, enc_dim=8

    key = jax.random.PRNGKey(0)
    kx, kq, kk, kv, kbq, kbk, kbv = jax.random.split(key, 7)

    x = jax.random.normal(kx, (B, C, H, W), dtype=jnp.float32)
    params = {
        # Conv2d(dim, enc_dim, 1) weights: [E, C, 1, 1] -> stored as [E, C]
        'wq': jax.random.normal(kq, (E, C), dtype=jnp.float32) * 0.2,
        'wk': jax.random.normal(kk, (E, C), dtype=jnp.float32) * 0.2,
        'wv': jax.random.normal(kv, (E, C), dtype=jnp.float32) * 0.2,
        'bq': jax.random.normal(kbq, (E,), dtype=jnp.float32) * 0.1,
        'bk': jax.random.normal(kbk, (E,), dtype=jnp.float32) * 0.1,
        'bv': jax.random.normal(kbv, (E,), dtype=jnp.float32) * 0.1,
    }

    out = self_attention_forward(x, params)
    out = jax.block_until_ready(out)

    ref = jax.block_until_ready(reference(x, params))
    # Tolerance slightly loosened because the kernel uses the EUP approximate
    # reciprocal in the softmax normalisation.
    np.testing.assert_allclose(np.asarray(out), np.asarray(ref),
                               rtol=1e-2, atol=1e-2)

    print("KERNEL_OK")
</pallas_src>

<mosaic_0001>
module attributes {stable_mosaic.version = 11 : i64} {
  func.func @_fused_attn_kernel(%arg0: i32, %arg1: memref<1x4x16x16xf32, #tpu.memory_space<vmem>>, %arg2: memref<24x4xf32, #tpu.memory_space<smem>>, %arg3: memref<24xf32, #tpu.memory_space<smem>>, %arg4: memref<1x8x16x16xf32, #tpu.memory_space<vmem>>, %arg5: memref<24x16x16xf32, #tpu.memory_space<vmem>>) attributes {dimension_semantics = [#tpu.dimension_semantics<parallel>], iteration_bounds = array<i64: 2>, scalar_prefetch = 0 : i64, scratch_operands = 1 : i64, tpu.core_type = #tpu.core_type<tc>, window_params = [{transform_indices = @transform_0, window_bounds = array<i64: 1, 4, 16, 16>}, {transform_indices = @transform_1, window_bounds = array<i64: 24, 4>}, {transform_indices = @transform_2, window_bounds = array<i64: 24>}, {transform_indices = @transform_3, window_bounds = array<i64: 1, 8, 16, 16>}]} {
    %c0 = arith.constant 0 : index
    %c0_0 = arith.constant 0 : index
    %c0_1 = arith.constant 0 : index
    %c0_2 = arith.constant 0 : index
    %0 = vector.load %arg1[%c0, %c0_0, %c0_1, %c0_2] : memref<1x4x16x16xf32, #tpu.memory_space<vmem>>, vector<1x1x16x16xf32>
    %1 = vector.shape_cast %0 : vector<1x1x16x16xf32> to vector<16x16xf32>
    %c0_3 = arith.constant 0 : index
    %c1 = arith.constant 1 : index
    %c0_4 = arith.constant 0 : index
    %c0_5 = arith.constant 0 : index
    %2 = vector.load %arg1[%c0_3, %c1, %c0_4, %c0_5] : memref<1x4x16x16xf32, #tpu.memory_space<vmem>>, vector<1x1x16x16xf32>
    %3 = vector.shape_cast %2 : vector<1x1x16x16xf32> to vector<16x16xf32>
    %c0_6 = arith.constant 0 : index
    %c2 = arith.constant 2 : index
    %c0_7 = arith.constant 0 : index
    %c0_8 = arith.constant 0 : index
    %4 = vector.load %arg1[%c0_6, %c2, %c0_7, %c0_8] : memref<1x4x16x16xf32, #tpu.memory_space<vmem>>, vector<1x1x16x16xf32>
    %5 = vector.shape_cast %4 : vector<1x1x16x16xf32> to vector<16x16xf32>
    %c0_9 = arith.constant 0 : index
    %c3 = arith.constant 3 : index
    %c0_10 = arith.constant 0 : index
    %c0_11 = arith.constant 0 : index
    %6 = vector.load %arg1[%c0_9, %c3, %c0_10, %c0_11] : memref<1x4x16x16xf32, #tpu.memory_space<vmem>>, vector<1x1x16x16xf32>
    %7 = vector.shape_cast %6 : vector<1x1x16x16xf32> to vector<16x16xf32>
    %c0_12 = arith.constant 0 : index
    %c0_13 = arith.constant 0 : index
    %8 = memref.load %arg2[%c0_12, %c0_13] : memref<24x4xf32, #tpu.memory_space<smem>>
    %9 = vector.broadcast %8 : f32 to vector<16x16xf32>
    %10 = arith.mulf %1, %9 : vector<16x16xf32>
    %c0_14 = arith.constant 0 : index
    %11 = memref.load %arg3[%c0_14] : memref<24xf32, #tpu.memory_space<smem>>
    %12 = vector.broadcast %11 : f32 to vector<16x16xf32>
    %13 = arith.addf %10, %12 : vector<16x16xf32>
    %c0_15 = arith.constant 0 : index
    %c1_16 = arith.constant 1 : index
    %14 = memref.load %arg2[%c0_15, %c1_16] : memref<24x4xf32, #tpu.memory_space<smem>>
    %15 = vector.broadcast %14 : f32 to vector<16x16xf32>
    %16 = arith.mulf %3, %15 : vector<16x16xf32>
    %17 = arith.addf %13, %16 : vector<16x16xf32>
    %c0_17 = arith.constant 0 : index
    %c2_18 = arith.constant 2 : index
    %18 = memref.load %arg2[%c0_17, %c2_18] : memref<24x4xf32, #tpu.memory_space<smem>>
    %19 = vector.broadcast %18 : f32 to vector<16x16xf32>
    %20 = arith.mulf %5, %19 : vector<16x16xf32>
    %21 = arith.addf %17, %20 : vector<16x16xf32>
    %c0_19 = arith.constant 0 : index
    %c3_20 = arith.constant 3 : index
    %22 = memref.load %arg2[%c0_19, %c3_20] : memref<24x4xf32, #tpu.memory_space<smem>>
    %23 = vector.broadcast %22 : f32 to vector<16x16xf32>
    %24 = arith.mulf %7, %23 : vector<16x16xf32>
    %25 = arith.addf %21, %24 : vector<16x16xf32>
    %c0_21 = arith.constant 0 : index
    %c0_22 = arith.constant 0 : index
    %c0_23 = arith.constant 0 : index
    %26 = vector.load %arg5[%c0_21, %c0_22, %c0_23] : memref<24x16x16xf32, #tpu.memory_space<vmem>>, vector<1x16x16xf32>
    %27 = vector.shape_cast %26 : vector<1x16x16xf32> to vector<16x16xf32>
    %28 = vector.shape_cast %25 : vector<16x16xf32> to vector<1x16x16xf32>
    tpu.vector_store %arg5[%c0_21, %c0_22, %c0_23], %28 {strides = array<i32>} : memref<24x16x16xf32, #tpu.memory_space<vmem>>, vector<1x16x16xf32>,
    %c1_24 = arith.constant 1 : index
    %c0_25 = arith.constant 0 : index
    %29 = memref.load %arg2[%c1_24, %c0_25] : memref<24x4xf32, #tpu.memory_space<smem>>
    %30 = vector.broadcast %29 : f32 to vector<16x16xf32>
    %31 = arith.mulf %1, %30 : vector<16x16xf32>
    %c1_26 = arith.constant 1 : index
    %32 = memref.load %arg3[%c1_26] : memref<24xf32, #tpu.memory_space<smem>>
    %33 = vector.broadcast %32 : f32 to vector<16x16xf32>
    %34 = arith.addf %31, %33 : vector<16x16xf32>
    %c1_27 = arith.constant 1 : index
    %c1_28 = arith.constant 1 : index
    %35 = memref.load %arg2[%c1_27, %c1_28] : memref<24x4xf32, #tpu.memory_space<smem>>
    %36 = vector.broadcast %35 : f32 to vector<16x16xf32>
    %37 = arith.mulf %3, %36 : vector<16x16xf32>
    %38 = arith.addf %34, %37 : vector<16x16xf32>
    %c1_29 = arith.constant 1 : index
    %c2_30 = arith.constant 2 : index
    %39 = memref.load %arg2[%c1_29, %c2_30] : memref<24x4xf32, #tpu.memory_space<smem>>
    %40 = vector.broadcast %39 : f32 to vector<16x16xf32>
    %41 = arith.mulf %5, %40 : vector<16x16xf32>
    %42 = arith.addf %38, %41 : vector<16x16xf32>
    %c1_31 = arith.constant 1 : index
    %c3_32 = arith.constant 3 : index
    %43 = memref.load %arg2[%c1_31, %c3_32] : memref<24x4xf32, #tpu.memory_space<smem>>
    %44 = vector.broadcast %43 : f32 to vector<16x16xf32>
    %45 = arith.mulf %7, %44 : vector<16x16xf32>
    %46 = arith.addf %42, %45 : vector<16x16xf32>
    %c1_33 = arith.constant 1 : index
    %c0_34 = arith.constant 0 : index
    %c0_35 = arith.constant 0 : index
    %47 = vector.load %arg5[%c1_33, %c0_34, %c0_35] : memref<24x16x16xf32, #tpu.memory_space<vmem>>, vector<1x16x16xf32>
    %48 = vector.shape_cast %47 : vector<1x16x16xf32> to vector<16x16xf32>
    %49 = vector.shape_cast %46 : vector<16x16xf32> to vector<1x16x16xf32>
    tpu.vector_store %arg5[%c1_33, %c0_34, %c0_35], %49 {strides = array<i32>} : memref<24x16x16xf32, #tpu.memory_space<vmem>>, vector<1x16x16xf32>,
    %c2_36 = arith.constant 2 : index
    %c0_37 = arith.constant 0 : index
    %50 = memref.load %arg2[%c2_36, %c0_37] : memref<24x4xf32, #tpu.memory_space<smem>>
    %51 = vector.broadcast %50 : f32 to vector<16x16xf32>
    %52 = arith.mulf %1, %51 : vector<16x16xf32>
    %c2_38 = arith.constant 2 : index
    %53 = memref.load %arg3[%c2_38] : memref<24xf32, #tpu.memory_space<smem>>
    %54 = vector.broadcast %53 : f32 to vector<16x16xf32>
    %55 = arith.addf %52, %54 : vector<16x16xf32>
    %c2_39 = arith.constant 2 : index
    %c1_40 = arith.constant 1 : index
    %56 = memref.load %arg2[%c2_39, %c1_40] : memref<24x4xf32, #tpu.memory_space<smem>>
    %57 = vector.broadcast %56 : f32 to vector<16x16xf32>
    %58 = arith.mulf %3, %57 : vector<16x16xf32>
    %59 = arith.addf %55, %58 : vector<16x16xf32>
    %c2_41 = arith.constant 2 : index
    %c2_42 = arith.constant 2 : index
    %60 = memref.load %arg2[%c2_41, %c2_42] : memref<24x4xf32, #tpu.memory_space<smem>>
    %61 = vector.broadcast %60 : f32 to vector<16x16xf32>
    %62 = arith.mulf %5, %61 : vector<16x16xf32>
    %63 = arith.addf %59, %62 : vector<16x16xf32>
    %c2_43 = arith.constant 2 : index
    %c3_44 = arith.constant 3 : index
    %64 = memref.load %arg2[%c2_43, %c3_44] : memref<24x4xf32, #tpu.memory_space<smem>>
    %65 = vector.broadcast %64 : f32 to vector<16x16xf32>
    %66 = arith.mulf %7, %65 : vector<16x16xf32>
    %67 = arith.addf %63, %66 : vector<16x16xf32>
    %c2_45 = arith.constant 2 : index
    %c0_46 = arith.constant 0 : index
    %c0_47 = arith.constant 0 : index
    %68 = vector.load %arg5[%c2_45, %c0_46, %c0_47] : memref<24x16x16xf32, #tpu.memory_space<vmem>>, vector<1x16x16xf32>
    %69 = vector.shape_cast %68 : vector<1x16x16xf32> to vector<16x16xf32>
    %70 = vector.shape_cast %67 : vector<16x16xf32> to vector<1x16x16xf32>
    tpu.vector_store %arg5[%c2_45, %c0_46, %c0_47], %70 {strides = array<i32>} : memref<24x16x16xf32, #tpu.memory_space<vmem>>, vector<1x16x16xf32>,
    %c3_48 = arith.constant 3 : index
    %c0_49 = arith.constant 0 : index
    %71 = memref.load %arg2[%c3_48, %c0_49] : memref<24x4xf32, #tpu.memory_space<smem>>
    %72 = vector.broadcast %71 : f32 to vector<16x16xf32>
    %73 = arith.mulf %1, %72 : vector<16x16xf32>
    %c3_50 = arith.constant 3 : index
    %74 = memref.load %arg3[%c3_50] : memref<24xf32, #tpu.memory_space<smem>>
    %75 = vector.broadcast %74 : f32 to vector<16x16xf32>
    %76 = arith.addf %73, %75 : vector<16x16xf32>
    %c3_51 = arith.constant 3 : index
    %c1_52 = arith.constant 1 : index
    %77 = memref.load %arg2[%c3_51, %c1_52] : memref<24x4xf32, #tpu.memory_space<smem>>
    %78 = vector.broadcast %77 : f32 to vector<16x16xf32>
    %79 = arith.mulf %3, %78 : vector<16x16xf32>
    %80 = arith.addf %76, %79 : vector<16x16xf32>
    %c3_53 = arith.constant 3 : index
    %c2_54 = arith.constant 2 : index
    %81 = memref.load %arg2[%c3_53, %c2_54] : memref<24x4xf32, #tpu.memory_space<smem>>
    %82 = vector.broadcast %81 : f32 to vector<16x16xf32>
    %83 = arith.mulf %5, %82 : vector<16x16xf32>
    %84 = arith.addf %80, %83 : vector<16x16xf32>
    %c3_55 = arith.constant 3 : index
    %c3_56 = arith.constant 3 : index
    %85 = memref.load %arg2[%c3_55, %c3_56] : memref<24x4xf32, #tpu.memory_space<smem>>
    %86 = vector.broadcast %85 : f32 to vector<16x16xf32>
    %87 = arith.mulf %7, %86 : vector<16x16xf32>
    %88 = arith.addf %84, %87 : vector<16x16xf32>
    %c3_57 = arith.constant 3 : index
    %c0_58 = arith.constant 0 : index
    %c0_59 = arith.constant 0 : index
    %89 = vector.load %arg5[%c3_57, %c0_58, %c0_59] : memref<24x16x16xf32, #tpu.memory_space<vmem>>, vector<1x16x16xf32>
    %90 = vector.shape_cast %89 : vector<1x16x16xf32> to vector<16x16xf32>
    %91 = vector.shape_cast %88 : vector<16x16xf32> to vector<1x16x16xf32>
    tpu.vector_store %arg5[%c3_57, %c0_58, %c0_59], %91 {strides = array<i32>} : memref<24x16x16xf32, #tpu.memory_space<vmem>>, vector<1x16x16xf32>,
    %c4 = arith.constant 4 : index
    %c0_60 = arith.constant 0 : index
    %92 = memref.load %arg2[%c4, %c0_60] : memref<24x4xf32, #tpu.memory_space<smem>>
    %93 = vector.broadcast %92 : f32 to vector<16x16xf32>
    %94 = arith.mulf %1, %93 : vector<16x16xf32>
    %c4_61 = arith.constant 4 : index
    %95 = memref.load %arg3[%c4_61] : memref<24xf32, #tpu.memory_space<smem>>
    %96 = vector.broadcast %95 : f32 to vector<16x16xf32>
    %97 = arith.addf %94, %96 : vector<16x16xf32>
    %c4_62 = arith.constant 4 : index
    %c1_63 = arith.constant 1 : index
    %98 = memref.load %arg2[%c4_62, %c1_63] : memref<24x4xf32, #tpu.memory_space<smem>>
    %99 = vector.broadcast %98 : f32 to vector<16x16xf32>
    %100 = arith.mulf %3, %99 : vector<16x16xf32>
    %101 = arith.addf %97, %100 : vector<16x16xf32>
    %c4_64 = arith.constant 4 : index
    %c2_65 = arith.constant 2 : index
    %102 = memref.load %arg2[%c4_64, %c2_65] : memref<24x4xf32, #tpu.memory_space<smem>>
    %103 = vector.broadcast %102 : f32 to vector<16x16xf32>
    %104 = arith.mulf %5, %103 : vector<16x16xf32>
    %105 = arith.addf %101, %104 : vector<16x16xf32>
    %c4_66 = arith.constant 4 : index
    %c3_67 = arith.constant 3 : index
    %106 = memref.load %arg2[%c4_66, %c3_67] : memref<24x4xf32, #tpu.memory_space<smem>>
    %107 = vector.broadcast %106 : f32 to vector<16x16xf32>
    %108 = arith.mulf %7, %107 : vector<16x16xf32>
    %109 = arith.addf %105, %108 : vector<16x16xf32>
    %c4_68 = arith.constant 4 : index
    %c0_69 = arith.constant 0 : index
    %c0_70 = arith.constant 0 : index
    %110 = vector.load %arg5[%c4_68, %c0_69, %c0_70] : memref<24x16x16xf32, #tpu.memory_space<vmem>>, vector<1x16x16xf32>
    %111 = vector.shape_cast %110 : vector<1x16x16xf32> to vector<16x16xf32>
    %112 = vector.shape_cast %109 : vector<16x16xf32> to vector<1x16x16xf32>
    tpu.vector_store %arg5[%c4_68, %c0_69, %c0_70], %112 {strides = array<i32>} : memref<24x16x16xf32, #tpu.memory_space<vmem>>, vector<1x16x16xf32>,
    %c5 = arith.constant 5 : index
    %c0_71 = arith.constant 0 : index
    %113 = memref.load %arg2[%c5, %c0_71] : memref<24x4xf32, #tpu.memory_space<smem>>
    %114 = vector.broadcast %113 : f32 to vector<16x16xf32>
    %115 = arith.mulf %1, %114 : vector<16x16xf32>
    %c5_72 = arith.constant 5 : index
    %116 = memref.load %arg3[%c5_72] : memref<24xf32, #tpu.memory_space<smem>>
    %117 = vector.broadcast %116 : f32 to vector<16x16xf32>
    %118 = arith.addf %115, %117 : vector<16x16xf32>
    %c5_73 = arith.constant 5 : index
    %c1_74 = arith.constant 1 : index
    %119 = memref.load %arg2[%c5_73, %c1_74] : memref<24x4xf32, #tpu.memory_space<smem>>
    %120 = vector.broadcast %119 : f32 to vector<16x16xf32>
    %121 = arith.mulf %3, %120 : vector<16x16xf32>
    %122 = arith.addf %118, %121 : vector<16x16xf32>
    %c5_75 = arith.constant 5 : index
    %c2_76 = arith.constant 2 : index
    %123 = memref.load %arg2[%c5_75, %c2_76] : memref<24x4xf32, #tpu.memory_space<smem>>
    %124 = vector.broadcast %123 : f32 to vector<16x16xf32>
    %125 = arith.mulf %5, %124 : vector<16x16xf32>
    %126 = arith.addf %122, %125 : vector<16x16xf32>
    %c5_77 = arith.constant 5 : index
    %c3_78 = arith.constant 3 : index
    %127 = memref.load %arg2[%c5_77, %c3_78] : memref<24x4xf32, #tpu.memory_space<smem>>
    %128 = vector.broadcast %127 : f32 to vector<16x16xf32>
    %129 = arith.mulf %7, %128 : vector<16x16xf32>
    %130 = arith.addf %126, %129 : vector<16x16xf32>
    %c5_79 = arith.constant 5 : index
    %c0_80 = arith.constant 0 : index
    %c0_81 = arith.constant 0 : index
    %131 = vector.load %arg5[%c5_79, %c0_80, %c0_81] : memref<24x16x16xf32, #tpu.memory_space<vmem>>, vector<1x16x16xf32>
    %132 = vector.shape_cast %131 : vector<1x16x16xf32> to vector<16x16xf32>
    %133 = vector.shape_cast %130 : vector<16x16xf32> to vector<1x16x16xf32>
    tpu.vector_store %arg5[%c5_79, %c0_80, %c0_81], %133 {strides = array<i32>} : memref<24x16x16xf32, #tpu.memory_space<vmem>>, vector<1x16x16xf32>,
    %c6 = arith.constant 6 : index
    %c0_82 = arith.constant 0 : index
    %134 = memref.load %arg2[%c6, %c0_82] : memref<24x4xf32, #tpu.memory_space<smem>>
    %135 = vector.broadcast %134 : f32 to vector<16x16xf32>
    %136 = arith.mulf %1, %135 : vector<16x16xf32>
    %c6_83 = arith.constant 6 : index
    %137 = memref.load %arg3[%c6_83] : memref<24xf32, #tpu.memory_space<smem>>
    %138 = vector.broadcast %137 : f32 to vector<16x16xf32>
    %139 = arith.addf %136, %138 : vector<16x16xf32>
    %c6_84 = arith.constant 6 : index
    %c1_85 = arith.constant 1 : index
    %140 = memref.load %arg2[%c6_84, %c1_85] : memref<24x4xf32, #tpu.memory_space<smem>>
    %141 = vector.broadcast %140 : f32 to vector<16x16xf32>
    %142 = arith.mulf %3, %141 : vector<16x16xf32>
    %143 = arith.addf %139, %142 : vector<16x16xf32>
    %c6_86 = arith.constant 6 : index
    %c2_87 = arith.constant 2 : index
    %144 = memref.load %arg2[%c6_86, %c2_87] : memref<24x4xf32, #tpu.memory_space<smem>>
    %145 = vector.broadcast %144 : f32 to vector<16x16xf32>
    %146 = arith.mulf %5, %145 : vector<16x16xf32>
    %147 = arith.addf %143, %146 : vector<16x16xf32>
    %c6_88 = arith.constant 6 : index
    %c3_89 = arith.constant 3 : index
    %148 = memref.load %arg2[%c6_88, %c3_89] : memref<24x4xf32, #tpu.memory_space<smem>>
    %149 = vector.broadcast %148 : f32 to vector<16x16xf32>
    %150 = arith.mulf %7, %149 : vector<16x16xf32>
    %151 = arith.addf %147, %150 : vector<16x16xf32>
    %c6_90 = arith.constant 6 : index
    %c0_91 = arith.constant 0 : index
    %c0_92 = arith.constant 0 : index
    %152 = vector.load %arg5[%c6_90, %c0_91, %c0_92] : memref<24x16x16xf32, #tpu.memory_space<vmem>>, vector<1x16x16xf32>
    %153 = vector.shape_cast %152 : vector<1x16x16xf32> to vector<16x16xf32>
    %154 = vector.shape_cast %151 : vector<16x16xf32> to vector<1x16x16xf32>
    tpu.vector_store %arg5[%c6_90, %c0_91, %c0_92], %154 {strides = array<i32>} : memref<24x16x16xf32, #tpu.memory_space<vmem>>, vector<1x16x16xf32>,
    %c7 = arith.constant 7 : index
    %c0_93 = arith.constant 0 : index
    %155 = memref.load %arg2[%c7, %c0_93] : memref<24x4xf32, #tpu.memory_space<smem>>
    %156 = vector.broadcast %155 : f32 to vector<16x16xf32>
    %157 = arith.mulf %1, %156 : vector<16x16xf32>
    %c7_94 = arith.constant 7 : index
    %158 = memref.load %arg3[%c7_94] : memref<24xf32, #tpu.memory_space<smem>>
    %159 = vector.broadcast %158 : f32 to vector<16x16xf32>
    %160 = arith.addf %157, %159 : vector<16x16xf32>
    %c7_95 = arith.constant 7 : index
    %c1_96 = arith.constant 1 : index
    %161 = memref.load %arg2[%c7_95, %c1_96] : memref<24x4xf32, #tpu.memory_space<smem>>
    %162 = vector.broadcast %161 : f32 to vector<16x16xf32>
    %163 = arith.mulf %3, %162 : vector<16x16xf32>
    %164 = arith.addf %160, %163 : vector<16x16xf32>
    %c7_97 = arith.constant 7 : index
    %c2_98 = arith.constant 2 : index
    %165 = memref.load %arg2[%c7_97, %c2_98] : memref<24x4xf32, #tpu.memory_space<smem>>
    %166 = vector.broadcast %165 : f32 to vector<16x16xf32>
    %167 = arith.mulf %5, %166 : vector<16x16xf32>
    %168 = arith.addf %164, %167 : vector<16x16xf32>
    %c7_99 = arith.constant 7 : index
    %c3_100 = arith.constant 3 : index
    %169 = memref.load %arg2[%c7_99, %c3_100] : memref<24x4xf32, #tpu.memory_space<smem>>
    %170 = vector.broadcast %169 : f32 to vector<16x16xf32>
    %171 = arith.mulf %7, %170 : vector<16x16xf32>
    %172 = arith.addf %168, %171 : vector<16x16xf32>
    %c7_101 = arith.constant 7 : index
    %c0_102 = arith.constant 0 : index
    %c0_103 = arith.constant 0 : index
    %173 = vector.load %arg5[%c7_101, %c0_102, %c0_103] : memref<24x16x16xf32, #tpu.memory_space<vmem>>, vector<1x16x16xf32>
    %174 = vector.shape_cast %173 : vector<1x16x16xf32> to vector<16x16xf32>
    %175 = vector.shape_cast %172 : vector<16x16xf32> to vector<1x16x16xf32>
    tpu.vector_store %arg5[%c7_101, %c0_102, %c0_103], %175 {strides = array<i32>} : memref<24x16x16xf32, #tpu.memory_space<vmem>>, vector<1x16x16xf32>,
    %c8 = arith.constant 8 : index
    %c0_104 = arith.constant 0 : index
    %176 = memref.load %arg2[%c8, %c0_104] : memref<24x4xf32, #tpu.memory_space<smem>>
    %177 = vector.broadcast %176 : f32 to vector<16x16xf32>
    %178 = arith.mulf %1, %177 : vector<16x16xf32>
    %c8_105 = arith.constant 8 : index
    %179 = memref.load %arg3[%c8_105] : memref<24xf32, #tpu.memory_space<smem>>
    %180 = vector.broadcast %179 : f32 to vector<16x16xf32>
    %181 = arith.addf %178, %180 : vector<16x16xf32>
    %c8_106 = arith.constant 8 : index
    %c1_107 = arith.constant 1 : index
    %182 = memref.load %arg2[%c8_106, %c1_107] : memref<24x4xf32, #tpu.memory_space<smem>>
    %183 = vector.broadcast %182 : f32 to vector<16x16xf32>
    %184 = arith.mulf %3, %183 : vector<16x16xf32>
    %185 = arith.addf %181, %184 : vector<16x16xf32>
    %c8_108 = arith.constant 8 : index
    %c2_109 = arith.constant 2 : index
    %186 = memref.load %arg2[%c8_108, %c2_109] : memref<24x4xf32, #tpu.memory_space<smem>>
    %187 = vector.broadcast %186 : f32 to vector<16x16xf32>
    %188 = arith.mulf %5, %187 : vector<16x16xf32>
    %189 = arith.addf %185, %188 : vector<16x16xf32>
    %c8_110 = arith.constant 8 : index
    %c3_111 = arith.constant 3 : index
    %190 = memref.load %arg2[%c8_110, %c3_111] : memref<24x4xf32, #tpu.memory_space<smem>>
    %191 = vector.broadcast %190 : f32 to vector<16x16xf32>
    %192 = arith.mulf %7, %191 : vector<16x16xf32>
    %193 = arith.addf %189, %192 : vector<16x16xf32>
    %c8_112 = arith.constant 8 : index
    %c0_113 = arith.constant 0 : index
    %c0_114 = arith.constant 0 : index
    %194 = vector.load %arg5[%c8_112, %c0_113, %c0_114] : memref<24x16x16xf32, #tpu.memory_space<vmem>>, vector<1x16x16xf32>
    %195 = vector.shape_cast %194 : vector<1x16x16xf32> to vector<16x16xf32>
    %196 = vector.shape_cast %193 : vector<16x16xf32> to vector<1x16x16xf32>
    tpu.vector_store %arg5[%c8_112, %c0_113, %c0_114], %196 {strides = array<i32>} : memref<24x16x16xf32, #tpu.memory_space<vmem>>, vector<1x16x16xf32>,
    %c9 = arith.constant 9 : index
    %c0_115 = arith.constant 0 : index
    %197 = memref.load %arg2[%c9, %c0_115] : memref<24x4xf32, #tpu.memory_space<smem>>
    %198 = vector.broadcast %197 : f32 to vector<16x16xf32>
    %199 = arith.mulf %1, %198 : vector<16x16xf32>
    %c9_116 = arith.constant 9 : index
    %200 = memref.load %arg3[%c9_116] : memref<24xf32, #tpu.memory_space<smem>>
    %201 = vector.broadcast %200 : f32 to vector<16x16xf32>
    %202 = arith.addf %199, %201 : vector<16x16xf32>
    %c9_117 = arith.constant 9 : index
    %c1_118 = arith.constant 1 : index
    %203 = memref.load %arg2[%c9_117, %c1_118] : memref<24x4xf32, #tpu.memory_space<smem>>
    %204 = vector.broadcast %203 : f32 to vector<16x16xf32>
    %205 = arith.mulf %3, %204 : vector<16x16xf32>
    %206 = arith.addf %202, %205 : vector<16x16xf32>
    %c9_119 = arith.constant 9 : index
    %c2_120 = arith.constant 2 : index
    %207 = memref.load %arg2[%c9_119, %c2_120] : memref<24x4xf32, #tpu.memory_space<smem>>
    %208 = vector.broadcast %207 : f32 to vector<16x16xf32>
    %209 = arith.mulf %5, %208 : vector<16x16xf32>
    %210 = arith.addf %206, %209 : vector<16x16xf32>
    %c9_121 = arith.constant 9 : index
    %c3_122 = arith.constant 3 : index
    %211 = memref.load %arg2[%c9_121, %c3_122] : memref<24x4xf32, #tpu.memory_space<smem>>
    %212 = vector.broadcast %211 : f32 to vector<16x16xf32>
    %213 = arith.mulf %7, %212 : vector<16x16xf32>
    %214 = arith.addf %210, %213 : vector<16x16xf32>
    %c9_123 = arith.constant 9 : index
    %c0_124 = arith.constant 0 : index
    %c0_125 = arith.constant 0 : index
    %215 = vector.load %arg5[%c9_123, %c0_124, %c0_125] : memref<24x16x16xf32, #tpu.memory_space<vmem>>, vector<1x16x16xf32>
    %216 = vector.shape_cast %215 : vector<1x16x16xf32> to vector<16x16xf32>
    %217 = vector.shape_cast %214 : vector<16x16xf32> to vector<1x16x16xf32>
    tpu.vector_store %arg5[%c9_123, %c0_124, %c0_125], %217 {strides = array<i32>} : memref<24x16x16xf32, #tpu.memory_space<vmem>>, vector<1x16x16xf32>,
    %c10 = arith.constant 10 : index
    %c0_126 = arith.constant 0 : index
    %218 = memref.load %arg2[%c10, %c0_126] : memref<24x4xf32, #tpu.memory_space<smem>>
    %219 = vector.broadcast %218 : f32 to vector<16x16xf32>
    %220 = arith.mulf %1, %219 : vector<16x16xf32>
    %c10_127 = arith.constant 10 : index
    %221 = memref.load %arg3[%c10_127] : memref<24xf32, #tpu.memory_space<smem>>
    %222 = vector.broadcast %221 : f32 to vector<16x16xf32>
    %223 = arith.addf %220, %222 : vector<16x16xf32>
    %c10_128 = arith.constant 10 : index
    %c1_129 = arith.constant 1 : index
    %224 = memref.load %arg2[%c10_128, %c1_129] : memref<24x4xf32, #tpu.memory_space<smem>>
    %225 = vector.broadcast %224 : f32 to vector<16x16xf32>
    %226 = arith.mulf %3, %225 : vector<16x16xf32>
    %227 = arith.addf %223, %226 : vector<16x16xf32>
    %c10_130 = arith.constant 10 : index
    %c2_131 = arith.constant 2 : index
    %228 = memref.load %arg2[%c10_130, %c2_131] : memref<24x4xf32, #tpu.memory_space<smem>>
    %229 = vector.broadcast %228 : f32 to vector<16x16xf32>
    %230 = arith.mulf %5, %229 : vector<16x16xf32>
    %231 = arith.addf %227, %230 : vector<16x16xf32>
    %c10_132 = arith.constant 10 : index
    %c3_133 = arith.constant 3 : index
    %232 = memref.load %arg2[%c10_132, %c3_133] : memref<24x4xf32, #tpu.memory_space<smem>>
    %233 = vector.broadcast %232 : f32 to vector<16x16xf32>
    %234 = arith.mulf %7, %233 : vector<16x16xf32>
    %235 = arith.addf %231, %234 : vector<16x16xf32>
    %c10_134 = arith.constant 10 : index
    %c0_135 = arith.constant 0 : index
    %c0_136 = arith.constant 0 : index
    %236 = vector.load %arg5[%c10_134, %c0_135, %c0_136] : memref<24x16x16xf32, #tpu.memory_space<vmem>>, vector<1x16x16xf32>
    %237 = vector.shape_cast %236 : vector<1x16x16xf32> to vector<16x16xf32>
    %238 = vector.shape_cast %235 : vector<16x16xf32> to vector<1x16x16xf32>
    tpu.vector_store %arg5[%c10_134, %c0_135, %c0_136], %238 {strides = array<i32>} : memref<24x16x16xf32, #tpu.memory_space<vmem>>, vector<1x16x16xf32>,
    %c11 = arith.constant 11 : index
    %c0_137 = arith.constant 0 : index
    %239 = memref.load %arg2[%c11, %c0_137] : memref<24x4xf32, #tpu.memory_space<smem>>
    %240 = vector.broadcast %239 : f32 to vector<16x16xf32>
    %241 = arith.mulf %1, %240 : vector<16x16xf32>
    %c11_138 = arith.constant 11 : index
    %242 = memref.load %arg3[%c11_138] : memref<24xf32, #tpu.memory_space<smem>>
    %243 = vector.broadcast %242 : f32 to vector<16x16xf32>
    %244 = arith.addf %241, %243 : vector<16x16xf32>
    %c11_139 = arith.constant 11 : index
    %c1_140 = arith.constant 1 : index
    %245 = memref.load %arg2[%c11_139, %c1_140] : memref<24x4xf32, #tpu.memory_space<smem>>
    %246 = vector.broadcast %245 : f32 to vector<16x16xf32>
    %247 = arith.mulf %3, %246 : vector<16x16xf32>
    %248 = arith.addf %244, %247 : vector<16x16xf32>
    %c11_141 = arith.constant 11 : index
    %c2_142 = arith.constant 2 : index
    %249 = memref.load %arg2[%c11_141, %c2_142] : memref<24x4xf32, #tpu.memory_space<smem>>
    %250 = vector.broadcast %249 : f32 to vector<16x16xf32>
    %251 = arith.mulf %5, %250 : vector<16x16xf32>
    %252 = arith.addf %248, %251 : vector<16x16xf32>
    %c11_143 = arith.constant 11 : index
    %c3_144 = arith.constant 3 : index
    %253 = memref.load %arg2[%c11_143, %c3_144] : memref<24x4xf32, #tpu.memory_space<smem>>
    %254 = vector.broadcast %253 : f32 to vector<16x16xf32>
    %255 = arith.mulf %7, %254 : vector<16x16xf32>
    %256 = arith.addf %252, %255 : vector<16x16xf32>
    %c11_145 = arith.constant 11 : index
    %c0_146 = arith.constant 0 : index
    %c0_147 = arith.constant 0 : index
    %257 = vector.load %arg5[%c11_145, %c0_146, %c0_147] : memref<24x16x16xf32, #tpu.memory_space<vmem>>, vector<1x16x16xf32>
    %258 = vector.shape_cast %257 : vector<1x16x16xf32> to vector<16x16xf32>
    %259 = vector.shape_cast %256 : vector<16x16xf32> to vector<1x16x16xf32>
    tpu.vector_store %arg5[%c11_145, %c0_146, %c0_147], %259 {strides = array<i32>} : memref<24x16x16xf32, #tpu.memory_space<vmem>>, vector<1x16x16xf32>,
    %c12 = arith.constant 12 : index
    %c0_148 = arith.constant 0 : index
    %260 = memref.load %arg2[%c12, %c0_148] : memref<24x4xf32, #tpu.memory_space<smem>>
    %261 = vector.broadcast %260 : f32 to vector<16x16xf32>
    %262 = arith.mulf %1, %261 : vector<16x16xf32>
    %c12_149 = arith.constant 12 : index
    %263 = memref.load %arg3[%c12_149] : memref<24xf32, #tpu.memory_space<smem>>
    %264 = vector.broadcast %263 : f32 to vector<16x16xf32>
    %265 = arith.addf %262, %264 : vector<16x16xf32>
    %c12_150 = arith.constant 12 : index
    %c1_151 = arith.constant 1 : index
    %266 = memref.load %arg2[%c12_150, %c1_151] : memref<24x4xf32, #tpu.memory_space<smem>>
    %267 = vector.broadcast %266 : f32 to vector<16x16xf32>
    %268 = arith.mulf %3, %267 : vector<16x16xf32>
    %269 = arith.addf %265, %268 : vector<16x16xf32>
    %c12_152 = arith.constant 12 : index
    %c2_153 = arith.constant 2 : index
    %270 = memref.load %arg2[%c12_152, %c2_153] : memref<24x4xf32, #tpu.memory_space<smem>>
    %271 = vector.broadcast %270 : f32 to vector<16x16xf32>
    %272 = arith.mulf %5, %271 : vector<16x16xf32>
    %273 = arith.addf %269, %272 : vector<16x16xf32>
    %c12_154 = arith.constant 12 : index
    %c3_155 = arith.constant 3 : index
    %274 = memref.load %arg2[%c12_154, %c3_155] : memref<24x4xf32, #tpu.memory_space<smem>>
    %275 = vector.broadcast %274 : f32 to vector<16x16xf32>
    %276 = arith.mulf %7, %275 : vector<16x16xf32>
    %277 = arith.addf %273, %276 : vector<16x16xf32>
    %c12_156 = arith.constant 12 : index
    %c0_157 = arith.constant 0 : index
    %c0_158 = arith.constant 0 : index
    %278 = vector.load %arg5[%c12_156, %c0_157, %c0_158] : memref<24x16x16xf32, #tpu.memory_space<vmem>>, vector<1x16x16xf32>
    %279 = vector.shape_cast %278 : vector<1x16x16xf32> to vector<16x16xf32>
    %280 = vector.shape_cast %277 : vector<16x16xf32> to vector<1x16x16xf32>
    tpu.vector_store %arg5[%c12_156, %c0_157, %c0_158], %280 {strides = array<i32>} : memref<24x16x16xf32, #tpu.memory_space<vmem>>, vector<1x16x16xf32>,
    %c13 = arith.constant 13 : index
    %c0_159 = arith.constant 0 : index
    %281 = memref.load %arg2[%c13, %c0_159] : memref<24x4xf32, #tpu.memory_space<smem>>
    %282 = vector.broadcast %281 : f32 to vector<16x16xf32>
    %283 = arith.mulf %1, %282 : vector<16x16xf32>
    %c13_160 = arith.constant 13 : index
    %284 = memref.load %arg3[%c13_160] : memref<24xf32, #tpu.memory_space<smem>>
    %285 = vector.broadcast %284 : f32 to vector<16x16xf32>
    %286 = arith.addf %283, %285 : vector<16x16xf32>
    %c13_161 = arith.constant 13 : index
    %c1_162 = arith.constant 1 : index
    %287 = memref.load %arg2[%c13_161, %c1_162] : memref<24x4xf32, #tpu.memory_space<smem>>
    %288 = vector.broadcast %287 : f32 to vector<16x16xf32>
    %289 = arith.mulf %3, %288 : vector<16x16xf32>
    %290 = arith.addf %286, %289 : vector<16x16xf32>
    %c13_163 = arith.constant 13 : index
    %c2_164 = arith.constant 2 : index
    %291 = memref.load %arg2[%c13_163, %c2_164] : memref<24x4xf32, #tpu.memory_space<smem>>
    %292 = vector.broadcast %291 : f32 to vector<16x16xf32>
    %293 = arith.mulf %5, %292 : vector<16x16xf32>
    %294 = arith.addf %290, %293 : vector<16x16xf32>
    %c13_165 = arith.constant 13 : index
    %c3_166 = arith.constant 3 : index
    %295 = memref.load %arg2[%c13_165, %c3_166] : memref<24x4xf32, #tpu.memory_space<smem>>
    %296 = vector.broadcast %295 : f32 to vector<16x16xf32>
    %297 = arith.mulf %7, %296 : vector<16x16xf32>
    %298 = arith.addf %294, %297 : vector<16x16xf32>
    %c13_167 = arith.constant 13 : index
    %c0_168 = arith.constant 0 : index
    %c0_169 = arith.constant 0 : index
    %299 = vector.load %arg5[%c13_167, %c0_168, %c0_169] : memref<24x16x16xf32, #tpu.memory_space<vmem>>, vector<1x16x16xf32>
    %300 = vector.shape_cast %299 : vector<1x16x16xf32> to vector<16x16xf32>
    %301 = vector.shape_cast %298 : vector<16x16xf32> to vector<1x16x16xf32>
    tpu.vector_store %arg5[%c13_167, %c0_168, %c0_169], %301 {strides = array<i32>} : memref<24x16x16xf32, #tpu.memory_space<vmem>>, vector<1x16x16xf32>,
    %c14 = arith.constant 14 : index
    %c0_170 = arith.constant 0 : index
    %302 = memref.load %arg2[%c14, %c0_170] : memref<24x4xf32, #tpu.memory_space<smem>>
    %303 = vector.broadcast %302 : f32 to vector<16x16xf32>
    %304 = arith.mulf %1, %303 : vector<16x16xf32>
    %c14_171 = arith.constant 14 : index
    %305 = memref.load %arg3[%c14_171] : memref<24xf32, #tpu.memory_space<smem>>
    %306 = vector.broadcast %305 : f32 to vector<16x16xf32>
    %307 = arith.addf %304, %306 : vector<16x16xf32>
    %c14_172 = arith.constant 14 : index
    %c1_173 = arith.constant 1 : index
    %308 = memref.load %arg2[%c14_172, %c1_173] : memref<24x4xf32, #tpu.memory_space<smem>>
    %309 = vector.broadcast %308 : f32 to vector<16x16xf32>
    %310 = arith.mulf %3, %309 : vector<16x16xf32>
    %311 = arith.addf %307, %310 : vector<16x16xf32>
    %c14_174 = arith.constant 14 : index
    %c2_175 = arith.constant 2 : index
    %312 = memref.load %arg2[%c14_174, %c2_175] : memref<24x4xf32, #tpu.memory_space<smem>>
    %313 = vector.broadcast %312 : f32 to vector<16x16xf32>
    %314 = arith.mulf %5, %313 : vector<16x16xf32>
    %315 = arith.addf %311, %314 : vector<16x16xf32>
    %c14_176 = arith.constant 14 : index
    %c3_177 = arith.constant 3 : index
    %316 = memref.load %arg2[%c14_176, %c3_177] : memref<24x4xf32, #tpu.memory_space<smem>>
    %317 = vector.broadcast %316 : f32 to vector<16x16xf32>
    %318 = arith.mulf %7, %317 : vector<16x16xf32>
    %319 = arith.addf %315, %318 : vector<16x16xf32>
    %c14_178 = arith.constant 14 : index
    %c0_179 = arith.constant 0 : index
    %c0_180 = arith.constant 0 : index
    %320 = vector.load %arg5[%c14_178, %c0_179, %c0_180] : memref<24x16x16xf32, #tpu.memory_space<vmem>>, vector<1x16x16xf32>
    %321 = vector.shape_cast %320 : vector<1x16x16xf32> to vector<16x16xf32>
    %322 = vector.shape_cast %319 : vector<16x16xf32> to vector<1x16x16xf32>
    tpu.vector_store %arg5[%c14_178, %c0_179, %c0_180], %322 {strides = array<i32>} : memref<24x16x16xf32, #tpu.memory_space<vmem>>, vector<1x16x16xf32>,
    %c15 = arith.constant 15 : index
    %c0_181 = arith.constant 0 : index
    %323 = memref.load %arg2[%c15, %c0_181] : memref<24x4xf32, #tpu.memory_space<smem>>
    %324 = vector.broadcast %323 : f32 to vector<16x16xf32>
    %325 = arith.mulf %1, %324 : vector<16x16xf32>
    %c15_182 = arith.constant 15 : index
    %326 = memref.load %arg3[%c15_182] : memref<24xf32, #tpu.memory_space<smem>>
    %327 = vector.broadcast %326 : f32 to vector<16x16xf32>
    %328 = arith.addf %325, %327 : vector<16x16xf32>
    %c15_183 = arith.constant 15 : index
    %c1_184 = arith.constant 1 : index
    %329 = memref.load %arg2[%c15_183, %c1_184] : memref<24x4xf32, #tpu.memory_space<smem>>
    %330 = vector.broadcast %329 : f32 to vector<16x16xf32>
    %331 = arith.mulf %3, %330 : vector<16x16xf32>
    %332 = arith.addf %328, %331 : vector<16x16xf32>
    %c15_185 = arith.constant 15 : index
    %c2_186 = arith.constant 2 : index
    %333 = memref.load %arg2[%c15_185, %c2_186] : memref<24x4xf32, #tpu.memory_space<smem>>
    %334 = vector.broadcast %333 : f32 to vector<16x16xf32>
    %335 = arith.mulf %5, %334 : vector<16x16xf32>
    %336 = arith.addf %332, %335 : vector<16x16xf32>
    %c15_187 = arith.constant 15 : index
    %c3_188 = arith.constant 3 : index
    %337 = memref.load %arg2[%c15_187, %c3_188] : memref<24x4xf32, #tpu.memory_space<smem>>
    %338 = vector.broadcast %337 : f32 to vector<16x16xf32>
    %339 = arith.mulf %7, %338 : vector<16x16xf32>
    %340 = arith.addf %336, %339 : vector<16x16xf32>
    %c15_189 = arith.constant 15 : index
    %c0_190 = arith.constant 0 : index
    %c0_191 = arith.constant 0 : index
    %341 = vector.load %arg5[%c15_189, %c0_190, %c0_191] : memref<24x16x16xf32, #tpu.memory_space<vmem>>, vector<1x16x16xf32>
    %342 = vector.shape_cast %341 : vector<1x16x16xf32> to vector<16x16xf32>
    %343 = vector.shape_cast %340 : vector<16x16xf32> to vector<1x16x16xf32>
    tpu.vector_store %arg5[%c15_189, %c0_190, %c0_191], %343 {strides = array<i32>} : memref<24x16x16xf32, #tpu.memory_space<vmem>>, vector<1x16x16xf32>,
    %c16 = arith.constant 16 : index
    %c0_192 = arith.constant 0 : index
    %344 = memref.load %arg2[%c16, %c0_192] : memref<24x4xf32, #tpu.memory_space<smem>>
    %345 = vector.broadcast %344 : f32 to vector<16x16xf32>
    %346 = arith.mulf %1, %345 : vector<16x16xf32>
    %c16_193 = arith.constant 16 : index
    %347 = memref.load %arg3[%c16_193] : memref<24xf32, #tpu.memory_space<smem>>
    %348 = vector.broadcast %347 : f32 to vector<16x16xf32>
    %349 = arith.addf %346, %348 : vector<16x16xf32>
    %c16_194 = arith.constant 16 : index
    %c1_195 = arith.constant 1 : index
    %350 = memref.load %arg2[%c16_194, %c1_195] : memref<24x4xf32, #tpu.memory_space<smem>>
    %351 = vector.broadcast %350 : f32 to vector<16x16xf32>
    %352 = arith.mulf %3, %351 : vector<16x16xf32>
    %353 = arith.addf %349, %352 : vector<16x16xf32>
    %c16_196 = arith.constant 16 : index
    %c2_197 = arith.constant 2 : index
    %354 = memref.load %arg2[%c16_196, %c2_197] : memref<24x4xf32, #tpu.memory_space<smem>>
    %355 = vector.broadcast %354 : f32 to vector<16x16xf32>
    %356 = arith.mulf %5, %355 : vector<16x16xf32>
    %357 = arith.addf %353, %356 : vector<16x16xf32>
    %c16_198 = arith.constant 16 : index
    %c3_199 = arith.constant 3 : index
    %358 = memref.load %arg2[%c16_198, %c3_199] : memref<24x4xf32, #tpu.memory_space<smem>>
    %359 = vector.broadcast %358 : f32 to vector<16x16xf32>
    %360 = arith.mulf %7, %359 : vector<16x16xf32>
    %361 = arith.addf %357, %360 : vector<16x16xf32>
    %c16_200 = arith.constant 16 : index
    %c0_201 = arith.constant 0 : index
    %c0_202 = arith.constant 0 : index
    %362 = vector.load %arg5[%c16_200, %c0_201, %c0_202] : memref<24x16x16xf32, #tpu.memory_space<vmem>>, vector<1x16x16xf32>
    %363 = vector.shape_cast %362 : vector<1x16x16xf32> to vector<16x16xf32>
    %364 = vector.shape_cast %361 : vector<16x16xf32> to vector<1x16x16xf32>
    tpu.vector_store %arg5[%c16_200, %c0_201, %c0_202], %364 {strides = array<i32>} : memref<24x16x16xf32, #tpu.memory_space<vmem>>, vector<1x16x16xf32>,
    %c17 = arith.constant 17 : index
    %c0_203 = arith.constant 0 : index
    %365 = memref.load %arg2[%c17, %c0_203] : memref<24x4xf32, #tpu.memory_space<smem>>
    %366 = vector.broadcast %365 : f32 to vector<16x16xf32>
    %367 = arith.mulf %1, %366 : vector<16x16xf32>
    %c17_204 = arith.constant 17 : index
    %368 = memref.load %arg3[%c17_204] : memref<24xf32, #tpu.memory_space<smem>>
    %369 = vector.broadcast %368 : f32 to vector<16x16xf32>
    %370 = arith.addf %367, %369 : vector<16x16xf32>
    %c17_205 = arith.constant 17 : index
    %c1_206 = arith.constant 1 : index
    %371 = memref.load %arg2[%c17_205, %c1_206] : memref<24x4xf32, #tpu.memory_space<smem>>
    %372 = vector.broadcast %371 : f32 to vector<16x16xf32>
    %373 = arith.mulf %3, %372 : vector<16x16xf32>
    %374 = arith.addf %370, %373 : vector<16x16xf32>
    %c17_207 = arith.constant 17 : index
    %c2_208 = arith.constant 2 : index
    %375 = memref.load %arg2[%c17_207, %c2_208] : memref<24x4xf32, #tpu.memory_space<smem>>
    %376 = vector.broadcast %375 : f32 to vector<16x16xf32>
    %377 = arith.mulf %5, %376 : vector<16x16xf32>
    %378 = arith.addf %374, %377 : vector<16x16xf32>
    %c17_209 = arith.constant 17 : index
    %c3_210 = arith.constant 3 : index
    %379 = memref.load %arg2[%c17_209, %c3_210] : memref<24x4xf32, #tpu.memory_space<smem>>
    %380 = vector.broadcast %379 : f32 to vector<16x16xf32>
    %381 = arith.mulf %7, %380 : vector<16x16xf32>
    %382 = arith.addf %378, %381 : vector<16x16xf32>
    %c17_211 = arith.constant 17 : index
    %c0_212 = arith.constant 0 : index
    %c0_213 = arith.constant 0 : index
    %383 = vector.load %arg5[%c17_211, %c0_212, %c0_213] : memref<24x16x16xf32, #tpu.memory_space<vmem>>, vector<1x16x16xf32>
    %384 = vector.shape_cast %383 : vector<1x16x16xf32> to vector<16x16xf32>
    %385 = vector.shape_cast %382 : vector<16x16xf32> to vector<1x16x16xf32>
    tpu.vector_store %arg5[%c17_211, %c0_212, %c0_213], %385 {strides = array<i32>} : memref<24x16x16xf32, #tpu.memory_space<vmem>>, vector<1x16x16xf32>,
    %c18 = arith.constant 18 : index
    %c0_214 = arith.constant 0 : index
    %386 = memref.load %arg2[%c18, %c0_214] : memref<24x4xf32, #tpu.memory_space<smem>>
    %387 = vector.broadcast %386 : f32 to vector<16x16xf32>
    %388 = arith.mulf %1, %387 : vector<16x16xf32>
    %c18_215 = arith.constant 18 : index
    %389 = memref.load %arg3[%c18_215] : memref<24xf32, #tpu.memory_space<smem>>
    %390 = vector.broadcast %389 : f32 to vector<16x16xf32>
    %391 = arith.addf %388, %390 : vector<16x16xf32>
    %c18_216 = arith.constant 18 : index
    %c1_217 = arith.constant 1 : index
    %392 = memref.load %arg2[%c18_216, %c1_217] : memref<24x4xf32, #tpu.memory_space<smem>>
    %393 = vector.broadcast %392 : f32 to vector<16x16xf32>
    %394 = arith.mulf %3, %393 : vector<16x16xf32>
    %395 = arith.addf %391, %394 : vector<16x16xf32>
    %c18_218 = arith.constant 18 : index
    %c2_219 = arith.constant 2 : index
    %396 = memref.load %arg2[%c18_218, %c2_219] : memref<24x4xf32, #tpu.memory_space<smem>>
    %397 = vector.broadcast %396 : f32 to vector<16x16xf32>
    %398 = arith.mulf %5, %397 : vector<16x16xf32>
    %399 = arith.addf %395, %398 : vector<16x16xf32>
    %c18_220 = arith.constant 18 : index
    %c3_221 = arith.constant 3 : index
    %400 = memref.load %arg2[%c18_220, %c3_221] : memref<24x4xf32, #tpu.memory_space<smem>>
    %401 = vector.broadcast %400 : f32 to vector<16x16xf32>
    %402 = arith.mulf %7, %401 : vector<16x16xf32>
    %403 = arith.addf %399, %402 : vector<16x16xf32>
    %c18_222 = arith.constant 18 : index
    %c0_223 = arith.constant 0 : index
    %c0_224 = arith.constant 0 : index
    %404 = vector.load %arg5[%c18_222, %c0_223, %c0_224] : memref<24x16x16xf32, #tpu.memory_space<vmem>>, vector<1x16x16xf32>
    %405 = vector.shape_cast %404 : vector<1x16x16xf32> to vector<16x16xf32>
    %406 = vector.shape_cast %403 : vector<16x16xf32> to vector<1x16x16xf32>
    tpu.vector_store %arg5[%c18_222, %c0_223, %c0_224], %406 {strides = array<i32>} : memref<24x16x16xf32, #tpu.memory_space<vmem>>, vector<1x16x16xf32>,
    %c19 = arith.constant 19 : index
    %c0_225 = arith.constant 0 : index
    %407 = memref.load %arg2[%c19, %c0_225] : memref<24x4xf32, #tpu.memory_space<smem>>
    %408 = vector.broadcast %407 : f32 to vector<16x16xf32>
    %409 = arith.mulf %1, %408 : vector<16x16xf32>
    %c19_226 = arith.constant 19 : index
    %410 = memref.load %arg3[%c19_226] : memref<24xf32, #tpu.memory_space<smem>>
    %411 = vector.broadcast %410 : f32 to vector<16x16xf32>
    %412 = arith.addf %409, %411 : vector<16x16xf32>
    %c19_227 = arith.constant 19 : index
    %c1_228 = arith.constant 1 : index
    %413 = memref.load %arg2[%c19_227, %c1_228] : memref<24x4xf32, #tpu.memory_space<smem>>
    %414 = vector.broadcast %413 : f32 to vector<16x16xf32>
    %415 = arith.mulf %3, %414 : vector<16x16xf32>
    %416 = arith.addf %412, %415 : vector<16x16xf32>
    %c19_229 = arith.constant 19 : index
    %c2_230 = arith.constant 2 : index
    %417 = memref.load %arg2[%c19_229, %c2_230] : memref<24x4xf32, #tpu.memory_space<smem>>
    %418 = vector.broadcast %417 : f32 to vector<16x16xf32>
    %419 = arith.mulf %5, %418 : vector<16x16xf32>
    %420 = arith.addf %416, %419 : vector<16x16xf32>
    %c19_231 = arith.constant 19 : index
    %c3_232 = arith.constant 3 : index
    %421 = memref.load %arg2[%c19_231, %c3_232] : memref<24x4xf32, #tpu.memory_space<smem>>
    %422 = vector.broadcast %421 : f32 to vector<16x16xf32>
    %423 = arith.mulf %7, %422 : vector<16x16xf32>
    %424 = arith.addf %420, %423 : vector<16x16xf32>
    %c19_233 = arith.constant 19 : index
    %c0_234 = arith.constant 0 : index
    %c0_235 = arith.constant 0 : index
    %425 = vector.load %arg5[%c19_233, %c0_234, %c0_235] : memref<24x16x16xf32, #tpu.memory_space<vmem>>, vector<1x16x16xf32>
    %426 = vector.shape_cast %425 : vector<1x16x16xf32> to vector<16x16xf32>
    %427 = vector.shape_cast %424 : vector<16x16xf32> to vector<1x16x16xf32>
    tpu.vector_store %arg5[%c19_233, %c0_234, %c0_235], %427 {strides = array<i32>} : memref<24x16x16xf32, #tpu.memory_space<vmem>>, vector<1x16x16xf32>,
    %c20 = arith.constant 20 : index
    %c0_236 = arith.constant 0 : index
    %428 = memref.load %arg2[%c20, %c0_236] : memref<24x4xf32, #tpu.memory_space<smem>>
    %429 = vector.broadcast %428 : f32 to vector<16x16xf32>
    %430 = arith.mulf %1, %429 : vector<16x16xf32>
    %c20_237 = arith.constant 20 : index
    %431 = memref.load %arg3[%c20_237] : memref<24xf32, #tpu.memory_space<smem>>
    %432 = vector.broadcast %431 : f32 to vector<16x16xf32>
    %433 = arith.addf %430, %432 : vector<16x16xf32>
    %c20_238 = arith.constant 20 : index
    %c1_239 = arith.constant 1 : index
    %434 = memref.load %arg2[%c20_238, %c1_239] : memref<24x4xf32, #tpu.memory_space<smem>>
    %435 = vector.broadcast %434 : f32 to vector<16x16xf32>
    %436 = arith.mulf %3, %435 : vector<16x16xf32>
    %437 = arith.addf %433, %436 : vector<16x16xf32>
    %c20_240 = arith.constant 20 : index
    %c2_241 = arith.constant 2 : index
    %438 = memref.load %arg2[%c20_240, %c2_241] : memref<24x4xf32, #tpu.memory_space<smem>>
    %439 = vector.broadcast %438 : f32 to vector<16x16xf32>
    %440 = arith.mulf %5, %439 : vector<16x16xf32>
    %441 = arith.addf %437, %440 : vector<16x16xf32>
    %c20_242 = arith.constant 20 : index
    %c3_243 = arith.constant 3 : index
    %442 = memref.load %arg2[%c20_242, %c3_243] : memref<24x4xf32, #tpu.memory_space<smem>>
    %443 = vector.broadcast %442 : f32 to vector<16x16xf32>
    %444 = arith.mulf %7, %443 : vector<16x16xf32>
    %445 = arith.addf %441, %444 : vector<16x16xf32>
    %c20_244 = arith.constant 20 : index
    %c0_245 = arith.constant 0 : index
    %c0_246 = arith.constant 0 : index
    %446 = vector.load %arg5[%c20_244, %c0_245, %c0_246] : memref<24x16x16xf32, #tpu.memory_space<vmem>>, vector<1x16x16xf32>
    %447 = vector.shape_cast %446 : vector<1x16x16xf32> to vector<16x16xf32>
    %448 = vector.shape_cast %445 : vector<16x16xf32> to vector<1x16x16xf32>
    tpu.vector_store %arg5[%c20_244, %c0_245, %c0_246], %448 {strides = array<i32>} : memref<24x16x16xf32, #tpu.memory_space<vmem>>, vector<1x16x16xf32>,
    %c21 = arith.constant 21 : index
    %c0_247 = arith.constant 0 : index
    %449 = memref.load %arg2[%c21, %c0_247] : memref<24x4xf32, #tpu.memory_space<smem>>
    %450 = vector.broadcast %449 : f32 to vector<16x16xf32>
    %451 = arith.mulf %1, %450 : vector<16x16xf32>
    %c21_248 = arith.constant 21 : index
    %452 = memref.load %arg3[%c21_248] : memref<24xf32, #tpu.memory_space<smem>>
    %453 = vector.broadcast %452 : f32 to vector<16x16xf32>
    %454 = arith.addf %451, %453 : vector<16x16xf32>
    %c21_249 = arith.constant 21 : index
    %c1_250 = arith.constant 1 : index
    %455 = memref.load %arg2[%c21_249, %c1_250] : memref<24x4xf32, #tpu.memory_space<smem>>
    %456 = vector.broadcast %455 : f32 to vector<16x16xf32>
    %457 = arith.mulf %3, %456 : vector<16x16xf32>
    %458 = arith.addf %454, %457 : vector<16x16xf32>
    %c21_251 = arith.constant 21 : index
    %c2_252 = arith.constant 2 : index
    %459 = memref.load %arg2[%c21_251, %c2_252] : memref<24x4xf32, #tpu.memory_space<smem>>
    %460 = vector.broadcast %459 : f32 to vector<16x16xf32>
    %461 = arith.mulf %5, %460 : vector<16x16xf32>
    %462 = arith.addf %458, %461 : vector<16x16xf32>
    %c21_253 = arith.constant 21 : index
    %c3_254 = arith.constant 3 : index
    %463 = memref.load %arg2[%c21_253, %c3_254] : memref<24x4xf32, #tpu.memory_space<smem>>
    %464 = vector.broadcast %463 : f32 to vector<16x16xf32>
    %465 = arith.mulf %7, %464 : vector<16x16xf32>
    %466 = arith.addf %462, %465 : vector<16x16xf32>
    %c21_255 = arith.constant 21 : index
    %c0_256 = arith.constant 0 : index
    %c0_257 = arith.constant 0 : index
    %467 = vector.load %arg5[%c21_255, %c0_256, %c0_257] : memref<24x16x16xf32, #tpu.memory_space<vmem>>, vector<1x16x16xf32>
    %468 = vector.shape_cast %467 : vector<1x16x16xf32> to vector<16x16xf32>
    %469 = vector.shape_cast %466 : vector<16x16xf32> to vector<1x16x16xf32>
    tpu.vector_store %arg5[%c21_255, %c0_256, %c0_257], %469 {strides = array<i32>} : memref<24x16x16xf32, #tpu.memory_space<vmem>>, vector<1x16x16xf32>,
    %c22 = arith.constant 22 : index
    %c0_258 = arith.constant 0 : index
    %470 = memref.load %arg2[%c22, %c0_258] : memref<24x4xf32, #tpu.memory_space<smem>>
    %471 = vector.broadcast %470 : f32 to vector<16x16xf32>
    %472 = arith.mulf %1, %471 : vector<16x16xf32>
    %c22_259 = arith.constant 22 : index
    %473 = memref.load %arg3[%c22_259] : memref<24xf32, #tpu.memory_space<smem>>
    %474 = vector.broadcast %473 : f32 to vector<16x16xf32>
    %475 = arith.addf %472, %474 : vector<16x16xf32>
    %c22_260 = arith.constant 22 : index
    %c1_261 = arith.constant 1 : index
    %476 = memref.load %arg2[%c22_260, %c1_261] : memref<24x4xf32, #tpu.memory_space<smem>>
    %477 = vector.broadcast %476 : f32 to vector<16x16xf32>
    %478 = arith.mulf %3, %477 : vector<16x16xf32>
    %479 = arith.addf %475, %478 : vector<16x16xf32>
    %c22_262 = arith.constant 22 : index
    %c2_263 = arith.constant 2 : index
    %480 = memref.load %arg2[%c22_262, %c2_263] : memref<24x4xf32, #tpu.memory_space<smem>>
    %481 = vector.broadcast %480 : f32 to vector<16x16xf32>
    %482 = arith.mulf %5, %481 : vector<16x16xf32>
    %483 = arith.addf %479, %482 : vector<16x16xf32>
    %c22_264 = arith.constant 22 : index
    %c3_265 = arith.constant 3 : index
    %484 = memref.load %arg2[%c22_264, %c3_265] : memref<24x4xf32, #tpu.memory_space<smem>>
    %485 = vector.broadcast %484 : f32 to vector<16x16xf32>
    %486 = arith.mulf %7, %485 : vector<16x16xf32>
    %487 = arith.addf %483, %486 : vector<16x16xf32>
    %c22_266 = arith.constant 22 : index
    %c0_267 = arith.constant 0 : index
    %c0_268 = arith.constant 0 : index
    %488 = vector.load %arg5[%c22_266, %c0_267, %c0_268] : memref<24x16x16xf32, #tpu.memory_space<vmem>>, vector<1x16x16xf32>
    %489 = vector.shape_cast %488 : vector<1x16x16xf32> to vector<16x16xf32>
    %490 = vector.shape_cast %487 : vector<16x16xf32> to vector<1x16x16xf32>
    tpu.vector_store %arg5[%c22_266, %c0_267, %c0_268], %490 {strides = array<i32>} : memref<24x16x16xf32, #tpu.memory_space<vmem>>, vector<1x16x16xf32>,
    %c23 = arith.constant 23 : index
    %c0_269 = arith.constant 0 : index
    %491 = memref.load %arg2[%c23, %c0_269] : memref<24x4xf32, #tpu.memory_space<smem>>
    %492 = vector.broadcast %491 : f32 to vector<16x16xf32>
    %493 = arith.mulf %1, %492 : vector<16x16xf32>
    %c23_270 = arith.constant 23 : index
    %494 = memref.load %arg3[%c23_270] : memref<24xf32, #tpu.memory_space<smem>>
    %495 = vector.broadcast %494 : f32 to vector<16x16xf32>
    %496 = arith.addf %493, %495 : vector<16x16xf32>
    %c23_271 = arith.constant 23 : index
    %c1_272 = arith.constant 1 : index
    %497 = memref.load %arg2[%c23_271, %c1_272] : memref<24x4xf32, #tpu.memory_space<smem>>
    %498 = vector.broadcast %497 : f32 to vector<16x16xf32>
    %499 = arith.mulf %3, %498 : vector<16x16xf32>
    %500 = arith.addf %496, %499 : vector<16x16xf32>
    %c23_273 = arith.constant 23 : index
    %c2_274 = arith.constant 2 : index
    %501 = memref.load %arg2[%c23_273, %c2_274] : memref<24x4xf32, #tpu.memory_space<smem>>
    %502 = vector.broadcast %501 : f32 to vector<16x16xf32>
    %503 = arith.mulf %5, %502 : vector<16x16xf32>
    %504 = arith.addf %500, %503 : vector<16x16xf32>
    %c23_275 = arith.constant 23 : index
    %c3_276 = arith.constant 3 : index
    %505 = memref.load %arg2[%c23_275, %c3_276] : memref<24x4xf32, #tpu.memory_space<smem>>
    %506 = vector.broadcast %505 : f32 to vector<16x16xf32>
    %507 = arith.mulf %7, %506 : vector<16x16xf32>
    %508 = arith.addf %504, %507 : vector<16x16xf32>
    %c23_277 = arith.constant 23 : index
    %c0_278 = arith.constant 0 : index
    %c0_279 = arith.constant 0 : index
    %509 = vector.load %arg5[%c23_277, %c0_278, %c0_279] : memref<24x16x16xf32, #tpu.memory_space<vmem>>, vector<1x16x16xf32>
    %510 = vector.shape_cast %509 : vector<1x16x16xf32> to vector<16x16xf32>
    %511 = vector.shape_cast %508 : vector<16x16xf32> to vector<1x16x16xf32>
    tpu.vector_store %arg5[%c23_277, %c0_278, %c0_279], %511 {strides = array<i32>} : memref<24x16x16xf32, #tpu.memory_space<vmem>>, vector<1x16x16xf32>,
    %c0_280 = arith.constant 0 : index
    %c0_281 = arith.constant 0 : index
    %c0_282 = arith.constant 0 : index
    %512 = vector.load %arg5[%c0_280, %c0_281, %c0_282] : memref<24x16x16xf32, #tpu.memory_space<vmem>>, vector<8x16x16xf32>
    %c8_283 = arith.constant 8 : index
    %c0_284 = arith.constant 0 : index
    %c0_285 = arith.constant 0 : index
    %513 = vector.load %arg5[%c8_283, %c0_284, %c0_285] : memref<24x16x16xf32, #tpu.memory_space<vmem>>, vector<8x16x16xf32>
    %c16_286 = arith.constant 16 : index
    %c0_287 = arith.constant 0 : index
    %c0_288 = arith.constant 0 : index
    %514 = vector.load %arg5[%c16_286, %c0_287, %c0_288] : memref<24x16x16xf32, #tpu.memory_space<vmem>>, vector<8x16x16xf32>
    "tpu.trace_start"() <{level = 10 : i32, message = "ehw,egw->ehg"}> : () -> ()
    %cst = arith.constant dense<0.000000e+00> : vector<8x16x16xf32>
    %515 = tpu.matmul %512, %513, %cst {dimension_numbers = #tpu.dot_dimension_numbers<[2], [2], [1], [1], [0, 0, 0, 1, 1, 1], [0], [0]>} : vector<8x16x16xf32>, vector<8x16x16xf32>, vector<8x16x16xf32> -> vector<8x16x16xf32>
    "tpu.trace_stop"() : () -> ()
    %cst_289 = arith.constant 0.353553385 : f32
    %516 = vector.broadcast %cst_289 : f32 to vector<8x16x16xf32>
    %517 = arith.mulf %515, %516 : vector<8x16x16xf32>
    %cst_290 = arith.constant dense<0xFF800000> : vector<8x16xf32>
    %518 = vector.multi_reduction <maximumf>, %517, %cst_290 [2] : vector<8x16x16xf32> to vector<8x16xf32>
    %519 = vector.shape_cast %518 : vector<8x16xf32> to vector<8x16x1xf32>
    %520 = vector.broadcast %519 : vector<8x16x1xf32> to vector<8x16x16xf32>
    %521 = arith.subf %517, %520 : vector<8x16x16xf32>
    %522 = math.exp %521 : vector<8x16x16xf32>
    %cst_291 = arith.constant dense<0.000000e+00> : vector<8x16xf32>
    %523 = vector.multi_reduction <add>, %522, %cst_291 [2] : vector<8x16x16xf32> to vector<8x16xf32>
    %524 = vector.shape_cast %523 : vector<8x16xf32> to vector<8x16x1xf32>
    %525 = tpu.reciprocal %524 {approx = true} : vector<8x16x1xf32> -> vector<8x16x1xf32>
    %526 = vector.broadcast %525 : vector<8x16x1xf32> to vector<8x16x16xf32>
    %527 = arith.mulf %522, %526 : vector<8x16x16xf32>
    %528 = tpu.transpose %512, [0, 2, 1] : vector<8x16x16xf32> -> vector<8x16x16xf32>
    "tpu.trace_start"() <{level = 10 : i32, message = "ewh,ehv->ewv"}> : () -> ()
    %cst_292 = arith.constant dense<0.000000e+00> : vector<8x16x16xf32>
    %529 = tpu.matmul %528, %513, %cst_292 {dimension_numbers = #tpu.dot_dimension_numbers<[2], [1], [1], [2], [0, 0, 0, 1, 1, 2], [0], [0]>} : vector<8x16x16xf32>, vector<8x16x16xf32>, vector<8x16x16xf32> -> vector<8x16x16xf32>
    "tpu.trace_stop"() : () -> ()
    %cst_293 = arith.constant 0.353553385 : f32
    %530 = vector.broadcast %cst_293 : f32 to vector<8x16x16xf32>
    %531 = arith.mulf %529, %530 : vector<8x16x16xf32>
    %cst_294 = arith.constant dense<0xFF800000> : vector<8x16xf32>
    %532 = vector.multi_reduction <maximumf>, %531, %cst_294 [1] : vector<8x16x16xf32> to vector<8x16xf32>
    %533 = vector.shape_cast %532 : vector<8x16xf32> to vector<8x1x16xf32>
    %534 = vector.broadcast %533 : vector<8x1x16xf32> to vector<8x16x16xf32>
    %535 = arith.subf %531, %534 : vector<8x16x16xf32>
    %536 = math.exp %535 : vector<8x16x16xf32>
    %cst_295 = arith.constant dense<0.000000e+00> : vector<8x16xf32>
    %537 = vector.multi_reduction <add>, %536, %cst_295 [1] : vector<8x16x16xf32> to vector<8x16xf32>
    %538 = vector.shape_cast %537 : vector<8x16xf32> to vector<8x1x16xf32>
    %539 = tpu.reciprocal %538 {approx = true} : vector<8x1x16xf32> -> vector<8x1x16xf32>
    %540 = vector.broadcast %539 : vector<8x1x16xf32> to vector<8x16x16xf32>
    %541 = arith.mulf %536, %540 : vector<8x16x16xf32>
    "tpu.trace_start"() <{level = 10 : i32, message = "ehg,egw->ehw"}> : () -> ()
    %cst_296 = arith.constant dense<0.000000e+00> : vector<8x16x16xf32>
    %542 = tpu.matmul %527, %514, %cst_296 {dimension_numbers = #tpu.dot_dimension_numbers<[2], [1], [1], [2], [0, 0, 0, 1, 1, 2], [0], [0]>} : vector<8x16x16xf32>, vector<8x16x16xf32>, vector<8x16x16xf32> -> vector<8x16x16xf32>
    "tpu.trace_stop"() : () -> ()
    "tpu.trace_start"() <{level = 10 : i32, message = "ehw,ewv->ehv"}> : () -> ()
    %cst_297 = arith.constant dense<0.000000e+00> : vector<8x16x16xf32>
    %543 = tpu.matmul %542, %541, %cst_297 {dimension_numbers = #tpu.dot_dimension_numbers<[2], [1], [1], [2], [0, 0, 0, 1, 1, 2], [0], [0]>} : vector<8x16x16xf32>, vector<8x16x16xf32>, vector<8x16x16xf32> -> vector<8x16x16xf32>
    "tpu.trace_stop"() : () -> ()
    %c0_298 = arith.constant 0 : index
    %c0_299 = arith.constant 0 : index
    %c0_300 = arith.constant 0 : index
    %c0_301 = arith.constant 0 : index
    %544 = vector.load %arg4[%c0_298, %c0_299, %c0_300, %c0_301] : memref<1x8x16x16xf32, #tpu.memory_space<vmem>>, vector<1x8x16x16xf32>
    %545 = vector.shape_cast %544 : vector<1x8x16x16xf32> to vector<8x16x16xf32>
    %546 = vector.shape_cast %543 : vector<8x16x16xf32> to vector<1x8x16x16xf32>
    tpu.vector_store %arg4[%c0_298, %c0_299, %c0_300, %c0_301], %546 {strides = array<i32>} : memref<1x8x16x16xf32, #tpu.memory_space<vmem>>, vector<1x8x16x16xf32>,
    return
  }
  func.func @transform_0(%arg0: i32) -> (i32, i32, i32, i32) {
    %c0_i32 = arith.constant 0 : i32
    %c0_i32_0 = arith.constant 0 : i32
    %c0_i32_1 = arith.constant 0 : i32
    %c0_i32_2 = arith.constant 0 : i32
    return %arg0, %c0_i32, %c0_i32_0, %c0_i32_1 : i32, i32, i32, i32
  }
  func.func @transform_1(%arg0: i32) -> (i32, i32) {
    %c0_i32 = arith.constant 0 : i32
    %c0_i32_0 = arith.constant 0 : i32
    %c0_i32_1 = arith.constant 0 : i32
    return %c0_i32, %c0_i32_0 : i32, i32
  }
  func.func @transform_2(%arg0: i32) -> i32 {
    %c0_i32 = arith.constant 0 : i32
    %c0_i32_0 = arith.constant 0 : i32
    return %c0_i32 : i32
  }
  func.func @transform_3(%arg0: i32) -> (i32, i32, i32, i32) {
    %c0_i32 = arith.constant 0 : i32
    %c0_i32_0 = arith.constant 0 : i32
    %c0_i32_1 = arith.constant 0 : i32
    %c0_i32_2 = arith.constant 0 : i32
    return %arg0, %c0_i32, %c0_i32_0, %c0_i32_1 : i32, i32, i32, i32
  }
}

</mosaic_0001>

<bundles_post_ra>
// kernel: tpu_custom_call.1
= control target key start
LH: loop header
LB: loop body
LE: loop exit
PB: predicated region body
PF: predicated region fallthrough
CT: control target
= control target key end

     0   :  { %8 = vsyncpa [#allocation4], 0  ;;  %s6891_s0 = inlined_call_operand.hbm [shape: f32[2,4,16,16], index: 0, kind: input, shape index: {}]   ;;  %s6892_s1 = inlined_call_operand.vmem [shape: f32[24,4], index: 1, kind: input, shape index: {}]   ;;  %s6893_s2 = inlined_call_operand.vmem [shape: f32[24], index: 2, kind: input, shape index: {}]   ;;  %s6894_s3 = inlined_call_operand.hbm [shape: f32[2,8,16,16], index: 3, kind: output, shape index: {}]  }
   0x1   :  { %10 = vsyncpa [#allocation4 + $0x1], 0 }
   0x2   :  { %11 = vsyncpa [#allocation6], 0 }
   0x3   :  { %12 = vsyncpa [#allocation9], 0 }
   0x4   :  { %13 = vsyncpa [#allocation5], 0 }
   0x5   :  { %15 = vsyncpa [#allocation5 + $0x1], 0  ;;  %s5494_s12 = smov 0   ;;  %s5496_s13 = smov 0  }
   0x6   :  { %s5498_s14 = smov 0   ;;  %s5500_s15 = smov 0  }
   0x7 LB: > { %s5515_s16 = sadd.s32 4294967295, %s5464_s15   ;;  %s4418_s17 = sadd.s32 4294967294, %s5464_s15   ;;  %s5464_s15 = sphi %s5500_s15, %s6932_s15   ;;  %s5460_s14 = sphi %s5498_s14, %s6931_s14   ;;  %s5456_s13 = sphi %s5496_s13, %s6930_s13   ;;  %s5452_s12 = sphi %s5494_s12, %s6929_s12  }
   0x8   : > { %p41_p0 = scmp.ne.s32.totalorder %s5456_s13, %s5452_s12  ;;  %p6895_p1 = scmp.eq.s32.totalorder %s5515_s16, 0 }
   0x9   : > { %p113_p3 = scmp.eq.s32.totalorder %s4418_s17, 1  ;;  %p4419_p5 = scmp.ge.s32.totalorder %s5464_s15, 1 }
   0xa   : > { %p5524_p4 = por %p6895_p1, %p41_p0  ;;  %p120_p7 = scmp.lt.s32.totalorder %s5464_s15, 3 }
   0xb   : > { %p5529_p6 = por %p113_p3, %p41_p0  ;;  %s132_s22 = sshll.u32 %s6892_s1, 4  ;;  %s133_s22 = int_to_ptr.vmem [resolvable:$true] %s132_s22 }
   0xc   : > { %s6901_s18 = scalar_select %p5524_p4, 1, 0 }
   0xd   : > { %s6902_s19 = scalar_select %p5529_p6, 1, 0 }
   0xe   : > { %p5537_p8 = pnand %p4419_p5, %p120_p7  ;;  %s146_s26 = sshll.u32 %s6893_s2, 4  ;;  %s147_s26 = int_to_ptr.vmem [resolvable:$true] %s146_s26 }
   0xf   : > { %s5330_s28 = scalar_lea.vmem %s133_s22, 384  ;;  %p5338_p5 = scmp.lt.s32.totalorder %s133_s22, %s133_s22 }
  0x10   : > { %p5150_p9 = pneg %p5537_p8  ;;  %p5331_p12 = scmp.ne.s32.totalorder %s133_s22, %s5330_s28 }
  0x11   : > { %p5339_p7 = scmp.lt.s32.totalorder %s5330_s28, %s5330_s28 }
  0x12   : > { %p5549_p11 = pnand %p5150_p9, %p6895_p1 }
  0x13   : > { %p5340_p10 = por %p5339_p7, %p5338_p5 }
  0x14   : > { %p5332_p13 = pneg %p5549_p11 }
  0x16   : > { %p5333_p0 = pnand %p5332_p13, %p5331_p12 }
  0x18   : > { %p5334_p3 = pneg %p5333_p0 }
  0x1a   : > { %p5341_p2 = pnand %p5340_p10, %p5334_p3 }
  0x1c   : > { %5344 = shalt.err (!%p5341_p2)
}
  0x1d   : > { %s5466_s29 = smov [#allocation7]   ;;  %s5467_s30 = smov 128  }
  0x1e   : > { %s5468_s4 = smov 8   ;;  %s5345_s5 = scalar_lea.vmem %s147_s26, 16 }
  0x1f   : > { %5153 = dma.vmem_to_smem (!%p5549_p11), %s133_s22, 384, %s5466_s29, [#allocation6], %s5467_s30, %s5467_s30, %s5468_s4  }
  0x20   : > { %p5346_p9 = scmp.ne.s32.totalorder %s147_s26, %s5345_s5  ;;  %p5353_p1 = scmp.lt.s32.totalorder %s147_s26, %s147_s26 }
  0x21   : > { %p5354_p5 = scmp.lt.s32.totalorder %s5345_s5, %s5345_s5 }
  0x22   : > { %p5348_p12 = pnand %p5346_p9, %p5332_p13 }
  0x23   : > { %p5355_p10 = por %p5354_p5, %p5353_p1 }
  0x24   : > { %p5349_p0 = pneg %p5348_p12 }
  0x26   : > { %p5356_p2 = pnand %p5355_p10, %p5349_p0 }
  0x28   : > { %5359 = shalt.err (!%p5356_p2)
}
  0x29   : > { %s5469_s6 = smov [#allocation8]   ;;  %s5569_s7 = sadd.s32 1, %s5464_s15  }
  0x2a   : > { %5156 = dma.vmem_to_smem (!%p5549_p11), %s147_s26, 16, %s5469_s6, [#allocation9]  }
  0x2b   : > { %s28_s8 = sadd.s32 1, %s5460_s14  ;;  %s25_s9 = ssub.s32 %s5464_s15, %s5569_s7 }
  0x2c   : > { %p35_p1 = scmp.ne.s32.totalorder %s5460_s14, %s5456_s13  ;;  %p26_p13 = scmp.eq.s32.totalorder %s25_s9, 0 }
  0x2d   : > { %p36_p3 = scmp.eq.s32.totalorder %s5464_s15, 0  ;;  %p6905_p7 = scmp.eq.s32.totalorder %s5515_s16, 1 }
  0x2e   : > { %p5167_p12 = scmp.lt.s32.totalorder %s5464_s15, 2  ;;  %s157_s17 = sand.u32 1, %s5460_s14  }
  0x2f   : > { %p5579_p9 = por %p6905_p7, %p35_p1  ;;  %p37_p0 = por %p36_p3, %p35_p1 }
  0x30   : > { %s5585_s11 = scalar_select %p26_p13, %s5460_s14, %s28_s8  }
  0x31   : > { %s6906_s10 = scalar_select %p5579_p9, 1, 0 }
  0x32   : > { %s4423_s20 = sshll.u32 %s157_s17, 6  ;;  %s4640_s21 = sshll.u32 %s5464_s15, 10 }
  0x33   : > { %s5592_s25 = scalar_lea.hbm %s6891_s0, %s4640_s21  ;;  %s161_s26 = scalar_lea.vmem [#allocation3], %s4423_s20 }
  0x34   : > { %s168_s27 = sshll.u32 %s161_s26, 4  ;;  %p5596_p11 = pnand %p5167_p12, %p37_p0  ;;  %s5594_s27 = int_to_ptr.vmem [resolvable:$true] %s168_s27 }
  0x35   : > { %s5600_s29 = scalar_lea.sflag [#allocation4], %s157_s17  ;;  %s5360_s5 = scalar_lea.hbm %s5592_s25, 1024 }
  0x36   : > { %p5361_p5 = scmp.ne.s32.totalorder %s5592_s25, %s5360_s5  ;;  %p5362_p10 = pneg %p5596_p11 }
  0x37   : > { %s5365_s9 = scalar_lea.hbm %s6891_s0, 2048  ;;  %p5366_p13 = scmp.lt.u32.totalorder %s5592_s25, %s6891_s0 }
  0x38   : > { %p5363_p2 = pnand %p5362_p10, %p5361_p5  ;;  %p5367_p3 = scmp.lt.u32.totalorder %s5365_s9, %s5360_s5 }
  0x39   : > { %p5369_p12 = scmp.lt.u32.totalorder %s5360_s5, %s5592_s25 }
  0x3a   : > { %p5364_p1 = pneg %p5363_p2  ;;  %p5368_p7 = por %p5367_p3, %p5366_p13 }
  0x3c   : > { %p5370_p0 = por %p5369_p12, %p5368_p7 }
  0x3e   : > { %p5371_p6 = pnand %p5370_p0, %p5364_p1 }
  0x40   : > { %5374 = shalt.err (!%p5371_p6)
}
  0x41   : > { %s5375_s17 = scalar_lea.vmem %s5594_s27, 1024  ;;  %s5470_s22 = smov [#allocation3]  }
  0x42   : > { %p5376_p5 = scmp.ne.s32.totalorder %s5594_s27, %s5375_s17  ;;  %s5380_s24 = sshll.u32 %s5470_s22, 4  ;;  %s5381_s24 = int_to_ptr.vmem [resolvable:$false] %s5380_s24 }
  0x43   : > { %s5382_s26 = scalar_lea.vmem %s5381_s24, 2048  ;;  %p5383_p4 = scmp.lt.s32.totalorder %s5594_s27, %s5381_s24 }
  0x44   : > { %p5378_p2 = pnand %p5376_p5, %p5362_p10  ;;  %p5384_p13 = scmp.lt.s32.totalorder %s5382_s26, %s5375_s17 }
  0x46   : > { %p5379_p9 = pneg %p5378_p2  ;;  %p5385_p3 = por %p5384_p13, %p5383_p4 }
  0x48   : > { %p5386_p7 = pnand %p5385_p3, %p5379_p9 }
  0x4a   : > { %5389 = shalt.err (!%p5386_p7)
}
  0x4b   : > { %5160 = dma.hbm_to_vmem [thread:$0]  (!%p5596_p11), %s5592_s25, 1024, %s5594_s27, %s5600_s29, %s5467_s30, %s5467_s30, %s5468_s4  }
  0x4c   : > { %180 = sbr.rel (%p5537_p8) target bundleno = 1179 (0x49b), region = 32 }
  0x53   : > { %s5634_s5 = sand.u32 1, %s5456_s13   ;;  %p6908_p4 = scmp.ne.s32.totalorder %s6901_s18, 0 }
  0x54   : > { %s4427_s6 = sshll.u32 %s5634_s5, 6  ;;  %s183_s8 = scalar_lea.sflag [#allocation4], %s5634_s5 }
  0x55   : > { %s5638_s9 = scalar_lea.vmem [#allocation3], %s4427_s6 }
  0x56   : > { %5435 = dma.done.wait (%p6908_p4), %s183_s8, 1024  }
  0x57   : > { %5437 = vsyncadd (%p6908_p4), %s183_s8, 4294966272  ;;  %p6909_p6 = scmp.eq.s32.totalorder %s5515_s16, 0 }
  0x59   : > { %5439 = dma.done.wait (%p6909_p6), [#allocation6], 384   ;;  %p6910_p8 = pmov %p6909_p6 }
  0x5a   : > { %p6911_p9 = pmov %p6909_p6 }
  0x5b   : > { %5441 = vsyncadd (%p6910_p8), [#allocation6], 4294966912 }
  0x5c   : > { %5443 = dma.done.wait (%p6911_p9), [#allocation9], 16   ;;  %p6912_p11 = pmov %p6909_p6 }
  0x5e   : > { %5445 = vsyncadd (%p6912_p11), [#allocation9], 4294967280 }
  0x5f   : > { %199 = sfence }
  0x60   : > { %s4475_s23 = sld [smem:[#allocation7 + $0x400]]  ;;  %s4477_s30 = sld [smem:[#allocation7 + $0x401]]  ;;  %v5659_v0 = vld [vmem:[%s5638_s9] sm:$0xff]  ;;  %v5662_v1 = vld [vmem:[%s5638_s9 + $0x8] sm:$0xff]  ;;  %v5669_v2 = vld [vmem:[%s5638_s9 + $0x10] sm:$0xff]  ;;  %vm255_vm0 = vcmask 130048  }
  0x61   : > { %s4476_s18 = sld [smem:[#allocation8 + $0x8]]  ;;  %s5652_s4 = sld [smem:[#allocation7 + $0x402]]  ;;  %v5672_v3 = vld [vmem:[%s5638_s9 + $0x18] sm:$0xff]  ;;  %v5679_v5 = vld [vmem:[%s5638_s9 + $0x20] sm:$0xff]  ;;  %v5682_v6 = vld [vmem:[%s5638_s9 + $0x28] sm:$0xff] }
  0x62   : > { %s5654_s25 = sld [smem:[#allocation7 + $0x403]]  ;;  %s5656_s27 = sld [smem:[#allocation7 + $0x480]]  ;;  %v5687_v10 = vld [vmem:[%s5638_s9 + $0x30] sm:$0xff]  ;;  %v5690_v11 = vld [vmem:[%s5638_s9 + $0x38] sm:$0xff]  ;;  %vm5775_vm1 = vmpackc.low %vm255_vm0, %vm255_vm0 }
  0x63   : > { %s5664_s28 = sld [smem:[#allocation8 + $0x9]]  ;;  %s5674_s20 = sld [smem:[#allocation7 + $0x482]] }
  0x64   : > { %s5666_s29 = sld [smem:[#allocation7 + $0x481]]  ;;  %s5676_s21 = sld [smem:[#allocation7 + $0x483]] }
  0x65   : > { %s5693_s17 = sld [smem:[#allocation7]]  ;;  %s5699_s24 = sld [smem:[#allocation7 + $0x1]] }
  0x66   : > { %v462_v4 = vstv %s4475_s23  ;;  %v470_v12 = vstv %s4477_s30  ;;  %s5695_s22 = sld [smem:[#allocation8]]  ;;  %s5701_s26 = sld [smem:[#allocation7 + $0x2]] }
  0x67   : > { %v463_v7 = vmul.f32 %v462_v4, %v5659_v0  ;;  %v464_v8 = vmul.f32 %v462_v4, %v5662_v1  ;;  %v466_v9 = vstv %s4476_s18  ;;  %v476_v13 = vstv %s5652_s4  ;;  %s5713_s6 = sld [smem:[#allocation7 + $0x3]]  ;;  %s5715_s8 = sld [smem:[#allocation7 + $0x80]] }
  0x68   : > { %v471_v16 = vmul.f32 %v5669_v2, %v470_v12  ;;  %v472_v17 = vmul.f32 %v5672_v3, %v470_v12  ;;  %v477_v18 = vmul.f32 %v5679_v5, %v476_v13  ;;  %v478_v19 = vmul.f32 %v5682_v6, %v476_v13  ;;  %s5719_s23 = sld [smem:[#allocation8 + $0x1]]  ;;  %s5729_s30 = sld [smem:[#allocation7 + $0x82]] }
  0x69   : > { %v467_v14 = vadd.f32 %v466_v9, %v463_v7  ;;  %v468_v15 = vadd.f32 %v466_v9, %v464_v8  ;;  %v482_v20 = vstv %s5654_s25  ;;  %v491_v21 = vstv %s5656_s27  ;;  %s5721_s18 = sld [smem:[#allocation7 + $0x81]]  ;;  %s5731_s4 = sld [smem:[#allocation7 + $0x83]] }
  0x6a   : > { %v483_v24 = vmul.f32 %v5687_v10, %v482_v20  ;;  %v484_v25 = vmul.f32 %v5690_v11, %v482_v20  ;;  %v492_v26 = vmul.f32 %v491_v21, %v5659_v0  ;;  %v493_v27 = vmul.f32 %v491_v21, %v5662_v1  ;;  %s5745_s25 = sld [smem:[#allocation7 + $0x500]]  ;;  %s5747_s27 = sld [smem:[#allocation8 + $0xa]] }
  0x6b   : > { %v473_v22 = vadd.f32 %v471_v16, %v467_v14  ;;  %v474_v23 = vadd.f32 %v472_v17, %v468_v15  ;;  %v495_v28 = vstv %s5664_s28  ;;  %v499_v29 = vstv %s5666_s29  ;;  %s5749_s28 = sld [smem:[#allocation7 + $0x501]]  ;;  %s5751_s29 = sld [smem:[#allocation7 + $0x502]] }
  0x6c   : > { %v500_v32 = vmul.f32 %v5669_v2, %v499_v29  ;;  %v501_v33 = vmul.f32 %v5672_v3, %v499_v29  ;;  %v496_v34 = vadd.f32 %v495_v28, %v492_v26  ;;  %v497_v35 = vadd.f32 %v495_v28, %v493_v27  ;;  %p6926_p1 = scmp.ne.s32.totalorder %s6906_s10, 0 }
  0x6d   : > { %v479_v30 = vadd.f32 %v477_v18, %v473_v22  ;;  %v480_v31 = vadd.f32 %v478_v19, %v474_v23  ;;  %v505_v36 = vstv %s5674_s20  ;;  %v511_v37 = vstv %s5676_s21  ;;  %s5761_s20 = sld [smem:[#allocation7 + $0x503]]  ;;  %s5769_s21 = sld [smem:[#allocation7 + $0x580]] }
  0x6e   : > { %v506_v40 = vmul.f32 %v5679_v5, %v505_v36  ;;  %v507_v41 = vmul.f32 %v5682_v6, %v505_v36  ;;  %v502_v42 = vadd.f32 %v500_v32, %v496_v34  ;;  %v503_v43 = vadd.f32 %v501_v33, %v497_v35 }
  0x6f   : > { %v485_v38 = vadd.f32 %v483_v24, %v479_v30  ;;  %v486_v39 = vadd.f32 %v484_v25, %v480_v31  ;;  %v512_v44 = vmul.f32 %v5687_v10, %v511_v37  ;;  %v513_v45 = vmul.f32 %v5690_v11, %v511_v37 }
  0x70   : > { %v230_v46 = vstv %s5693_s17  ;;  %v234_v47 = vstv %s5695_s22  ;;  %v238_v48 = vstv %s5699_s24  ;;  %v244_v49 = vstv %s5701_s26  ;;  %s5771_s17 = sld [smem:[#allocation8 + $0xb]]  ;;  %s5786_s22 = sld [smem:[#allocation7 + $0x581]] }
  0x71   : > { %488 = vst.msk [vmem:[#allocation2 + $0x80] sm:$0xff] %vm255_vm0, %v485_v38  ;;  %489 = vst.msk [vmem:[#allocation2 + $0x88] sm:$0xff] %vm255_vm0, %v486_v39  ;;  %v508_v50 = vadd.f32 %v506_v40, %v502_v42  ;;  %v509_v51 = vadd.f32 %v507_v41, %v503_v43  ;;  %v231_v52 = vmul.f32 %v230_v46, %v5659_v0  ;;  %v250_v62 = vstv %s5713_s6  ;;  %s5788_s24 = sld [smem:[#allocation7 + $0x582]]  ;;  %s5811_s26 = sld [smem:[#allocation7 + $0x583]] }
  0x72   : > { %v232_v53 = vmul.f32 %v230_v46, %v5662_v1  ;;  %v239_v54 = vmul.f32 %v5669_v2, %v238_v48  ;;  %v240_v55 = vmul.f32 %v5672_v3, %v238_v48  ;;  %v245_v56 = vmul.f32 %v5679_v5, %v244_v49  ;;  %s5816_s6 = sld [smem:[#allocation7 + $0x100]] }
  0x73   : > { %v246_v57 = vmul.f32 %v5682_v6, %v244_v49  ;;  %v514_v58 = vadd.f32 %v512_v44, %v508_v50  ;;  %v515_v59 = vadd.f32 %v513_v45, %v509_v51  ;;  %v235_v60 = vadd.f32 %v234_v47, %v231_v52 }
  0x74   : > { %v236_v61 = vadd.f32 %v234_v47, %v232_v53  ;;  %v259_v63 = vstv %s5715_s8  ;;  %v263_v4 = vstv %s5719_s23  ;;  %v267_v7 = vstv %s5721_s18  ;;  %s5821_s8 = sld [smem:[#allocation8 + $0x2]]  ;;  %s5823_s23 = sld [smem:[#allocation7 + $0x101]] }
  0x75   : > { %517 = vst.msk [vmem:[#allocation2 + $0x90] sm:$0xff] %vm255_vm0, %v514_v58  ;;  %518 = vst.msk [vmem:[#allocation2 + $0x98] sm:$0xff] %vm255_vm0, %v515_v59  ;;  %v241_v8 = vadd.f32 %v239_v54, %v235_v60  ;;  %v251_v9 = vmul.f32 %v5687_v10, %v250_v62  ;;  %v252_v12 = vmul.f32 %v5690_v11, %v250_v62  ;;  %v273_v23 = vstv %s5729_s30  ;;  %s5833_s18 = sld [smem:[#allocation7 + $0x102]]  ;;  %s5845_s30 = sld [smem:[#allocation7 + $0x103]] }
  0x76   : > { %v242_v13 = vadd.f32 %v240_v55, %v236_v61  ;;  %v260_v14 = vmul.f32 %v259_v63, %v5659_v0  ;;  %v261_v15 = vmul.f32 %v259_v63, %v5662_v1  ;;  %v268_v16 = vmul.f32 %v5669_v2, %v267_v7 }
  0x77   : > { %v5767_v17 = vmul.f32 %v5672_v3, %v267_v7  ;;  %v247_v21 = vadd.f32 %v245_v56, %v241_v8  ;;  %v279_v24 = vstv %s5731_s4  ;;  %v274_v28 = vmul.f32 %v5679_v5, %v273_v23  ;;  %s5847_s4 = sld [smem:[#allocation7 + $0x180]] }
  0x78   : > { %v941_v18 = vld [vmem:[#allocation2 + $0x80] sm:$0xff]  ;;  %v942_v19 = vld [vmem:[#allocation2 + $0x88] sm:$0xff]  ;;  %v248_v22 = vadd.f32 %v246_v57, %v242_v13  ;;  %v264_v26 = vadd.f32 %v263_v4, %v260_v14  ;;  %v5783_v27 = vadd.f32 %v263_v4, %v261_v15  ;;  %v5791_v31 = vmul.f32 %v5682_v6, %v273_v23 }
  0x79   : > { %v5781_v25 = vpack.c.bf16 %v942_v19, %v941_v18  ;;  %v253_v29 = vadd.f32 %v251_v9, %v247_v21  ;;  %v280_v32 = vmul.f32 %v5687_v10, %v279_v24  ;;  %v5798_v34 = vmul.f32 %v5690_v11, %v279_v24 }
  0x7a   : > { %v254_v30 = vadd.f32 %v252_v12, %v248_v22  ;;  %v270_v33 = vadd.f32 %v268_v16, %v264_v26  ;;  %v520_v35 = vstv %s5745_s25  ;;  %v524_v36 = vstv %s5747_s27  ;;  %s5851_s25 = sld [smem:[#allocation8 + $0x3]]  ;;  %s5857_s27 = sld [smem:[#allocation7 + $0x181]] }
  0x7b   : > { %4996 = vmatprep.subr.msk.bf16.mxu0 %vm5775_vm1, %v5781_v25  ;;  %256 = vst.msk [vmem:[#allocation2] sm:$0xff] %vm255_vm0, %v253_v29  ;;  %v521_v37 = vmul.f32 %v520_v35, %v5659_v0  ;;  %v522_v38 = vmul.f32 %v520_v35, %v5662_v1  ;;  %v528_v39 = vstv %s5749_s28  ;;  %v534_v40 = vstv %s5751_s29  ;;  %s5859_s28 = sld [smem:[#allocation7 + $0x182]]  ;;  %s5872_s29 = sld [smem:[#allocation7 + $0x183]] }
  0x7c   : > { %4999 = vmatpush3.bf16.xpose.msk.msra.mxu0 %vm5775_vm1, %v5781_v25  ;;  %257 = vst.msk [vmem:[#allocation2 + $0x8] sm:$0xff] %vm255_vm0, %v254_v30  ;;  %v943_v41 = vld [vmem:[#allocation2 + $0x90] sm:$0xff]  ;;  %v944_v42 = vld [vmem:[#allocation2 + $0x98] sm:$0xff]  ;;  %v276_v43 = vadd.f32 %v274_v28, %v270_v33  ;;  %v529_v44 = vmul.f32 %v5669_v2, %v528_v39  ;;  %v530_v45 = vmul.f32 %v5672_v3, %v528_v39  ;;  %v540_v52 = vstv %s5761_s20  ;;  %s5878_s20 = sld [smem:[#allocation7 + $0x600]] }
  0x7d   : > { %v535_v46 = vmul.f32 %v5679_v5, %v534_v40  ;;  %v5818_v47 = vpack.c.bf16 %v944_v42, %v943_v41  ;;  %v525_v48 = vadd.f32 %v524_v36, %v521_v37  ;;  %v526_v49 = vadd.f32 %v524_v36, %v522_v38 }
  0x7e   : > { %v536_v50 = vmul.f32 %v5682_v6, %v534_v40  ;;  %v282_v51 = vadd.f32 %v280_v32, %v276_v43  ;;  %v549_v53 = vstv %s5769_s21  ;;  %v553_v54 = vstv %s5771_s17  ;;  %s5881_s21 = sld [smem:[#allocation8 + $0xc]]  ;;  %s5888_s17 = sld [smem:[#allocation7 + $0x601]] }
  0x7f   : > { %5002 = vmatprep.subr.msk.bf16.mxu1 %vm5775_vm1, %v5818_v47  ;;  %v531_v55 = vadd.f32 %v529_v44, %v525_v48  ;;  %v532_v56 = vadd.f32 %v530_v45, %v526_v49  ;;  %v541_v57 = vmul.f32 %v5687_v10, %v540_v52  ;;  %v542_v58 = vmul.f32 %v5690_v11, %v540_v52 }
  0x80   : > { %5005 = vmatpush3.bf16.xpose.msk.msra.mxu1 %vm5775_vm1, %v5818_v47  ;;  %285 = vst.msk [vmem:[#allocation2 + $0x10] sm:$0xff] %vm255_vm0, %v282_v51  ;;  %v550_v59 = vmul.f32 %v549_v53, %v5659_v0  ;;  %v551_v60 = vmul.f32 %v549_v53, %v5662_v1  ;;  %v557_v61 = vstv %s5786_s22  ;;  %v563_v62 = vstv %s5788_s24  ;;  %s5890_s22 = sld [smem:[#allocation7 + $0x602]]  ;;  %s5903_s24 = sld [smem:[#allocation7 + $0x603]] }
  0x81   : > { %v537_v63 = vadd.f32 %v535_v46, %v531_v55  ;;  %v538_v4 = vadd.f32 %v536_v50, %v532_v56  ;;  %v558_v7 = vmul.f32 %v5669_v2, %v557_v61  ;;  %v559_v8 = vmul.f32 %v5672_v3, %v557_v61 }
  0x82   : > { %v925_v9 = vld [vmem:[#allocation2] sm:$0xff]  ;;  %v554_v13 = vadd.f32 %v553_v54, %v550_v59  ;;  %v555_v14 = vadd.f32 %v553_v54, %v551_v60  ;;  %v564_v15 = vmul.f32 %v5679_v5, %v563_v62  ;;  %v565_v16 = vmul.f32 %v5682_v6, %v563_v62 }
  0x83   : > { %v926_v12 = vld [vmem:[#allocation2 + $0x8] sm:$0xff]  ;;  %4774 = vmatprep.mubr.msk.f32.mxu0 %vm255_vm0, %v925_v9  ;;  %v543_v18 = vadd.f32 %v541_v57, %v537_v63  ;;  %v544_v19 = vadd.f32 %v542_v58, %v538_v4  ;;  %v569_v21 = vstv %s5811_s26  ;;  %v271_v22 = vadd.f32 %v5767_v17, %v5783_v27  ;;  %1861 = vxpose.xlu0.b32.start [1/2] (short) (narrow) %v925_v9, 16  ;;  %s5905_s26 = sld [smem:[#allocation7 + $0x680]] }
  0x84   : > { %4775 = vmatmul.mubr.msk.f32.vlgmr.msra.gmra.mrb[0].mxu0 %vm255_vm0, %v926_v12  ;;  %v560_v23 = vadd.f32 %v558_v7, %v554_v13  ;;  %v561_v24 = vadd.f32 %v559_v8, %v555_v14  ;;  %v570_v26 = vmul.f32 %v5687_v10, %v569_v21  ;;  %v571_v28 = vmul.f32 %v5690_v11, %v569_v21 }
  0x85   : > { %546 = vst.msk [vmem:[#allocation2 + $0xa0] sm:$0xff] %vm255_vm0, %v543_v18  ;;  %547 = vst.msk [vmem:[#allocation2 + $0xa8] sm:$0xff] %vm255_vm0, %v544_v19  ;;  %v277_v17 = vadd.f32 %v5791_v31, %v271_v22  ;;  %v288_v27 = vstv %s5816_s6  ;;  %v292_v29 = vstv %s5821_s8  ;;  %v296_v30 = vstv %s5823_s23  ;;  %s5912_s6 = sld [smem:[#allocation8 + $0xd]]  ;;  %s5914_s8 = sld [smem:[#allocation7 + $0x681]] }
  0x86   : > { %v566_v32 = vadd.f32 %v564_v15, %v560_v23  ;;  %v567_v33 = vadd.f32 %v565_v16, %v561_v24  ;;  %v289_v35 = vmul.f32 %v288_v27, %v5659_v0  ;;  %v290_v36 = vmul.f32 %v288_v27, %v5662_v1  ;;  %s5928_s23 = sld [smem:[#allocation7 + $0x682]] }
  0x87   : > { %v927_v37 = vld [vmem:[#allocation2 + $0x10] sm:$0xff]  ;;  %v283_v38 = vadd.f32 %v5798_v34, %v277_v17  ;;  %v297_v39 = vmul.f32 %v5669_v2, %v296_v30  ;;  %v298_v31 = vmul.f32 %v5672_v3, %v296_v30  ;;  %v302_v40 = vstv %s5833_s18  ;;  %1862 = vxpose.xlu0.b32.end [2/2] (short) (narrow) %v926_v12, 16  ;;  %s5930_s18 = sld [smem:[#allocation7 + $0x683]] }
  0x88   : > { %4781 = vmatprep.mubr.msk.f32.mxu1 %vm255_vm0, %v927_v37  ;;  %v572_v41 = vadd.f32 %v570_v26, %v566_v32  ;;  %v573_v42 = vadd.f32 %v571_v28, %v567_v33  ;;  %v293_v43 = vadd.f32 %v292_v29, %v289_v35  ;;  %v294_v44 = vadd.f32 %v292_v29, %v290_v36 }
  0x89   : > { %286 = vst.msk [vmem:[#allocation2 + $0x18] sm:$0xff] %vm255_vm0, %v283_v38  ;;  %v303_v34 = vmul.f32 %v5679_v5, %v302_v40  ;;  %v304_v45 = vmul.f32 %v5682_v6, %v302_v40  ;;  %v308_v46 = vstv %s5845_s30  ;;  %v317_v48 = vstv %s5847_s4  ;;  %1893 = vxpose.xlu1.b32.start [1/2] (short) (narrow) %v927_v37, 16  ;;  %s5938_s30 = sld [smem:[#allocation7 + $0x200]]  ;;  %s5940_s4 = sld [smem:[#allocation8 + $0x4]] }
  0x8a   : > { %575 = vst.msk [vmem:[#allocation2 + $0xb0] sm:$0xff] %vm255_vm0, %v572_v41  ;;  %576 = vst.msk [vmem:[#allocation2 + $0xb8] sm:$0xff] %vm255_vm0, %v573_v42  ;;  %v299_v49 = vadd.f32 %v297_v39, %v293_v43  ;;  %v309_v50 = vmul.f32 %v5687_v10, %v308_v46  ;;  %v310_v51 = vmul.f32 %v5690_v11, %v308_v46  ;;  %v321_v54 = vstv %s5851_s25  ;;  %s5944_s25 = sld [smem:[#allocation7 + $0x201]] }
  0x8b   : > { %v318_v52 = vmul.f32 %v317_v48, %v5659_v0  ;;  %v319_v53 = vmul.f32 %v317_v48, %v5662_v1  ;;  %v325_v55 = vstv %s5857_s27  ;;  %v331_v56 = vstv %s5859_s28  ;;  %s5946_s27 = sld [smem:[#allocation7 + $0x202]]  ;;  %s5957_s28 = sld [smem:[#allocation7 + $0x203]] }
  0x8c   : > { %v945_v57 = vld [vmem:[#allocation2 + $0xa0] sm:$0xff]  ;;  %v946_v58 = vld [vmem:[#allocation2 + $0xa8] sm:$0xff]  ;;  %v305_v59 = vadd.f32 %v303_v34, %v299_v49  ;;  %v326_v61 = vmul.f32 %v5669_v2, %v325_v55  ;;  %v327_v62 = vmul.f32 %v5672_v3, %v325_v55  ;;  %v332_v7 = vmul.f32 %v5679_v5, %v331_v56 }
  0x8d   : > { %v322_v60 = vadd.f32 %v321_v54, %v318_v52  ;;  %v5907_v63 = vpack.c.bf16 %v946_v58, %v945_v57  ;;  %v323_v4 = vadd.f32 %v321_v54, %v319_v53  ;;  %v333_v8 = vmul.f32 %v5682_v6, %v331_v56 }
  0x8e   : > { %v311_v9 = vadd.f32 %v309_v50, %v305_v59  ;;  %v337_v13 = vstv %s5872_s29  ;;  %v300_v14 = vadd.f32 %v298_v31, %v294_v44  ;;  %v578_v19 = vstv %s5878_s20  ;;  %s5971_s29 = sld [smem:[#allocation7 + $0x280]]  ;;  %s5976_s20 = sld [smem:[#allocation8 + $0x5]] }
  0x8f   : > { %v328_v12 = vadd.f32 %v326_v61, %v322_v60  ;;  %5008 = vmatprep.subr.msk.bf16.mxu0 %vm5775_vm1, %v5907_v63  ;;  %v338_v15 = vmul.f32 %v5687_v10, %v337_v13  ;;  %v339_v16 = vmul.f32 %v5690_v11, %v337_v13  ;;  %v329_v18 = vadd.f32 %v327_v62, %v323_v4 }
  0x90   : > { %v928_v21 = vld [vmem:[#allocation2 + $0x18] sm:$0xff]  ;;  %5011 = vmatpush3.bf16.xpose.msk.msra.mxu0 %vm5775_vm1, %v5907_v63  ;;  %314 = vst.msk [vmem:[#allocation2 + $0x20] sm:$0xff] %vm255_vm0, %v311_v9  ;;  %v306_v23 = vadd.f32 %v304_v45, %v300_v14  ;;  %v579_v24 = vmul.f32 %v578_v19, %v5659_v0  ;;  %v580_v26 = vmul.f32 %v578_v19, %v5662_v1  ;;  %v582_v29 = vstv %s5881_s21  ;;  %s5978_s21 = sld [smem:[#allocation7 + $0x281]] }
  0x91   : > { %v334_v22 = vadd.f32 %v332_v7, %v328_v12  ;;  %v947_v28 = vld [vmem:[#allocation2 + $0xb0] sm:$0xff]  ;;  %v948_v17 = vld [vmem:[#allocation2 + $0xb8] sm:$0xff]  ;;  %4782 = vmatmul.mubr.msk.f32.vlgmr.msra.gmra.mrb[0].mxu1 %vm255_vm0, %v928_v21  ;;  %v335_v27 = vadd.f32 %v333_v8, %v329_v18  ;;  %v586_v30 = vstv %s5888_s17  ;;  %v592_v32 = vstv %s5890_s22  ;;  %1894 = vxpose.xlu1.b32.end [2/2] (short) (narrow) %v928_v21, 16  ;;  %s5982_s17 = sld [smem:[#allocation7 + $0x282]]  ;;  %s5984_s22 = sld [smem:[#allocation7 + $0x283]] }
  0x92   : > { %v5936_v33 = vpack.c.bf16 %v948_v17, %v947_v28  ;;  %v312_v36 = vadd.f32 %v310_v51, %v306_v23  ;;  %v583_v37 = vadd.f32 %v582_v29, %v579_v24  ;;  %v584_v39 = vadd.f32 %v582_v29, %v580_v26 }
  0x93   : > { %v340_v35 = vadd.f32 %v338_v15, %v334_v22  ;;  %v341_v38 = vadd.f32 %v339_v16, %v335_v27  ;;  %v587_v31 = vmul.f32 %v5669_v2, %v586_v30  ;;  %v588_v40 = vmul.f32 %v5672_v3, %v586_v30 }
  0x94   : > { %5014 = vmatprep.subr.msk.bf16.mxu1 %vm5775_vm1, %v5936_v33  ;;  %315 = vst.msk [vmem:[#allocation2 + $0x28] sm:$0xff] %vm255_vm0, %v312_v36  ;;  %v593_v41 = vmul.f32 %v5679_v5, %v592_v32  ;;  %v594_v42 = vmul.f32 %v5682_v6, %v592_v32  ;;  %v598_v43 = vstv %s5903_s24  ;;  %v607_v44 = vstv %s5905_s26  ;;  %s6003_s24 = sld [smem:[#allocation7 + $0x700]]  ;;  %s6005_s26 = sld [smem:[#allocation8 + $0xe]] }
  0x95   : > { %343 = vst.msk [vmem:[#allocation2 + $0x30] sm:$0xff] %vm255_vm0, %v340_v35  ;;  %5017 = vmatpush3.bf16.xpose.msk.msra.mxu1 %vm5775_vm1, %v5936_v33  ;;  %344 = vst.msk [vmem:[#allocation2 + $0x38] sm:$0xff] %vm255_vm0, %v341_v38  ;;  %v589_v34 = vadd.f32 %v587_v31, %v583_v37  ;;  %v590_v45 = vadd.f32 %v588_v40, %v584_v39  ;;  %v599_v46 = vmul.f32 %v5687_v10, %v598_v43 }
  0x96   : > { %v600_v48 = vmul.f32 %v5690_v11, %v598_v43  ;;  %v608_v49 = vmul.f32 %v607_v44, %v5659_v0  ;;  %v609_v50 = vmul.f32 %v607_v44, %v5662_v1  ;;  %v611_v51 = vstv %s5912_s6  ;;  %s6008_s6 = sld [smem:[#allocation7 + $0x701]] }
  0x97   : > { %v615_v52 = vstv %s5914_s8  ;;  %v929_v53 = vld [vmem:[#allocation2 + $0x20] sm:$0xff]  ;;  %v595_v54 = vadd.f32 %v593_v41, %v589_v34  ;;  %v596_v55 = vadd.f32 %v594_v42, %v590_v45  ;;  %v621_v60 = vstv %s5928_s23  ;;  %s6018_s8 = sld [smem:[#allocation7 + $0x702]]  ;;  %s6023_s23 = sld [smem:[#allocation7 + $0x703]] }
  0x98   : > { %v616_v56 = vmul.f32 %v5669_v2, %v615_v52  ;;  %v617_v57 = vmul.f32 %v5672_v3, %v615_v52  ;;  %4788 = vmatprep.mubr.msk.f32.mxu0 %vm255_vm0, %v929_v53  ;;  %v612_v58 = vadd.f32 %v611_v51, %v608_v49  ;;  %v613_v59 = vadd.f32 %v611_v51, %v609_v50 }
  0x99   : > { %v627_v61 = vstv %s5930_s18  ;;  %1925 = vxpose.xlu0.b32.start [1/2] (short) (narrow) %v929_v53, 16  ;;  %v601_v62 = vadd.f32 %v599_v46, %v595_v54  ;;  %v602_v4 = vadd.f32 %v600_v48, %v596_v55  ;;  %v622_v7 = vmul.f32 %v5679_v5, %v621_v60  ;;  %s6025_s18 = sld [smem:[#allocation7 + $0x780]] }
  0x9a   : > { %v623_v8 = vmul.f32 %v5682_v6, %v621_v60  ;;  %v618_v9 = vadd.f32 %v616_v56, %v612_v58  ;;  %v619_v12 = vadd.f32 %v617_v57, %v613_v59  ;;  %v628_v13 = vmul.f32 %v5687_v10, %v627_v61 }
  0x9b   : > { %v629_v14 = vmul.f32 %v5690_v11, %v627_v61  ;;  %v930_v16 = vld [vmem:[#allocation2 + $0x28] sm:$0xff]  ;;  %604 = vst.msk [vmem:[#allocation2 + $0xc0] sm:$0xff] %vm255_vm0, %v601_v62  ;;  %605 = vst.msk [vmem:[#allocation2 + $0xc8] sm:$0xff] %vm255_vm0, %v602_v4  ;;  %v346_v18 = vstv %s5938_s30  ;;  %v350_v19 = vstv %s5940_s4  ;;  %v354_v21 = vstv %s5944_s25  ;;  %s6035_s30 = sld [smem:[#allocation8 + $0xf]]  ;;  %s6037_s4 = sld [smem:[#allocation7 + $0x781]] }
  0x9c   : > { %v931_v15 = vld [vmem:[#allocation2 + $0x30] sm:$0xff]  ;;  %v360_v22 = vstv %s5946_s27  ;;  %4789 = vmatmul.mubr.msk.f32.vlgmr.msra.gmra.mrb[2].mxu0 %vm255_vm0, %v930_v16  ;;  %v932_v23 = vld [vmem:[#allocation2 + $0x38] sm:$0xff]  ;;  %v624_v24 = vadd.f32 %v622_v7, %v618_v9  ;;  %v625_v26 = vadd.f32 %v623_v8, %v619_v12  ;;  %v347_v28 = vmul.f32 %v346_v18, %v5659_v0  ;;  %s6051_s25 = sld [smem:[#allocation7 + $0x782]]  ;;  %s6053_s27 = sld [smem:[#allocation7 + $0x783]] }
  0x9d   : > { %4795 = vmatprep.mubr.msk.f32.mxu1 %vm255_vm0, %v931_v15  ;;  %v366_v17 = vstv %s5957_s28  ;;  %v348_v27 = vmul.f32 %v346_v18, %v5662_v1  ;;  %v355_v29 = vmul.f32 %v5669_v2, %v354_v21  ;;  %v356_v30 = vmul.f32 %v5672_v3, %v354_v21  ;;  %1926 = vxpose.xlu0.b32.end [2/2] (short) (narrow) %v930_v16, 16  ;;  %s6059_s28 = sld [smem:[#allocation7 + $0x300]] }
  0x9e   : > { %4796 = vmatmul.mubr.msk.f32.vlgmr.msra.gmra.mrb[2].mxu1 %vm255_vm0, %v932_v23  ;;  %v361_v32 = vmul.f32 %v5679_v5, %v360_v22  ;;  %v630_v35 = vadd.f32 %v628_v13, %v624_v24  ;;  %v631_v36 = vadd.f32 %v629_v14, %v625_v26  ;;  %v351_v37 = vadd.f32 %v350_v19, %v347_v28 }
  0x9f   : > { %v362_v38 = vmul.f32 %v5682_v6, %v360_v22  ;;  %v352_v39 = vadd.f32 %v350_v19, %v348_v27  ;;  %v367_v31 = vmul.f32 %v5687_v10, %v366_v17  ;;  %v368_v40 = vmul.f32 %v5690_v11, %v366_v17  ;;  %1957 = vxpose.xlu1.b32.start [1/2] (short) (narrow) %v931_v15, 16 }
  0xa0   : > { %v375_v41 = vstv %s5971_s29  ;;  %633 = vst.msk [vmem:[#allocation2 + $0xd0] sm:$0xff] %vm255_vm0, %v630_v35  ;;  %634 = vst.msk [vmem:[#allocation2 + $0xd8] sm:$0xff] %vm255_vm0, %v631_v36  ;;  %v357_v42 = vadd.f32 %v355_v29, %v351_v37  ;;  %v379_v34 = vstv %s5976_s20  ;;  %v383_v45 = vstv %s5978_s21  ;;  %s6061_s29 = sld [smem:[#allocation8 + $0x6]]  ;;  %s6067_s20 = sld [smem:[#allocation7 + $0x301]] }
  0xa1   : > { %v376_v43 = vmul.f32 %v375_v41, %v5659_v0  ;;  %v377_v44 = vmul.f32 %v375_v41, %v5662_v1  ;;  %v389_v46 = vstv %s5982_s17  ;;  %v395_v48 = vstv %s5984_s22  ;;  %s6069_s21 = sld [smem:[#allocation7 + $0x302]]  ;;  %s6077_s17 = sld [smem:[#allocation7 + $0x303]] }
  0xa2   : > { %v358_v49 = vadd.f32 %v356_v30, %v352_v39  ;;  %v949_v50 = vld [vmem:[#allocation2 + $0xc0] sm:$0xff]  ;;  %v950_v51 = vld [vmem:[#allocation2 + $0xc8] sm:$0xff]  ;;  %v363_v52 = vadd.f32 %v361_v32, %v357_v42  ;;  %v384_v55 = vmul.f32 %v5669_v2, %v383_v45  ;;  %v385_v57 = vmul.f32 %v5672_v3, %v383_v45  ;;  %s6079_s22 = sld [smem:[#allocation7 + $0x380]] }
  0xa3   : > { %v380_v53 = vadd.f32 %v379_v34, %v376_v43  ;;  %v381_v54 = vadd.f32 %v379_v34, %v377_v44  ;;  %v6028_v56 = vpack.c.bf16 %v950_v51, %v949_v50  ;;  %v390_v58 = vmul.f32 %v5679_v5, %v389_v46  ;;  %1958 = vxpose.xlu1.b32.end [2/2] (short) (narrow) %v932_v23, 16 }
  0xa4   : > { %v391_v59 = vmul.f32 %v5682_v6, %v389_v46  ;;  %v369_v60 = vadd.f32 %v367_v31, %v363_v52  ;;  %v396_v62 = vmul.f32 %v5687_v10, %v395_v48  ;;  %v397_v4 = vmul.f32 %v5690_v11, %v395_v48 }
  0xa5   : > { %v386_v61 = vadd.f32 %v384_v55, %v380_v53  ;;  %5020 = vmatprep.subr.msk.bf16.mxu0 %vm5775_vm1, %v6028_v56  ;;  %v364_v7 = vadd.f32 %v362_v38, %v358_v49  ;;  %v387_v8 = vadd.f32 %v385_v57, %v381_v54  ;;  %v636_v9 = vstv %s6003_s24  ;;  %s6093_s24 = sld [smem:[#allocation8 + $0x7]] }
  0xa6   : > { %v640_v12 = vstv %s6005_s26  ;;  %5023 = vmatpush3.bf16.xpose.msk.msra.mxu0 %vm5775_vm1, %v6028_v56  ;;  %372 = vst.msk [vmem:[#allocation2 + $0x40] sm:$0xff] %vm255_vm0, %v369_v60  ;;  %v637_v14 = vmul.f32 %v636_v9, %v5659_v0  ;;  %v638_v15 = vmul.f32 %v636_v9, %v5662_v1  ;;  %v644_v16 = vstv %s6008_s6  ;;  %s6098_s26 = sld [smem:[#allocation7 + $0x381]]  ;;  %s6100_s6 = sld [smem:[#allocation7 + $0x382]] }
  0xa7   : > { %v392_v13 = vadd.f32 %v390_v58, %v386_v61  ;;  %v951_v18 = vld [vmem:[#allocation2 + $0xd0] sm:$0xff]  ;;  %v952_v19 = vld [vmem:[#allocation2 + $0xd8] sm:$0xff]  ;;  %v370_v21 = vadd.f32 %v368_v40, %v364_v7  ;;  %v393_v22 = vadd.f32 %v391_v59, %v387_v8  ;;  %v645_v23 = vmul.f32 %v5669_v2, %v644_v16 }
  0xa8   : > { %v646_v24 = vmul.f32 %v5672_v3, %v644_v16  ;;  %v6057_v26 = vpack.c.bf16 %v952_v19, %v951_v18  ;;  %v641_v17 = vadd.f32 %v640_v12, %v637_v14  ;;  %v642_v27 = vadd.f32 %v640_v12, %v638_v15 }
  0xa9   : > { %v398_v28 = vadd.f32 %v396_v62, %v392_v13  ;;  %373 = vst.msk [vmem:[#allocation2 + $0x48] sm:$0xff] %vm255_vm0, %v370_v21  ;;  %v399_v29 = vadd.f32 %v397_v4, %v393_v22  ;;  %v650_v30 = vstv %s6018_s8  ;;  %v656_v32 = vstv %s6023_s23  ;;  %s6113_s8 = sld [smem:[#allocation7 + $0x383]]  ;;  %s6359_s23 = sld [smem:[#allocation7 + $0x800]] }
  0xaa   : > { %v665_v35 = vstv %s6025_s18  ;;  %5026 = vmatprep.subr.msk.bf16.mxu1 %vm5775_vm1, %v6057_v26  ;;  %v647_v36 = vadd.f32 %v645_v23, %v641_v17  ;;  %v648_v37 = vadd.f32 %v646_v24, %v642_v27  ;;  %v651_v38 = vmul.f32 %v5679_v5, %v650_v30  ;;  %s6374_s18 = sld [smem:[#allocation8 + $0x10]] }
  0xab   : > { %401 = vst.msk [vmem:[#allocation2 + $0x50] sm:$0xff] %vm255_vm0, %v398_v28  ;;  %v652_v39 = vmul.f32 %v5682_v6, %v650_v30  ;;  %5029 = vmatpush3.bf16.xpose.msk.msra.mxu1 %vm5775_vm1, %v6057_v26  ;;  %402 = vst.msk [vmem:[#allocation2 + $0x58] sm:$0xff] %vm255_vm0, %v399_v29  ;;  %v657_v31 = vmul.f32 %v5687_v10, %v656_v32  ;;  %v658_v40 = vmul.f32 %v5690_v11, %v656_v32 }
  0xac   : > { %v666_v41 = vmul.f32 %v665_v35, %v5659_v0  ;;  %v667_v42 = vmul.f32 %v665_v35, %v5662_v1  ;;  %v653_v43 = vadd.f32 %v651_v38, %v647_v36  ;;  %v669_v34 = vstv %s6035_s30  ;;  %s6393_s30 = sld [smem:[#allocation7 + $0x801]] }
  0xad   : > { %v654_v44 = vadd.f32 %v652_v39, %v648_v37  ;;  %v673_v45 = vstv %s6037_s4  ;;  %v933_v46 = vld [vmem:[#allocation2 + $0x40] sm:$0xff]  ;;  %v679_v54 = vstv %s6051_s25  ;;  %v685_v55 = vstv %s6053_s27  ;;  %s6395_s4 = sld [smem:[#allocation7 + $0x802]]  ;;  %s6404_s25 = sld [smem:[#allocation7 + $0x803]] }
  0xae   : > { %v670_v48 = vadd.f32 %v669_v34, %v666_v41  ;;  %v671_v49 = vadd.f32 %v669_v34, %v667_v42  ;;  %v674_v50 = vmul.f32 %v5669_v2, %v673_v45  ;;  %v675_v51 = vmul.f32 %v5672_v3, %v673_v45  ;;  %4802 = vmatprep.mubr.msk.f32.mxu0 %vm255_vm0, %v933_v46  ;;  %s6407_s27 = sld [smem:[#allocation7 + $0x880]] }
  0xaf   : > { %v659_v52 = vadd.f32 %v657_v31, %v653_v43  ;;  %v660_v53 = vadd.f32 %v658_v40, %v654_v44  ;;  %1989 = vxpose.xlu0.b32.start [1/2] (short) (narrow) %v933_v46, 16  ;;  %v680_v59 = vmul.f32 %v5679_v5, %v679_v54  ;;  %v681_v60 = vmul.f32 %v5682_v6, %v679_v54 }
  0xb0   : > { %v676_v57 = vadd.f32 %v674_v50, %v670_v48  ;;  %v677_v58 = vadd.f32 %v675_v51, %v671_v49  ;;  %v934_v61 = vld [vmem:[#allocation2 + $0x48] sm:$0xff]  ;;  %v686_v62 = vmul.f32 %v5687_v10, %v685_v55  ;;  %v687_v4 = vmul.f32 %v5690_v11, %v685_v55 }
  0xb1   : > { %662 = vst.msk [vmem:[#allocation2 + $0xe0] sm:$0xff] %vm255_vm0, %v659_v52  ;;  %663 = vst.msk [vmem:[#allocation2 + $0xe8] sm:$0xff] %vm255_vm0, %v660_v53  ;;  %v404_v7 = vstv %s6059_s28  ;;  %v408_v8 = vstv %s6061_s29  ;;  %4803 = vmatmul.mubr.msk.f32.vlgmr.msra.gmra.mrb[4].mxu0 %vm255_vm0, %v934_v61  ;;  %v412_v18 = vstv %s6067_s20  ;;  %v418_v19 = vstv %s6069_s21  ;;  %s6414_s28 = sld [smem:[#allocation8 + $0x11]]  ;;  %s6449_s20 = sld [smem:[#allocation7 + $0x882]] }
  0xb2   : > { %v935_v9 = vld [vmem:[#allocation2 + $0x50] sm:$0xff]  ;;  %v682_v12 = vadd.f32 %v680_v59, %v676_v57  ;;  %v683_v13 = vadd.f32 %v681_v60, %v677_v58  ;;  %v405_v14 = vmul.f32 %v404_v7, %v5659_v0  ;;  %v406_v15 = vmul.f32 %v404_v7, %v5662_v1  ;;  %v936_v16 = vld [vmem:[#allocation2 + $0x58] sm:$0xff]  ;;  %s6435_s29 = sld [smem:[#allocation7 + $0x881]]  ;;  %s6469_s21 = sld [smem:[#allocation7 + $0x883]] }
  0xb3   : > { %4809 = vmatprep.mubr.msk.f32.mxu1 %vm255_vm0, %v935_v9  ;;  %v424_v21 = vstv %s6077_s17  ;;  %v433_v22 = vstv %s6079_s22  ;;  %1990 = vxpose.xlu0.b32.end [2/2] (short) (narrow) %v934_v61, 16  ;;  %v413_v27 = vmul.f32 %v5669_v2, %v412_v18  ;;  %v414_v29 = vmul.f32 %v5672_v3, %v412_v18  ;;  %s6471_s17 = sld [smem:[#allocation8 + $0x12]]  ;;  %s6481_s22 = sld [smem:[#allocation7 + $0x901]] }
  0xb4   : > { %4810 = vmatmul.mubr.msk.f32.vlgmr.msra.gmra.mrb[4].mxu1 %vm255_vm0, %v936_v16  ;;  %v688_v23 = vadd.f32 %v686_v62, %v682_v12  ;;  %v689_v24 = vadd.f32 %v687_v4, %v683_v13  ;;  %v409_v28 = vadd.f32 %v408_v8, %v405_v14  ;;  %v410_v17 = vadd.f32 %v408_v8, %v406_v15 }
  0xb5   : > { %v419_v30 = vmul.f32 %v5679_v5, %v418_v19  ;;  %v420_v32 = vmul.f32 %v5682_v6, %v418_v19  ;;  %2021 = vxpose.xlu1.b32.start [1/2] (short) (narrow) %v935_v9, 16  ;;  %v425_v35 = vmul.f32 %v5687_v10, %v424_v21  ;;  %v426_v36 = vmul.f32 %v5690_v11, %v424_v21 }
  0xb6   : > { %691 = vst.msk [vmem:[#allocation2 + $0xf0] sm:$0xff] %vm255_vm0, %v688_v23  ;;  %692 = vst.msk [vmem:[#allocation2 + $0xf8] sm:$0xff] %vm255_vm0, %v689_v24  ;;  %v434_v37 = vmul.f32 %v433_v22, %v5659_v0  ;;  %v435_v38 = vmul.f32 %v433_v22, %v5662_v1  ;;  %v415_v39 = vadd.f32 %v413_v27, %v409_v28  ;;  %v437_v31 = vstv %s6093_s24  ;;  %s6483_s24 = sld [smem:[#allocation7 + $0x902]] }
  0xb7   : > { %v441_v40 = vstv %s6098_s26  ;;  %v447_v41 = vstv %s6100_s6  ;;  %v453_v51 = vstv %s6113_s8  ;;  %v416_v52 = vadd.f32 %v414_v29, %v410_v17  ;;  %s6503_s26 = sld [smem:[#allocation7 + $0x980]]  ;;  %s6505_s6 = sld [smem:[#allocation8 + $0x13]] }
  0xb8   : > { %v953_v42 = vld [vmem:[#allocation2 + $0xe0] sm:$0xff]  ;;  %v954_v43 = vld [vmem:[#allocation2 + $0xe8] sm:$0xff]  ;;  %v438_v44 = vadd.f32 %v437_v31, %v434_v37  ;;  %v439_v34 = vadd.f32 %v437_v31, %v435_v38  ;;  %v442_v45 = vmul.f32 %v5669_v2, %v441_v40  ;;  %v443_v46 = vmul.f32 %v5672_v3, %v441_v40  ;;  %s6509_s8 = sld [smem:[#allocation7 + $0x903]] }
  0xb9   : > { %v6136_v48 = vpack.c.bf16 %v954_v43, %v953_v42  ;;  %v421_v49 = vadd.f32 %v419_v30, %v415_v39  ;;  %v448_v0 = vmul.f32 %v5679_v5, %v447_v41  ;;  %v449_v1 = vmul.f32 %v5682_v6, %v447_v41  ;;  %2022 = vxpose.xlu1.b32.end [2/2] (short) (narrow) %v936_v16, 16 }
  0xba   : > { %v444_v50 = vadd.f32 %v442_v45, %v438_v44  ;;  %v445_v53 = vadd.f32 %v443_v46, %v439_v34  ;;  %v454_v2 = vmul.f32 %v5687_v10, %v453_v51  ;;  %v455_v3 = vmul.f32 %v5690_v11, %v453_v51 }
  0xbb   : > { %5032 = vmatprep.subr.msk.bf16.mxu0 %vm5775_vm1, %v6136_v48  ;;  %v427_v54 = vadd.f32 %v425_v35, %v421_v49  ;;  %v422_v6 = vadd.f32 %v420_v32, %v416_v52 }
  0xbc   : > { %5035 = vmatpush3.bf16.xpose.msk.msra.mxu0 %vm5775_vm1, %v6136_v48  ;;  %v450_v5 = vadd.f32 %v448_v0, %v444_v50  ;;  %v451_v55 = vadd.f32 %v449_v1, %v445_v53 }
  0xbd   : > { %v955_v57 = vld [vmem:[#allocation2 + $0xf0] sm:$0xff]  ;;  %v956_v58 = vld [vmem:[#allocation2 + $0xf8] sm:$0xff]  ;;  %430 = vst.msk [vmem:[#allocation2 + $0x60] sm:$0xff] %vm255_vm0, %v427_v54  ;;  %5043 = vmatprep.subr.bf16.mxu0 %v5781_v25  ;;  %v428_v61 = vadd.f32 %v426_v36, %v422_v6 }
  0xbe   : > { %v5036_v59 = vpack.c.bf16 %v956_v58, %v955_v57  ;;  %v456_v60 = vadd.f32 %v454_v2, %v450_v5  ;;  %v457_v62 = vadd.f32 %v455_v3, %v451_v55 }
  0xbf   : > { %431 = vst.msk [vmem:[#allocation2 + $0x68] sm:$0xff] %vm255_vm0, %v428_v61 }
  0xc0   : > { %5038 = vmatprep.subr.msk.bf16.mxu1 %vm5775_vm1, %v5036_v59  ;;  %459 = vst.msk [vmem:[#allocation2 + $0x70] sm:$0xff] %vm255_vm0, %v456_v60  ;;  %460 = vst.msk [vmem:[#allocation2 + $0x78] sm:$0xff] %vm255_vm0, %v457_v62 }
  0xc1   : > { %5041 = vmatpush3.bf16.xpose.msk.msra.mxu1 %vm5775_vm1, %v5036_v59 }
  0xc2   : > { %5047 = vmatprep.subr.bf16.mxu1 %v5818_v47 }
  0xc4   : > { %v6159_v10 = vld [vmem:[#allocation2 + $0x60] sm:$0xff] }
  0xc5   : > { %4816 = vmatprep.mubr.msk.f32.mxu0 %vm255_vm0, %v6159_v10 }
  0xc6   : > { %v6165_v4 = vld [vmem:[#allocation2 + $0x68] sm:$0xff] }
  0xc7   : > { %v6163_v11 = vld [vmem:[#allocation2 + $0x70] sm:$0xff]  ;;  %v6167_v7 = vld [vmem:[#allocation2 + $0x78] sm:$0xff]  ;;  %4817 = vmatmul.mubr.msk.f32.vlgmr.msra.gmra.mrb[6].mxu0 %vm255_vm0, %v6165_v4 }
  0xc8   : > { %4823 = vmatprep.mubr.msk.f32.mxu1 %vm255_vm0, %v6163_v11  ;;  %5045 = vmatpush3.bf16.msra.mxu0 %v5781_v25 }
  0xc9   : > { %4824 = vmatmul.mubr.msk.f32.vlgmr.msra.gmra.mrb[6].mxu1 %vm255_vm0, %v6167_v7  ;;  %5051 = vmatprep.subr.bf16.mxu0 %v5907_v63 }
  0xca   : > { %5049 = vmatpush3.bf16.msra.mxu1 %v5818_v47 }
  0xcb   : > { %5055 = vmatprep.subr.bf16.mxu1 %v5936_v33 }
 0x103   : > { %v1877_v8 = vpop.trf.xlu0 }
 0x104   : > { %4830 = vmatprep.mubr.msk.f32.mxu0 %vm255_vm0, %v1877_v8 }
 0x107   : > { %v1878_v12 = vpop.trf.xlu0 }
 0x108   : > { %4831 = vmatmul.mubr.msk.f32.vlgmr.msra.gmra.mrb[8].mxu0 %vm255_vm0, %v1878_v12 }
 0x109   : > { %5053 = vmatpush3.bf16.msra.mxu0 %v5907_v63 }
 0x10a   : > { %5059 = vmatprep.subr.bf16.mxu0 %v6028_v56 }
 0x10d   : > { %v1909_v20 = vpop.trf.xlu1 }
 0x10e   : > { %4837 = vmatprep.mubr.msk.f32.mxu1 %vm255_vm0, %v1909_v20 }
 0x111   : > { %v1910_v9 = vpop.trf.xlu1 }
 0x112   : > { %4838 = vmatmul.mubr.msk.f32.vlgmr.msra.gmra.mrb[8].mxu1 %vm255_vm0, %v1910_v9 }
 0x113   : > { %5057 = vmatpush3.bf16.msra.mxu1 %v5936_v33 }
 0x114   : > { %5063 = vmatprep.subr.bf16.mxu1 %v6057_v26 }
 0x119   : > { %v1941_v47 = vpop.trf.xlu0 }
 0x11a   : > { %4844 = vmatprep.mubr.msk.f32.mxu0 %vm255_vm0, %v1941_v47 }
 0x11d   : > { %v1942_v14 = vpop.trf.xlu0 }
 0x11e   : > { %4845 = vmatmul.mubr.msk.f32.vlgmr.msra.gmra.mrb[10].mxu0 %vm255_vm0, %v1942_v14 }
 0x11f   : > { %v1973_v25 = vpop.trf.xlu1  ;;  %5061 = vmatpush3.bf16.msra.mxu0 %v6028_v56 }
 0x120   : > { %4851 = vmatprep.mubr.msk.f32.mxu1 %vm255_vm0, %v1973_v25  ;;  %5067 = vmatprep.subr.bf16.mxu0 %v6136_v48 }
 0x123   : > { %v1974_v13 = vpop.trf.xlu1 }
 0x124   : > { %4852 = vmatmul.mubr.msk.f32.vlgmr.msra.gmra.mrb[10].mxu1 %vm255_vm0, %v1974_v13 }
 0x125   : > { %5065 = vmatpush3.bf16.msra.mxu1 %v6057_v26 }
 0x126   : > { %5071 = vmatprep.subr.bf16.mxu1 %v5036_v59 }
 0x12f   : > { %v2005_v63 = vpop.trf.xlu0 }
 0x130   : > { %4858 = vmatprep.mubr.msk.f32.mxu0 %vm255_vm0, %v2005_v63 }
 0x133   : > { %v2006_v15 = vpop.trf.xlu0 }
 0x134   : > { %4859 = vmatmul.mubr.msk.f32.vlgmr.msra.gmra.mrb[12].mxu0 %vm255_vm0, %v2006_v15 }
 0x135   : > { %v2037_v33 = vpop.trf.xlu1  ;;  %5069 = vmatpush3.bf16.msra.mxu0 %v6136_v48 }
 0x136   : > { %4865 = vmatprep.mubr.msk.f32.mxu1 %vm255_vm0, %v2037_v33 }
 0x139   : > { %v2038_v16 = vpop.trf.xlu1 }
 0x13a   : > { %4866 = vmatmul.mubr.msk.f32.vlgmr.msra.gmra.mrb[12].mxu1 %vm255_vm0, %v2038_v16 }
 0x13b   : > { %5073 = vmatpush3.bf16.msra.mxu1 %v5036_v59 }
 0x157   : > { %v4776_v56 = vpop.f32.mrb[0].mxu0 }
 0x158   : > { %v6199_v26 = vmul.f32 0.35355338, %v4776_v56  ;;  %v1051_v18 = vpop.f32.mrb[1].mxu0 }
 0x159   : > { %v6201_v19 = vmul.f32 0.35355338, %v1051_v18 }
 0x15a   : > { %v1688_v21 = vsel %vm255_vm0, %v6199_v26, -inf }
 0x15b   : > { %1689 = vmax.xlane.f32.xlu1 %v1688_v21  ;;  %v1685_v22 = vsel %vm255_vm0, %v6201_v19, -inf }
 0x15c   : > { %1686 = vmax.xlane.f32.xlu0 %v1685_v22 }
 0x164   : > { %v4783_v23 = vpop.f32.mrb[0].mxu1 }
 0x165   : > { %v6207_v24 = vmul.f32 0.35355338, %v4783_v23  ;;  %v1138_v28 = vpop.f32.mrb[1].mxu1 }
 0x166   : > { %v6209_v17 = vmul.f32 0.35355338, %v1138_v28 }
 0x167   : > { %v1694_v27 = vsel %vm255_vm0, %v6207_v24, -inf }
 0x168   : > { %1695 = vmax.xlane.f32.xlu1 %v1694_v27  ;;  %v1691_v29 = vsel %vm255_vm0, %v6209_v17, -inf }
 0x169   : > { %1692 = vmax.xlane.f32.xlu0 %v1691_v29 }
 0x16f   : > { %v4790_v30 = vpop.f32.mrb[2].mxu0 }
 0x170   : > { %v6215_v35 = vmul.f32 0.35355338, %v4790_v30  ;;  %v1225_v36 = vpop.f32.mrb[3].mxu0 }
 0x171   : > { %v4797_v32 = vpop.f32.mrb[2].mxu1  ;;  %v6219_v39 = vmul.f32 0.35355338, %v1225_v36 }
 0x172   : > { %v6217_v37 = vmul.f32 0.35355338, %v4797_v32  ;;  %v1312_v38 = vpop.f32.mrb[3].mxu1  ;;  %v1700_v31 = vsel %vm255_vm0, %v6215_v35, -inf }
 0x173   : > { %v6223_v40 = vmul.f32 0.35355338, %v1312_v38  ;;  %1701 = vmax.xlane.f32.xlu0 %v1700_v31  ;;  %v1697_v42 = vsel %vm255_vm0, %v6219_v39, -inf }
 0x174   : > { %v1706_v41 = vsel %vm255_vm0, %v6217_v37, -inf }
 0x175   : > { %1707 = vmax.xlane.f32.xlu1 %v1706_v41  ;;  %v1703_v43 = vsel %vm255_vm0, %v6223_v40, -inf }
 0x177   : > { %1698 = vmax.xlane.f32.xlu0 %v1697_v42 }
 0x179   : > { %1704 = vmax.xlane.f32.xlu1 %v1703_v43 }
 0x184   : > { %v4804_v44 = vpop.f32.mrb[4].mxu0 }
 0x185   : > { %v6231_v34 = vmul.f32 0.35355338, %v4804_v44  ;;  %v1399_v45 = vpop.f32.mrb[5].mxu0 }
 0x186   : > { %v6235_v0 = vmul.f32 0.35355338, %v1399_v45 }
 0x187   : > { %v4811_v46 = vpop.f32.mrb[4].mxu1  ;;  %v1712_v1 = vsel %vm255_vm0, %v6231_v34, -inf }
 0x188   : > { %v6233_v48 = vmul.f32 0.35355338, %v4811_v46  ;;  %v1486_v49 = vpop.f32.mrb[5].mxu1  ;;  %1713 = vmax.xlane.f32.xlu0 %v1712_v1  ;;  %v1709_v52 = vsel %vm255_vm0, %v6235_v0, -inf }
 0x189   : > { %v6239_v50 = vmul.f32 0.35355338, %v1486_v49 }
 0x18a   : > { %v1718_v51 = vsel %vm255_vm0, %v6233_v48, -inf }
 0x18b   : > { %1719 = vmax.xlane.f32.xlu1 %v1718_v51  ;;  %v1715_v53 = vsel %vm255_vm0, %v6239_v50, -inf }
 0x18c   : > { %1710 = vmax.xlane.f32.xlu0 %v1709_v52 }
 0x18f   : > { %1716 = vmax.xlane.f32.xlu1 %v1715_v53 }
 0x19a   : > { %v4818_v54 = vpop.f32.mrb[6].mxu0 }
 0x19b   : > { %v6247_v3 = vmul.f32 0.35355338, %v4818_v54  ;;  %v1573_v5 = vpop.f32.mrb[7].mxu0 }
 0x19c   : > { %v4825_v2 = vpop.f32.mrb[6].mxu1  ;;  %v6251_v57 = vmul.f32 0.35355338, %v1573_v5 }
 0x19d   : > { %v6249_v6 = vmul.f32 0.35355338, %v4825_v2  ;;  %v1660_v55 = vpop.f32.mrb[7].mxu1  ;;  %v1724_v58 = vsel %vm255_vm0, %v6247_v3, -inf }
 0x19e   : > { %v6255_v59 = vmul.f32 0.35355338, %v1660_v55  ;;  %1725 = vmax.xlane.f32.xlu0 %v1724_v58  ;;  %v1721_v61 = vsel %vm255_vm0, %v6251_v57, -inf }
 0x19f   : > { %v1730_v60 = vsel %vm255_vm0, %v6249_v6, -inf }
 0x1a0   : > { %1731 = vmax.xlane.f32.xlu1 %v1730_v60  ;;  %v1727_v62 = vsel %vm255_vm0, %v6255_v59, -inf }
 0x1a2   : > { %1722 = vmax.xlane.f32.xlu0 %v1721_v61 }
 0x1a4   : > { %1728 = vmax.xlane.f32.xlu1 %v1727_v62 }
 0x1cf   : > { %2053 = vxpose.xlu0.b32.start [1/2] (short) (narrow) %v6159_v10, 16 }
 0x1d3   : > { %2054 = vxpose.xlu0.b32.end [2/2] (short) (narrow) %v6165_v4, 16 }
 0x1d7   : > { %2085 = vxpose.xlu1.b32.start [1/2] (short) (narrow) %v6163_v11, 16 }
 0x1db   : > { %2086 = vxpose.xlu1.b32.end [2/2] (short) (narrow) %v6167_v7, 16  ;;  %v4832_v7 = vpop.f32.mrb[8].mxu0 }
 0x1dc   : > { %v2766_v16 = vmul.f32 0.35355338, %v4832_v7 }
 0x1de   : > { %v2782_v23 = vsel %vm255_vm0, %v2766_v16, -inf }
 0x1e5   : > { %v4839_v15 = vpop.f32.mrb[8].mxu1 }
 0x1e6   : > { %v2768_v56 = vmul.f32 0.35355338, %v4839_v15  ;;  %v2270_v18 = vpop.f32.mrb[9].mxu1 }
 0x1e7   : > { %v2767_v22 = vmul.f32 0.35355338, %v2270_v18 }
 0x1e8   : > { %v1690_v20 = vpop.xlane.xlu1 %1689 }
 0x1e9   : > { %v1734_v8 = vsub.f32 %v6199_v26, %v1690_v20  ;;  %v1687_v9 = vpop.xlane.xlu0 %1686  ;;  %v2189_v26 = vpop.f32.mrb[9].mxu0 }
 0x1ea   : > { %v1733_v25 = vsub.f32 %v6201_v19, %v1687_v9  ;;  %v2765_v21 = vmul.f32 0.35355338, %v2189_v26 }
 0x1eb   : > { %v1751_v12 = vmul.f32 1.442695, %v1734_v8 }
 0x1ec   : > { %v1749_v47 = vmul.f32 1.442695, %v1733_v25  ;;  %v2781_v28 = vsel %vm255_vm0, %v2765_v21, -inf }
 0x1ed   : > { %5210 = vpow2.f32 %v1751_v12  ;;  %v2783_v30 = vmax.f32 %v2781_v28, %v2782_v23 }
 0x1ee   : > { %5212 = vpow2.f32 %v1749_v47 }
 0x1ef   : > { %v2784_v41 = vrot.slane %v2783_v30, 4 }
 0x1f1   : > { %v2785_v1 = vmax.f32 %v2783_v30, %v2784_v41 }
 0x1f3   : > { %v2786_v2 = vrot.slane %v2785_v1, 2 }
 0x1f5   : > { %v1696_v13 = vpop.xlane.xlu1 %1695  ;;  %v2787_v60 = vmax.f32 %v2785_v1, %v2786_v2 }
 0x1f6   : > { %v1736_v14 = vsub.f32 %v6207_v24, %v1696_v13  ;;  %v1693_v10 = vpop.xlane.xlu0 %1692  ;;  %v2791_v24 = vsel %vm255_vm0, %v2768_v56, -inf }
 0x1f7   : > { %v1735_v4 = vsub.f32 %v6209_v17, %v1693_v10  ;;  %v6271_v33 = vpop.eup %5210  ;;  %v2790_v17 = vsel %vm255_vm0, %v2767_v22, -inf }
 0x1f8   : > { %v1755_v63 = vmul.f32 1.442695, %v1736_v14  ;;  %v1784_v19 = vsel %vm255_vm0, %v6271_v33, 0.0  ;;  %v6279_v27 = vpop.eup %5212  ;;  %v2792_v32 = vmax.f32 %v2790_v17, %v2791_v24  ;;  %v4846_v17 = vpop.f32.mrb[10].mxu0 }
 0x1f9   : > { %v1753_v11 = vmul.f32 1.442695, %v1735_v4  ;;  %v1781_v44 = vsel %vm255_vm0, %v6279_v27, 0.0 }
 0x1fa   : > { %5214 = vpow2.f32 %v1755_v63  ;;  %v2793_v42 = vrot.slane %v2792_v32, 4 }
 0x1fb   : > { %5216 = vpow2.f32 %v1753_v11 }
 0x1fc   : > { %v2794_v51 = vmax.f32 %v2792_v32, %v2793_v42  ;;  %v6314_v32 = vmul.f32 0.35355338, %v4846_v17 }
 0x1fe   : > { %v2795_v55 = vrot.slane %v2794_v51, 2 }
 0x200   : > { %v1702_v29 = vpop.xlane.xlu0 %1701  ;;  %1785 = vadd.xlane.f32.xlu0 %v1784_v19  ;;  %v2796_v62 = vmax.f32 %v2794_v51, %v2795_v55 }
 0x201   : > { %v1738_v38 = vsub.f32 %v6215_v35, %v1702_v29 }
 0x202   : > { %v1708_v36 = vpop.xlane.xlu1 %1707  ;;  %v2797_v20 = vrot.slane %v2796_v62, 1 }
 0x203   : > { %v1740_v31 = vsub.f32 %v6217_v37, %v1708_v36  ;;  %v1759_v43 = vmul.f32 1.442695, %v1738_v38  ;;  %v4853_v36 = vpop.f32.mrb[10].mxu1  ;;  %v2351_v38 = vpop.f32.mrb[11].mxu0 }
 0x204   : > { %v6285_v45 = vpop.eup %5214  ;;  %v1699_v49 = vpop.xlane.xlu0 %1698  ;;  %1782 = vadd.xlane.f32.xlu0 %v1781_v44  ;;  %v2798_v9 = vmax.f32 %v2796_v62, %v2797_v20  ;;  %v6316_v41 = vmul.f32 0.35355338, %v4853_v36  ;;  %v6318_v42 = vmul.f32 0.35355338, %v2351_v38 }
 0x205   : > { %v1763_v46 = vmul.f32 1.442695, %v1740_v31  ;;  %5218 = vpow2.f32 %v1759_v43  ;;  %v1737_v53 = vsub.f32 %v6219_v39, %v1699_v49  ;;  %v1790_v35 = vsel %vm255_vm0, %v6285_v45, 0.0  ;;  %v6290_v37 = vpop.eup %5216 }
 0x206   : > { %v1705_v52 = vpop.xlane.xlu1 %1704  ;;  %1791 = vadd.xlane.f32.xlu1 %v1790_v35  ;;  %v1787_v61 = vsel %vm255_vm0, %v6290_v37, 0.0  ;;  %v2788_v39 = vrot.slane %v2787_v60, 1  ;;  %v2855_v47 = vsub.f32 %v2767_v22, %v2798_v9  ;;  %v2856_v13 = vsub.f32 %v2768_v56, %v2798_v9 }
 0x207   : > { %5220 = vpow2.f32 %v1763_v46  ;;  %v1739_v54 = vsub.f32 %v6223_v40, %v1705_v52  ;;  %v1757_v5 = vmul.f32 1.442695, %v1737_v53  ;;  %v2800_v46 = vsel %vm255_vm0, %v6314_v32, -inf }
 0x208   : > { %v2789_v8 = vmax.f32 %v2787_v60, %v2788_v39  ;;  %v2873_v7 = vmul.f32 1.442695, %v2855_v47  ;;  %v2875_v15 = vmul.f32 1.442695, %v2856_v13  ;;  %v2809_v1 = vsel %vm255_vm0, %v6316_v41, -inf  ;;  %v4860_v60 = vpop.f32.mrb[12].mxu0 }
 0x209   : > { %v1761_v58 = vmul.f32 1.442695, %v1739_v54  ;;  %5222 = vpow2.f32 %v1757_v5  ;;  %v2799_v51 = vsel %vm255_vm0, %v6318_v42, -inf }
 0x20a   : > { %1788 = vadd.xlane.f32.xlu1 %v1787_v61  ;;  %v2853_v12 = vsub.f32 %v2765_v21, %v2789_v8  ;;  %v2854_v25 = vsub.f32 %v2766_v16, %v2789_v8  ;;  %v2801_v54 = vmax.f32 %v2799_v51, %v2800_v46 }
 0x20b   : > { %5224 = vpow2.f32 %v1761_v58 }
 0x20c   : > { %v2869_v4 = vmul.f32 1.442695, %v2853_v12  ;;  %v2871_v63 = vmul.f32 1.442695, %v2854_v25  ;;  %v2802_v39 = vrot.slane %v2801_v54, 4 }
 0x20e   : > { %5226 = vpow2.f32 %v2869_v4  ;;  %v2803_v12 = vmax.f32 %v2801_v54, %v2802_v39 }
 0x20f   : > { %v6295_v40 = vpop.eup %5218  ;;  %5228 = vpow2.f32 %v2871_v63  ;;  %v6351_v63 = vmul.f32 0.35355338, %v4860_v60 }
 0x210   : > { %v1796_v10 = vsel %vm255_vm0, %v6295_v40, 0.0  ;;  %5230 = vpow2.f32 %v2873_v7  ;;  %v2804_v13 = vrot.slane %v2803_v12, 2 }
 0x211   : > { %v6297_v14 = vpop.eup %5220  ;;  %1797 = vadd.xlane.f32.xlu0 %v1796_v10  ;;  %5232 = vpow2.f32 %v2875_v15  ;;  %v2818_v17 = vsel %vm255_vm0, %v6351_v63, -inf }
 0x212   : > { %v1802_v11 = vsel %vm255_vm0, %v6297_v14, 0.0 }
 0x213   : > { %1803 = vadd.xlane.f32.xlu1 %v1802_v11  ;;  %v6303_v16 = vpop.eup %5222 }
 0x214   : > { %v1793_v56 = vsel %vm255_vm0, %v6303_v16, 0.0 }
 0x215   : > { %v6305_v26 = vpop.eup %5224  ;;  %v1714_v18 = vpop.xlane.xlu0 %1713  ;;  %1794 = vadd.xlane.f32.xlu0 %v1793_v56  ;;  %v2805_v56 = vmax.f32 %v2803_v12, %v2804_v13 }
 0x216   : > { %v1799_v19 = vsel %vm255_vm0, %v6305_v26, 0.0  ;;  %v1742_v21 = vsub.f32 %v6231_v34, %v1714_v18  ;;  %v2432_v34 = vpop.f32.mrb[11].mxu1 }
 0x217   : > { %1800 = vadd.xlane.f32.xlu1 %v1799_v19  ;;  %v6333_v52 = vmul.f32 0.35355338, %v2432_v34  ;;  %v4867_v61 = vpop.f32.mrb[12].mxu1  ;;  %v2513_v34 = vpop.f32.mrb[13].mxu0 }
 0x218   : > { %v1720_v22 = vpop.xlane.xlu1 %1719  ;;  %v1767_v24 = vmul.f32 1.442695, %v1742_v21  ;;  %v6320_v43 = vpop.eup %5226  ;;  %v6353_v11 = vmul.f32 0.35355338, %v4867_v61 }
 0x219   : > { %v1744_v23 = vsub.f32 %v6233_v48, %v1720_v22  ;;  %v1711_v28 = vpop.xlane.xlu0 %1710  ;;  %v2901_v49 = vsel %vm255_vm0, %v6320_v43, 0.0  ;;  %v2808_v58 = vsel %vm255_vm0, %v6333_v52, -inf }
 0x21a   : > { %5234 = vpow2.f32 %v1767_v24  ;;  %v1741_v30 = vsub.f32 %v6235_v0, %v1711_v28  ;;  %v6325_v0 = vpop.eup %5228  ;;  %v2810_v20 = vmax.f32 %v2808_v58, %v2809_v1  ;;  %v6380_v1 = vmul.f32 0.35355338, %v2513_v34 }
 0x21b   : > { %v1771_v29 = vmul.f32 1.442695, %v1744_v23  ;;  %v6335_v53 = vpop.eup %5230  ;;  %v2902_v35 = vsel %vm255_vm0, %v6325_v0, 0.0  ;;  %v2806_v23 = vrot.slane %v2805_v56, 1  ;;  %v702_v34 = vstv %s6393_s30  ;;  %s6533_s30 = sld [smem:[#allocation7 + $0x983]] }
 0x21c   : > { %v1717_v31 = vpop.xlane.xlu1 %1716  ;;  %v1765_v44 = vmul.f32 1.442695, %v1741_v30  ;;  %v6339_v2 = vpop.eup %5232  ;;  %v2903_v5 = vadd.f32 %v2902_v35, %v2901_v49  ;;  %v2910_v55 = vsel %vm255_vm0, %v6335_v53, 0.0  ;;  %v2811_v25 = vrot.slane %v2810_v20, 4 }
 0x21d   : > { %5236 = vpow2.f32 %v1771_v29  ;;  %v1743_v48 = vsub.f32 %v6239_v50, %v1717_v31  ;;  %v2911_v62 = vsel %vm255_vm0, %v6339_v2, 0.0  ;;  %v2827_v29 = vsel %vm255_vm0, %v6353_v11, -inf }
 0x21e   : > { %5238 = vpow2.f32 %v1765_v44  ;;  %v2912_v8 = vadd.f32 %v2911_v62, %v2910_v55  ;;  %v2904_v9 = vrot.slane %v2903_v5, 4  ;;  %v2812_v10 = vmax.f32 %v2810_v20, %v2811_v25 }
 0x21f   : > { %v1769_v50 = vmul.f32 1.442695, %v1743_v48  ;;  %v2807_v38 = vmax.f32 %v2805_v56, %v2806_v23  ;;  %v2594_v48 = vpop.f32.mrb[13].mxu1  ;;  %v2817_v60 = vsel %vm255_vm0, %v6380_v1, -inf  ;;  %v694_v62 = vstv %s6359_s23  ;;  %s6511_s23 = sld [smem:[#allocation7 + $0x981]] }
 0x220   : > { %v6357_v15 = vadd.f32 %v2904_v9, %v2903_v5  ;;  %v2813_v18 = vrot.slane %v2812_v10, 2  ;;  %v2913_v21 = vrot.slane %v2912_v8, 4  ;;  %v6382_v51 = vmul.f32 0.35355338, %v2594_v48 }
 0x221   : > { %5240 = vpow2.f32 %v1769_v50  ;;  %v2857_v54 = vsub.f32 %v6318_v42, %v2807_v38  ;;  %v2858_v5 = vsub.f32 %v6314_v32, %v2807_v38  ;;  %v2819_v9 = vmax.f32 %v2817_v60, %v2818_v17  ;;  %v6431_v60 = vld [vmem:[%s5638_s9 + $0x28] sm:$0xff] }
 0x222   : > { %v2814_v24 = vmax.f32 %v2812_v10, %v2813_v18  ;;  %v6378_v49 = vadd.f32 %v2913_v21, %v2912_v8  ;;  %v2826_v61 = vsel %vm255_vm0, %v6382_v51, -inf  ;;  %v6410_v21 = vld [vmem:[%s5638_s9 + $0x8] sm:$0xff]  ;;  %v698_v17 = vstv %s6374_s18  ;;  %s6531_s18 = sld [smem:[#allocation7 + $0x982]] }
 0x223   : > { %v2877_v39 = vmul.f32 1.442695, %v2857_v54  ;;  %v2879_v42 = vmul.f32 1.442695, %v2858_v5  ;;  %v2828_v12 = vmax.f32 %v2826_v61, %v2827_v29  ;;  %v696_v23 = vmul.f32 %v6410_v21, %v694_v62 }
 0x224   : > { %v6347_v47 = vpop.eup %5234  ;;  %v2815_v31 = vrot.slane %v2814_v24, 1  ;;  %v708_v48 = vstv %s6395_s4  ;;  %s6552_s4 = sld [smem:[#allocation7 + $0xa00]] }
 0x225   : > { %v1808_v4 = vsel %vm255_vm0, %v6347_v47, 0.0  ;;  %v700_v38 = vadd.f32 %v698_v17, %v696_v23  ;;  %v710_v61 = vmul.f32 %v6431_v60, %v708_v48  ;;  %v727_v23 = vstv %s6414_s28  ;;  %s6569_s28 = sld [smem:[#allocation7 + $0xa02]] }
 0x226   : > { %1809 = vadd.xlane.f32.xlu0 %v1808_v4  ;;  %v2816_v55 = vmax.f32 %v2814_v24, %v2815_v31  ;;  %v6401_v4 = vld [vmem:[%s5638_s9] sm:$0xff] }
 0x227   : > { %v6355_v7 = vpop.eup %5236  ;;  %v695_v56 = vmul.f32 %v6401_v4, %v694_v62 }
 0x228   : > { %v1814_v19 = vsel %vm255_vm0, %v6355_v7, 0.0  ;;  %v6363_v22 = vpop.eup %5238  ;;  %v2859_v32 = vsub.f32 %v6333_v52, %v2816_v55  ;;  %v795_v36 = vstv %s6531_s18  ;;  %s6641_s18 = sld [smem:[#allocation7 + $0xb80]] }
 0x229   : > { %1815 = vadd.xlane.f32.xlu1 %v1814_v19  ;;  %v1805_v28 = vsel %vm255_vm0, %v6363_v22, 0.0  ;;  %v699_v29 = vadd.f32 %v698_v17, %v695_v56 }
 0x22a   : > { %1806 = vadd.xlane.f32.xlu0 %v1805_v28  ;;  %v2881_v10 = vmul.f32 1.442695, %v2859_v32 }
 0x22b   : > { %v6371_v30 = vpop.eup %5240  ;;  %v1726_v44 = vpop.xlane.xlu0 %1725 }
 0x22c   : > { %v1811_v46 = vsel %vm255_vm0, %v6371_v30, 0.0  ;;  %v1746_v35 = vsub.f32 %v6247_v3, %v1726_v44 }
 0x22d   : > { %v1732_v50 = vpop.xlane.xlu1 %1731  ;;  %1812 = vadd.xlane.f32.xlu1 %v1811_v46  ;;  %v6419_v46 = vld [vmem:[%s5638_s9 + $0x10] sm:$0xff] }
 0x22e   : > { %v1748_v58 = vsub.f32 %v6249_v6, %v1732_v50  ;;  %v1775_v3 = vmul.f32 1.442695, %v1746_v35  ;;  %v2860_v6 = vsub.f32 %v6316_v41, %v2816_v55  ;;  %v2820_v41 = vrot.slane %v2819_v9, 4  ;;  %v6423_v35 = vld [vmem:[%s5638_s9 + $0x18] sm:$0xff]  ;;  %v6427_v55 = vld [vmem:[%s5638_s9 + $0x20] sm:$0xff] }
 0x22f   : > { %v1723_v8 = vpop.xlane.xlu0 %1722  ;;  %v703_v50 = vmul.f32 %v6419_v46, %v702_v34  ;;  %v704_v54 = vmul.f32 %v6423_v35, %v702_v34 }
 0x230   : > { %v1779_v20 = vmul.f32 1.442695, %v1748_v58  ;;  %5242 = vpow2.f32 %v1775_v3  ;;  %v1745_v13 = vsub.f32 %v6251_v57, %v1723_v8  ;;  %v2883_v18 = vmul.f32 1.442695, %v2860_v6  ;;  %v6442_v6 = vld [vmem:[%s5638_s9 + $0x38] sm:$0xff] }
 0x231   : > { %v1729_v25 = vpop.xlane.xlu1 %1728  ;;  %v2829_v57 = vrot.slane %v2828_v12, 4  ;;  %v2821_v28 = vmax.f32 %v2819_v9, %v2820_v41  ;;  %v709_v58 = vmul.f32 %v6427_v55, %v708_v48  ;;  %v705_v3 = vadd.f32 %v703_v50, %v699_v29 }
 0x232   : > { %5244 = vpow2.f32 %v1779_v20  ;;  %v1747_v52 = vsub.f32 %v6255_v59, %v1729_v25  ;;  %v1773_v19 = vmul.f32 1.442695, %v1745_v13  ;;  %v6438_v20 = vld [vmem:[%s5638_s9 + $0x30] sm:$0xff]  ;;  %s6461_s9 = sld [smem:[#allocation7 + $0x900]] }
 0x233   : > { %5246 = vpow2.f32 %v2877_v39  ;;  %v2830_v59 = vmax.f32 %v2828_v12, %v2829_v57  ;;  %v2822_v31 = vrot.slane %v2821_v28, 2  ;;  %v706_v39 = vadd.f32 %v704_v54, %v700_v38 }
 0x234   : > { %v1777_v24 = vmul.f32 1.442695, %v1747_v52  ;;  %5248 = vpow2.f32 %v2879_v42  ;;  %v714_v42 = vstv %s6404_s25  ;;  %v723_v12 = vstv %s6407_s27  ;;  %s6561_s25 = sld [smem:[#allocation8 + $0x14]]  ;;  %s6567_s27 = sld [smem:[#allocation7 + $0xa01]] }
 0x235   : > { %5250 = vpow2.f32 %v1773_v19  ;;  %v2831_v44 = vrot.slane %v2830_v59, 2  ;;  %v2823_v5 = vmax.f32 %v2821_v28, %v2822_v31  ;;  %v715_v8 = vmul.f32 %v6438_v20, %v714_v42 }
 0x236   : > { %5252 = vpow2.f32 %v1777_v24  ;;  %v716_v9 = vmul.f32 %v6442_v6, %v714_v42  ;;  %v712_v56 = vadd.f32 %v710_v61, %v706_v39  ;;  %v724_v52 = vmul.f32 %v6401_v4, %v723_v12 }
 0x237   : > { %5254 = vpow2.f32 %v2881_v10  ;;  %v2832_v62 = vmax.f32 %v2830_v59, %v2831_v44  ;;  %v2824_v32 = vrot.slane %v2823_v5, 1  ;;  %v711_v10 = vadd.f32 %v709_v58, %v705_v3 }
 0x238   : > { %5256 = vpow2.f32 %v2883_v18  ;;  %v725_v57 = vmul.f32 %v6410_v21, %v723_v12  ;;  %v718_v29 = vadd.f32 %v716_v9, %v712_v56  ;;  %v728_v44 = vadd.f32 %v727_v23, %v724_v52 }
 0x239   : > { %v2833_v13 = vrot.slane %v2832_v62, 1  ;;  %v2825_v19 = vmax.f32 %v2823_v5, %v2824_v32  ;;  %v717_v59 = vadd.f32 %v715_v8, %v711_v10  ;;  %v731_v8 = vstv %s6435_s29  ;;  %s6575_s29 = sld [smem:[#allocation7 + $0xa03]] }
 0x23a   : > { %v6446_v25 = vpop.eup %5242  ;;  %721 = vst.msk [vmem:[#allocation2 + $0x108] sm:$0xff] %vm255_vm0, %v718_v29  ;;  %v732_v10 = vmul.f32 %v6419_v46, %v731_v8  ;;  %v733_v52 = vmul.f32 %v6423_v35, %v731_v8  ;;  %v760_v8 = vstv %s6481_s22  ;;  %s6600_s22 = sld [smem:[#allocation7 + $0xa83]] }
 0x23b   : > { %6915 = vst [vmem:[#allocation15_spill] sm:$0xff] %v6446_v25  ;;  %v1820_v41 = vsel %vm255_vm0, %v6446_v25, 0.0  ;;  %v2834_v17 = vmax.f32 %v2832_v62, %v2833_v13  ;;  %v2861_v34 = vsub.f32 %v6380_v1, %v2825_v19  ;;  %v2862_v48 = vsub.f32 %v6351_v63, %v2825_v19  ;;  %720 = vst.msk [vmem:[#allocation2 + $0x100] sm:$0xff] %vm255_vm0, %v717_v59 }
 0x23c   : > { %v6451_v18 = vpop.eup %5244  ;;  %v729_v63 = vadd.f32 %v727_v23, %v725_v57  ;;  %v737_v19 = vstv %s6449_s20  ;;  %s6580_s20 = sld [smem:[#allocation7 + $0xa80]] }
 0x23d   : > { %6916 = vst [vmem:[#allocation16_spill] sm:$0xff] %v6451_v18  ;;  %v6457_v24 = vpop.eup %5246  ;;  %v1826_v28 = vsel %vm255_vm0, %v6451_v18, 0.0  ;;  %v2863_v5 = vsub.f32 %v6382_v51, %v2834_v17  ;;  %v2864_v58 = vsub.f32 %v6353_v11, %v2834_v17  ;;  %v2885_v3 = vmul.f32 1.442695, %v2861_v34 }
 0x23e   : > { %v6463_v38 = vpop.eup %5248  ;;  %v2919_v31 = vsel %vm255_vm0, %v6457_v24, 0.0  ;;  %v2887_v51 = vmul.f32 1.442695, %v2862_v48  ;;  %v734_v17 = vadd.f32 %v732_v10, %v728_v44  ;;  %v735_v59 = vadd.f32 %v733_v52, %v729_v63 }
 0x23f   : > { %v6473_v50 = vpop.eup %5250  ;;  %v2920_v54 = vsel %vm255_vm0, %v6463_v38, 0.0  ;;  %v2889_v42 = vmul.f32 1.442695, %v2863_v5  ;;  %v2891_v32 = vmul.f32 1.442695, %v2864_v58  ;;  %5258 = vpow2.f32 %v2885_v3 }
 0x240   : > { %v6485_v1 = vpop.eup %5252  ;;  %v1817_v61 = vsel %vm255_vm0, %v6473_v50, 0.0  ;;  %v2921_v62 = vadd.f32 %v2920_v54, %v2919_v31  ;;  %5260 = vpow2.f32 %v2887_v51  ;;  %v738_v29 = vmul.f32 %v6427_v55, %v737_v19 }
 0x241   : > { %6917 = vst [vmem:[#allocation17_spill] sm:$0xff] %v6485_v1  ;;  %v6489_v11 = vpop.eup %5254  ;;  %v1823_v39 = vsel %vm255_vm0, %v6485_v1, 0.0  ;;  %1818 = vadd.xlane.f32.xlu0 %v1817_v61  ;;  %5262 = vpow2.f32 %v2889_v42  ;;  %v739_v31 = vmul.f32 %v6431_v60, %v737_v19  ;;  %v958_v44 = vld [vmem:[#allocation2 + $0x108] sm:$0xff]  ;;  %v743_v5 = vstv %s6469_s21  ;;  %s6592_s21 = sld [smem:[#allocation7 + $0xa81]] }
 0x242   : > { %v6494_v9 = vpop.eup %5256  ;;  %1824 = vadd.xlane.f32.xlu1 %v1823_v39  ;;  %v2922_v12 = vrot.slane %v2921_v62, 4  ;;  %v2928_v13 = vsel %vm255_vm0, %v6489_v11, 0.0  ;;  %5264 = vpow2.f32 %v2891_v32  ;;  %v957_v54 = vld [vmem:[#allocation2 + $0x100] sm:$0xff]  ;;  %v752_v58 = vstv %s6461_s9  ;;  %s6588_s9 = sld [smem:[#allocation8 + $0x15]] }
 0x243   : > { %v2929_v56 = vsel %vm255_vm0, %v6494_v9, 0.0  ;;  %v6518_v61 = vpack.c.bf16 %v958_v44, %v957_v54  ;;  %v744_v63 = vmul.f32 %v6438_v20, %v743_v5  ;;  %v753_v51 = vmul.f32 %v6401_v4, %v752_v58 }
 0x244   : > { %v6507_v57 = vadd.f32 %v2922_v12, %v2921_v62  ;;  %v2930_v23 = vadd.f32 %v2929_v56, %v2928_v13  ;;  %v741_v62 = vadd.f32 %v739_v31, %v735_v59  ;;  %v754_v39 = vmul.f32 %v6410_v21, %v752_v58 }
 0x245   : > { %1821 = vadd.xlane.f32.xlu0 %v1820_v41  ;;  %v740_v41 = vadd.f32 %v738_v29, %v734_v17  ;;  %5075 = vmatprep.subr.bf16.mxu0 %v6518_v61  ;;  %v756_v32 = vstv %s6471_s17  ;;  %v766_v12 = vstv %s6483_s24  ;;  %v761_v19 = vmul.f32 %v6419_v46, %v760_v8  ;;  %s6594_s17 = sld [smem:[#allocation7 + $0xa82]]  ;;  %s6612_s24 = sld [smem:[#allocation7 + $0xb00]] }
 0x246   : > { %1827 = vadd.xlane.f32.xlu1 %v1826_v28  ;;  %v2931_v48 = vrot.slane %v2930_v23, 4  ;;  %v745_v28 = vmul.f32 %v6442_v6, %v743_v5  ;;  %v757_v56 = vadd.f32 %v756_v32, %v753_v51  ;;  %v758_v52 = vadd.f32 %v756_v32, %v754_v39 }
 0x247   : > { %v746_v42 = vadd.f32 %v744_v63, %v740_v41  ;;  %v762_v17 = vmul.f32 %v6423_v35, %v760_v8  ;;  %v767_v59 = vmul.f32 %v6427_v55, %v766_v12  ;;  %v768_v29 = vmul.f32 %v6431_v60, %v766_v12 }
 0x248   : > { %v6529_v13 = vadd.f32 %v2931_v48, %v2930_v23  ;;  %v747_v10 = vadd.f32 %v745_v28, %v741_v62  ;;  %v772_v31 = vstv %s6509_s8  ;;  %v781_v48 = vstv %s6503_s26  ;;  %s6614_s26 = sld [smem:[#allocation8 + $0x16]]  ;;  %s6623_s8 = sld [smem:[#allocation7 + $0xb02]] }
 0x249   : > { %749 = vst.msk [vmem:[#allocation2 + $0x110] sm:$0xff] %vm255_vm0, %v746_v42  ;;  %v6540_v23 = vpop.eup %5258  ;;  %v785_v54 = vstv %s6505_s6  ;;  %v789_v44 = vstv %s6511_s23  ;;  %v763_v41 = vadd.f32 %v761_v19, %v757_v56  ;;  %v764_v62 = vadd.f32 %v762_v17, %v758_v52  ;;  %s6621_s6 = sld [smem:[#allocation7 + $0xb01]]  ;;  %s6637_s23 = sld [smem:[#allocation7 + $0xb03]] }
 0x24a   : > { %750 = vst.msk [vmem:[#allocation2 + $0x118] sm:$0xff] %vm255_vm0, %v747_v10  ;;  %v6547_v5 = vpop.eup %5260  ;;  %v2937_v58 = vsel %vm255_vm0, %v6540_v23, 0.0  ;;  %v773_v63 = vmul.f32 %v6438_v20, %v772_v31  ;;  %v774_v39 = vmul.f32 %v6442_v6, %v772_v31  ;;  %v782_v42 = vmul.f32 %v6401_v4, %v781_v48 }
 0x24b   : > { %v6554_v28 = vpop.eup %5262  ;;  %v2938_v51 = vsel %vm255_vm0, %v6547_v5, 0.0  ;;  %v783_v32 = vmul.f32 %v6410_v21, %v781_v48  ;;  %v769_v56 = vadd.f32 %v767_v59, %v763_v41  ;;  %v770_v52 = vadd.f32 %v768_v29, %v764_v62 }
 0x24c   : > { %v6563_v8 = vpop.eup %5264  ;;  %v2939_v12 = vadd.f32 %v2938_v51, %v2937_v58  ;;  %v2946_v10 = vsel %vm255_vm0, %v6554_v28, 0.0  ;;  %v786_v31 = vadd.f32 %v785_v54, %v782_v42  ;;  %v790_v3 = vmul.f32 %v6419_v46, %v789_v44 }
 0x24d   : > { %v2947_v17 = vsel %vm255_vm0, %v6563_v8, 0.0  ;;  %v787_v48 = vadd.f32 %v785_v54, %v783_v32  ;;  %v775_v59 = vadd.f32 %v773_v63, %v769_v56  ;;  %v776_v29 = vadd.f32 %v774_v39, %v770_v52 }
 0x24e   : > { %v2940_v58 = vrot.slane %v2939_v12, 4  ;;  %v2948_v51 = vadd.f32 %v2947_v17, %v2946_v10  ;;  %v791_v62 = vmul.f32 %v6423_v35, %v789_v44  ;;  %v792_v34 = vadd.f32 %v790_v3, %v786_v31 }
 0x24f   : > { %v2069_v19 = vpop.trf.xlu0  ;;  %v801_v18 = vstv %s6533_s30  ;;  %778 = vst.msk [vmem:[#allocation2 + $0x120] sm:$0xff] %vm255_vm0, %v775_v59  ;;  %779 = vst.msk [vmem:[#allocation2 + $0x128] sm:$0xff] %vm255_vm0, %v776_v29  ;;  %v796_v63 = vmul.f32 %v6427_v55, %v795_v36  ;;  %v797_v39 = vmul.f32 %v6431_v60, %v795_v36  ;;  %v810_v17 = vstv %s6552_s4  ;;  %s6643_s30 = sld [smem:[#allocation8 + $0x17]]  ;;  %s6648_s4 = sld [smem:[#allocation7 + $0xb81]] }
 0x250   : > { %4872 = vmatprep.mubr.msk.f32.mxu0 %vm255_vm0, %v2069_v19  ;;  %v959_v41 = vld [vmem:[#allocation2 + $0x110] sm:$0xff]  ;;  %v6582_v42 = vadd.f32 %v2940_v58, %v2939_v12  ;;  %v2949_v54 = vrot.slane %v2948_v51, 4  ;;  %v793_v10 = vadd.f32 %v791_v62, %v787_v48  ;;  %v802_v12 = vmul.f32 %v6438_v20, %v801_v18 }
 0x251   : > { %v960_v32 = vld [vmem:[#allocation2 + $0x118] sm:$0xff]  ;;  %v803_v56 = vmul.f32 %v6442_v6, %v801_v18  ;;  %v798_v19 = vadd.f32 %v796_v63, %v792_v34  ;;  %v811_v31 = vmul.f32 %v6401_v4, %v810_v17  ;;  %v812_v48 = vmul.f32 %v6410_v21, %v810_v17 }
 0x252   : > { %v5078_v44 = vpack.c.bf16 %v960_v32, %v959_v41  ;;  %v799_v18 = vadd.f32 %v797_v39, %v793_v10  ;;  %v814_v58 = vstv %s6561_s25  ;;  %v6606_v29 = vadd.f32 %v2949_v54, %v2948_v51  ;;  %s6650_s25 = sld [smem:[#allocation7 + $0xb82]] }
 0x253   : > { %v2070_v3 = vpop.trf.xlu0  ;;  %v804_v41 = vadd.f32 %v802_v12, %v798_v19  ;;  %v818_v62 = vstv %s6567_s27  ;;  %v824_v32 = vstv %s6569_s28  ;;  %v815_v63 = vadd.f32 %v814_v58, %v811_v31  ;;  %s6666_s27 = sld [smem:[#allocation7 + $0xb83]]  ;;  %s4430_s28 = sshll.u32 %s5634_s5, 7 }
 0x254   : > { %4873 = vmatmul.mubr.msk.f32.vlgmr.msra.gmra.mrb[14].mxu0 %vm255_vm0, %v2070_v3  ;;  %5079 = vmatprep.subr.bf16.mxu1 %v5078_v44  ;;  %v805_v34 = vadd.f32 %v803_v56, %v799_v18  ;;  %v816_v3 = vadd.f32 %v814_v58, %v812_v48  ;;  %v820_v51 = vmul.f32 %v6423_v35, %v818_v62  ;;  %v830_v10 = vstv %s6575_s29  ;;  %s6806_s29 = scalar_lea.vmem [#allocation10], %s4430_s28 }
 0x255   : > { %5077 = vmatpush3.bf16.msra.mxu0 %v6518_v61  ;;  %v819_v61 = vmul.f32 %v6419_v46, %v818_v62  ;;  %807 = vst.msk [vmem:[#allocation2 + $0x130] sm:$0xff] %vm255_vm0, %v804_v41  ;;  %v825_v54 = vmul.f32 %v6427_v55, %v824_v32  ;;  %v826_v39 = vmul.f32 %v6431_v60, %v824_v32  ;;  %v839_v31 = vstv %s6580_s20  ;;  %s4641_s20 = sshll.u32 %s5515_s16, 11  ;;  %s4310_s16 = scalar_lea.sflag [#allocation5], %s5634_s5 }
 0x256   : > { %v961_v12 = vld [vmem:[#allocation2 + $0x120] sm:$0xff]  ;;  %v962_v56 = vld [vmem:[#allocation2 + $0x128] sm:$0xff]  ;;  %808 = vst.msk [vmem:[#allocation2 + $0x138] sm:$0xff] %vm255_vm0, %v805_v34  ;;  %v831_v17 = vmul.f32 %v6438_v20, %v830_v10  ;;  %v832_v18 = vmul.f32 %v6442_v6, %v830_v10  ;;  %v840_v41 = vmul.f32 %v6401_v4, %v839_v31  ;;  %v841_v62 = vmul.f32 %v6410_v21, %v839_v31 }
 0x257   : > { %v2101_v59 = vpop.trf.xlu1  ;;  %v821_v19 = vadd.f32 %v819_v61, %v815_v63  ;;  %v6629_v58 = vpack.c.bf16 %v962_v56, %v961_v12  ;;  %v843_v52 = vstv %s6588_s9  ;;  %v847_v34 = vstv %s6592_s21  ;;  %s4323_s9 = sshll.u32 %s6806_s29, 4  ;;  %s6839_s9 = int_to_ptr.vmem [resolvable:$true] %s4323_s9 }
 0x258   : > { %4879 = vmatprep.mubr.msk.f32.mxu1 %vm255_vm0, %v2101_v59  ;;  %v822_v59 = vadd.f32 %v820_v51, %v816_v3  ;;  %v853_v63 = vstv %s6594_s17  ;;  %v844_v10 = vadd.f32 %v843_v52, %v840_v41  ;;  %v845_v12 = vadd.f32 %v843_v52, %v841_v62 }
 0x259   : > { %v827_v32 = vadd.f32 %v825_v54, %v821_v19  ;;  %5083 = vmatprep.subr.bf16.mxu0 %v6629_v58  ;;  %v859_v56 = vstv %s6600_s22  ;;  %v848_v51 = vmul.f32 %v6419_v46, %v847_v34  ;;  %v849_v54 = vmul.f32 %v6423_v35, %v847_v34  ;;  %s6837_s22 = scalar_lea.hbm %s6894_s3, %s4641_s20 }
 0x25a   : > { %v828_v61 = vadd.f32 %v826_v39, %v822_v59  ;;  %v854_v19 = vmul.f32 %v6427_v55, %v853_v63  ;;  %v855_v52 = vmul.f32 %v6431_v60, %v853_v63  ;;  %v860_v39 = vmul.f32 %v6438_v20, %v859_v56 }
 0x25b   : > { %v2102_v48 = vpop.trf.xlu1  ;;  %v833_v3 = vadd.f32 %v831_v17, %v827_v32  ;;  %v861_v31 = vmul.f32 %v6442_v6, %v859_v56  ;;  %v851_v59 = vadd.f32 %v849_v54, %v845_v12  ;;  %v868_v41 = vstv %s6612_s24  ;;  %s5390_s24 = scalar_lea.vmem %s6839_s9, 2048 }
 0x25c   : > { %4880 = vmatmul.mubr.msk.f32.vlgmr.msra.gmra.mrb[14].mxu1 %vm255_vm0, %v2102_v48  ;;  %v963_v17 = vld [vmem:[#allocation2 + $0x130] sm:$0xff]  ;;  %v850_v48 = vadd.f32 %v848_v51, %v844_v10  ;;  %v872_v62 = vstv %s6614_s26  ;;  %v869_v34 = vmul.f32 %v6401_v4, %v868_v41  ;;  %v876_v63 = vstv %s6621_s6  ;;  %p5391_p10 = scmp.ne.s32.totalorder %s6839_s9, %s5390_s24  ;;  %s5471_s26 = smov [#allocation10]  }
 0x25d   : > { %5081 = vmatpush3.bf16.msra.mxu1 %v5078_v44  ;;  %v834_v44 = vadd.f32 %v832_v18, %v828_v61  ;;  %836 = vst.msk [vmem:[#allocation2 + $0x140] sm:$0xff] %vm255_vm0, %v833_v3  ;;  %v964_v32 = vld [vmem:[#allocation2 + $0x138] sm:$0xff]  ;;  %v870_v18 = vmul.f32 %v6410_v21, %v868_v41  ;;  %v882_v61 = vstv %s6623_s8  ;;  %v857_v25 = vadd.f32 %v855_v52, %v851_v59  ;;  %s5394_s6 = sshll.u32 %s5471_s26, 4  ;;  %s5395_s6 = int_to_ptr.vmem [resolvable:$false] %s5394_s6 }
 0x25e   : > { %v6663_v36 = vpack.c.bf16 %v964_v32, %v963_v17  ;;  %v856_v56 = vadd.f32 %v854_v19, %v850_v48  ;;  %v877_v3 = vmul.f32 %v6419_v46, %v876_v63  ;;  %v873_v10 = vadd.f32 %v872_v62, %v869_v34  ;;  %p5392_p12 = pnand %p5391_p10, %p6926_p1  ;;  %s5396_s8 = scalar_lea.vmem %s5395_s6, 4096 }
 0x25f   : > { %837 = vst.msk [vmem:[#allocation2 + $0x148] sm:$0xff] %vm255_vm0, %v834_v44  ;;  %v874_v12 = vadd.f32 %v872_v62, %v870_v18  ;;  %v878_v51 = vmul.f32 %v6423_v35, %v876_v63  ;;  %v883_v54 = vmul.f32 %v6427_v55, %v882_v61  ;;  %v863_v17 = vadd.f32 %v861_v31, %v857_v25  ;;  %p5397_p5 = scmp.lt.s32.totalorder %s6839_s9, %s5395_s6  ;;  %p5398_p2 = scmp.lt.s32.totalorder %s5396_s8, %s5390_s24 }
 0x260   : > { %5087 = vmatprep.subr.bf16.mxu1 %v6663_v36  ;;  %v862_v44 = vadd.f32 %v860_v39, %v856_v56  ;;  %v884_v19 = vmul.f32 %v6431_v60, %v882_v61  ;;  %v888_v52 = vstv %s6637_s23  ;;  %v879_v48 = vadd.f32 %v877_v3, %v873_v10  ;;  %p5393_p0 = pneg %p5392_p12 }
 0x261   : > { %v880_v59 = vadd.f32 %v878_v51, %v874_v12  ;;  %v889_v41 = vmul.f32 %v6438_v20, %v888_v52  ;;  %v890_v32 = vmul.f32 %v6442_v6, %v888_v52  ;;  %866 = vst.msk [vmem:[#allocation2 + $0x158] sm:$0xff] %vm255_vm0, %v863_v17  ;;  %v897_v62 = vstv %s6641_s18  ;;  %p5399_p13 = por %p5398_p2, %p5397_p5 }
 0x262   : > { %865 = vst.msk [vmem:[#allocation2 + $0x150] sm:$0xff] %vm255_vm0, %v862_v44  ;;  %v901_v34 = vstv %s6643_s30  ;;  %v905_v18 = vstv %s6648_s4  ;;  %v911_v63 = vstv %s6650_s25  ;;  %v885_v39 = vadd.f32 %v883_v54, %v879_v48 }
 0x263   : > { %v886_v25 = vadd.f32 %v884_v19, %v880_v59  ;;  %v898_v31 = vmul.f32 %v6401_v4, %v897_v62  ;;  %v899_v61 = vmul.f32 %v6410_v21, %v897_v62  ;;  %v2951_v56 = vrot.slane %v6606_v29, 2  ;;  %p5400_p3 = pnand %p5399_p13, %p5393_p0 }
 0x264   : > { %v906_v3 = vmul.f32 %v6419_v46, %v905_v18  ;;  %v907_v10 = vmul.f32 %v6423_v35, %v905_v18  ;;  %v912_v12 = vmul.f32 %v6427_v55, %v911_v63  ;;  %v891_v51 = vadd.f32 %v889_v41, %v885_v39 }
 0x265   : > { %v892_v44 = vadd.f32 %v890_v32, %v886_v25  ;;  %v902_v17 = vadd.f32 %v901_v34, %v898_v31  ;;  %v913_v52 = vmul.f32 %v6431_v60, %v911_v63  ;;  %v903_v1 = vadd.f32 %v901_v34, %v899_v61 }
 0x266   : > { %v917_v54 = vstv %s6666_s27  ;;  %v6918_v4 = vrot.slane %v6357_v15, 2  ;;  %v6919_v21 = vrot.slane %v6378_v49, 2  ;;  %894 = vst.msk [vmem:[#allocation2 + $0x160] sm:$0xff] %vm255_vm0, %v891_v51  ;;  %v6920_v60 = vrot.slane %v6507_v57, 2 }
 0x267   : > { %895 = vst.msk [vmem:[#allocation2 + $0x168] sm:$0xff] %vm255_vm0, %v892_v44  ;;  %v908_v46 = vadd.f32 %v906_v3, %v902_v17  ;;  %v918_v35 = vmul.f32 %v6438_v20, %v917_v54  ;;  %v919_v55 = vmul.f32 %v6442_v6, %v917_v54  ;;  %v909_v41 = vadd.f32 %v907_v10, %v903_v1 }
 0x268   : > { %v2907_v19 = vadd.f32 %v6918_v4, %v6357_v15  ;;  %v2916_v48 = vadd.f32 %v6919_v21, %v6378_v49  ;;  %v2925_v59 = vadd.f32 %v6920_v60, %v6507_v57  ;;  %v6921_v62 = vrot.slane %v6529_v13, 2 }
 0x269   : > { %v914_v34 = vadd.f32 %v912_v12, %v908_v46  ;;  %v6922_v63 = vrot.slane %v6582_v42, 2  ;;  %v2952_v20 = vadd.f32 %v2951_v56, %v6606_v29  ;;  %v915_v6 = vadd.f32 %v913_v52, %v909_v41 }
 0x26a   : > { %v2908_v32 = vrot.slane %v2907_v19, 1  ;;  %v2917_v15 = vrot.slane %v2916_v48, 1  ;;  %v2934_v49 = vadd.f32 %v6921_v62, %v6529_v13  ;;  %v2926_v18 = vrot.slane %v2925_v59, 1 }
 0x26b   : > { %v2943_v39 = vadd.f32 %v6922_v63, %v6582_v42  ;;  %v920_v61 = vadd.f32 %v918_v35, %v914_v34  ;;  %v921_v10 = vadd.f32 %v919_v55, %v915_v6  ;;  %v2953_v51 = vrot.slane %v2952_v20, 1  ;;  %v966_v34 = vld [vmem:[#allocation2 + $0x148] sm:$0xff] }
 0x26c   : > { %v2909_v25 = vadd.f32 %v2908_v32, %v2907_v19  ;;  %v2918_v31 = vadd.f32 %v2917_v15, %v2916_v48  ;;  %v2927_v57 = vadd.f32 %v2926_v18, %v2925_v59  ;;  %v2935_v1 = vrot.slane %v2934_v49, 1 }
 0x26d   : > { %v2944_v3 = vrot.slane %v2943_v39, 1  ;;  %923 = vst.msk [vmem:[#allocation2 + $0x170] sm:$0xff] %vm255_vm0, %v920_v61  ;;  %924 = vst.msk [vmem:[#allocation2 + $0x178] sm:$0xff] %vm255_vm0, %v921_v10  ;;  %v2954_v42 = vadd.f32 %v2953_v51, %v2952_v20  ;;  %v969_v51 = vld [vmem:[#allocation2 + $0x160] sm:$0xff] }
 0x26e   : > { %5266 = vrcp.f32 %v2909_v25  ;;  %v2936_v13 = vadd.f32 %v2935_v1, %v2934_v49  ;;  %v967_v25 = vld [vmem:[#allocation2 + $0x150] sm:$0xff] }
 0x26f   : > { %5268 = vrcp.f32 %v2918_v31  ;;  %v2945_v12 = vadd.f32 %v2944_v3, %v2943_v39  ;;  %v968_v31 = vld [vmem:[#allocation2 + $0x158] sm:$0xff] }
 0x270   : > { %5270 = vrcp.f32 %v2927_v57  ;;  %v5094_v3 = vpack.c.bf16 %v968_v31, %v967_v25 }
 0x271   : > { %5272 = vrcp.f32 %v2936_v13  ;;  %v970_v13 = vld [vmem:[#allocation2 + $0x168] sm:$0xff] }
 0x272   : > { %5274 = vrcp.f32 %v2945_v12 }
 0x273   : > { %5276 = vrcp.f32 %v2954_v42 }
 0x274   : > { %v971_v42 = vld [vmem:[#allocation2 + $0x170] sm:$0xff] }
 0x278   : > { %v5267_v29 = vpop.eup %5266 }
 0x279   : > { %v5269_v56 = vpop.eup %5268  ;;  %v2981_v44 = vmul.f32 %v5267_v29, %v6320_v43  ;;  %v2982_v17 = vmul.f32 %v5267_v29, %v6325_v0  ;;  %v972_v29 = vld [vmem:[#allocation2 + $0x178] sm:$0xff] }
 0x27a   : > { %v5271_v52 = vpop.eup %5270  ;;  %v2983_v54 = vmul.f32 %v5269_v56, %v6335_v53  ;;  %v2984_v4 = vmul.f32 %v5269_v56, %v6339_v2 }
 0x27b   : > { %v5273_v19 = vpop.eup %5272  ;;  %v6715_v21 = vpack.c.bf16 %v2982_v17, %v2981_v44  ;;  %v2985_v48 = vmul.f32 %v5271_v52, %v6457_v24  ;;  %v2986_v46 = vmul.f32 %v5271_v52, %v6463_v38  ;;  %v5098_v17 = vpack.c.bf16 %v970_v13, %v969_v51 }
 0x27c   : > { %v5275_v35 = vpop.eup %5274  ;;  %v6719_v55 = vpack.c.bf16 %v2984_v4, %v2983_v54  ;;  %v2987_v60 = vmul.f32 %v5273_v19, %v6489_v11  ;;  %v2988_v43 = vmul.f32 %v5273_v19, %v6494_v9 }
 0x27d   : > { %v5277_v0 = vpop.eup %5276  ;;  %v6723_v59 = vpack.c.bf16 %v2986_v46, %v2985_v48  ;;  %v2989_v53 = vmul.f32 %v5275_v35, %v6540_v23  ;;  %v2990_v2 = vmul.f32 %v5275_v35, %v6547_v5  ;;  %v965_v5 = vld [vmem:[#allocation2 + $0x140] sm:$0xff] }
 0x27e   : > { %v6727_v41 = vpack.c.bf16 %v2988_v43, %v2987_v60  ;;  %v2991_v24 = vmul.f32 %v5277_v0, %v6554_v28  ;;  %v2992_v38 = vmul.f32 %v5277_v0, %v6563_v8  ;;  %v5090_v39 = vpack.c.bf16 %v966_v34, %v965_v5 }
 0x27f   : > { %v6731_v32 = vpack.c.bf16 %v2990_v2, %v2989_v53 }
 0x280   : > { %v6733_v15 = vpack.c.bf16 %v2992_v38, %v2991_v24  ;;  %v6923_v24 = vld [vmem:[#allocation17_spill] sm:$0xff] }
 0x28d   : > { %v1786_v11 = vpop.xlane.xlu0 %1785 }
 0x28e   : > { %5278 = vrcp.f32 %v1786_v11 }
 0x291   : > { %v1783_v9 = vpop.xlane.xlu0 %1782 }
 0x292   : > { %5280 = vrcp.f32 %v1783_v9 }
 0x293   : > { %v1792_v62 = vpop.xlane.xlu1 %1791 }
 0x294   : > { %5282 = vrcp.f32 %v1792_v62  ;;  %v6924_v62 = vld [vmem:[#allocation15_spill] sm:$0xff] }
 0x297   : > { %v1789_v49 = vpop.xlane.xlu1 %1788 }
 0x298   : > { %5284 = vrcp.f32 %v1789_v49  ;;  %v5279_v23 = vpop.eup %5278 }
 0x299   : > { %v1846_v8 = vmul.f32 %v5279_v23, %v6271_v33  ;;  %v6925_v23 = vld [vmem:[#allocation16_spill] sm:$0xff] }
 0x29c   : > { %v5281_v18 = vpop.eup %5280 }
 0x29d   : > { %v1845_v28 = vmul.f32 %v5281_v18, %v6279_v27 }
 0x29e   : > { %v1798_v63 = vpop.xlane.xlu0 %1797  ;;  %v5283_v6 = vpop.eup %5282 }
 0x29f   : > { %4886 = vmatprep.mubr.msk.f32.mxu0 %vm255_vm0, %v1845_v28  ;;  %5286 = vrcp.f32 %v1798_v63  ;;  %v1848_v1 = vmul.f32 %v5283_v6, %v6285_v45 }
 0x2a0   : > { %v1804_v20 = vpop.xlane.xlu1 %1803  ;;  %4887 = vmatmul.mubr.msk.f32.vlgmr.msra.gmra.mrb[16].mxu0 %vm255_vm0, %v1846_v8 }
 0x2a1   : > { %5085 = vmatpush3.bf16.msra.mxu0 %v6629_v58  ;;  %5288 = vrcp.f32 %v1804_v20 }
 0x2a2   : > { %v5285_v61 = vpop.eup %5284  ;;  %v1795_v57 = vpop.xlane.xlu0 %1794  ;;  %5091 = vmatprep.subr.bf16.mxu0 %v5090_v39 }
 0x2a3   : > { %5290 = vrcp.f32 %v1795_v57  ;;  %v1847_v33 = vmul.f32 %v5285_v61, %v6290_v37 }
 0x2a4   : > { %v1801_v27 = vpop.xlane.xlu1 %1800 }
 0x2a5   : > { %5292 = vrcp.f32 %v1801_v27  ;;  %4893 = vmatprep.mubr.msk.f32.mxu1 %vm255_vm0, %v1847_v33 }
 0x2a6   : > { %4894 = vmatmul.mubr.msk.f32.vlgmr.msra.gmra.mrb[16].mxu1 %vm255_vm0, %v1848_v1 }
 0x2a7   : > { %5089 = vmatpush3.bf16.msra.mxu1 %v6663_v36  ;;  %v5102_v36 = vpack.c.bf16 %v972_v29, %v971_v42 }
 0x2a8   : > { %5095 = vmatprep.subr.bf16.mxu1 %v5094_v3 }
 0x2a9   : > { %v5287_v58 = vpop.eup %5286 }
 0x2aa   : > { %v1850_v45 = vmul.f32 %v5287_v58, %v6295_v40 }
 0x2ab   : > { %v5289_v10 = vpop.eup %5288 }
 0x2ac   : > { %v1852_v52 = vmul.f32 %v5289_v10, %v6297_v14 }
 0x2ad   : > { %v5291_v12 = vpop.eup %5290 }
 0x2ae   : > { %v1849_v37 = vmul.f32 %v5291_v12, %v6303_v16 }
 0x2af   : > { %v5293_v56 = vpop.eup %5292 }
 0x2b0   : > { %v1851_v44 = vmul.f32 %v5293_v56, %v6305_v26  ;;  %4900 = vmatprep.mubr.msk.f32.mxu0 %vm255_vm0, %v1849_v37 }
 0x2b1   : > { %4901 = vmatmul.mubr.msk.f32.vlgmr.msra.gmra.mrb[18].mxu0 %vm255_vm0, %v1850_v45 }
 0x2b2   : > { %4907 = vmatprep.mubr.msk.f32.mxu1 %vm255_vm0, %v1851_v44  ;;  %5093 = vmatpush3.bf16.msra.mxu0 %v5090_v39 }
 0x2b3   : > { %4908 = vmatmul.mubr.msk.f32.vlgmr.msra.gmra.mrb[18].mxu1 %vm255_vm0, %v1852_v52  ;;  %v1810_v54 = vpop.xlane.xlu0 %1809  ;;  %5099 = vmatprep.subr.bf16.mxu0 %v5098_v17 }
 0x2b4   : > { %5097 = vmatpush3.bf16.msra.mxu1 %v5094_v3  ;;  %5294 = vrcp.f32 %v1810_v54 }
 0x2b5   : > { %5103 = vmatprep.subr.bf16.mxu1 %v5102_v36 }
 0x2b6   : > { %v1816_v40 = vpop.xlane.xlu1 %1815 }
 0x2b7   : > { %v1807_v16 = vpop.xlane.xlu0 %1806 }
 0x2b8   : > { %5296 = vrcp.f32 %v1807_v16 }
 0x2b9   : > { %5298 = vrcp.f32 %v1816_v40 }
 0x2ba   : > { %v1813_v14 = vpop.xlane.xlu1 %1812 }
 0x2bb   : > { %5300 = vrcp.f32 %v1813_v14 }
 0x2be   : > { %v5295_v26 = vpop.eup %5294 }
 0x2bf   : > { %v1854_v35 = vmul.f32 %v5295_v26, %v6347_v47 }
 0x2c2   : > { %v5297_v4 = vpop.eup %5296 }
 0x2c3   : > { %v5299_v19 = vpop.eup %5298  ;;  %v1853_v48 = vmul.f32 %v5297_v4, %v6363_v22 }
 0x2c4   : > { %v1856_v43 = vmul.f32 %v5299_v19, %v6355_v7 }
 0x2c5   : > { %v5301_v46 = vpop.eup %5300  ;;  %4914 = vmatprep.mubr.msk.f32.mxu0 %vm255_vm0, %v1853_v48 }
 0x2c6   : > { %v1855_v60 = vmul.f32 %v5301_v46, %v6371_v30  ;;  %4915 = vmatmul.mubr.msk.f32.vlgmr.msra.gmra.mrb[20].mxu0 %vm255_vm0, %v1854_v35 }
 0x2c7   : > { %5101 = vmatpush3.bf16.msra.mxu0 %v5098_v17 }
 0x2c8   : > { %4921 = vmatprep.mubr.msk.f32.mxu1 %vm255_vm0, %v1855_v60  ;;  %5107 = vmatprep.subr.bf16.mxu0 %v6715_v21 }
 0x2c9   : > { %4922 = vmatmul.mubr.msk.f32.vlgmr.msra.gmra.mrb[20].mxu1 %vm255_vm0, %v1856_v43 }
 0x2ca   : > { %5105 = vmatpush3.bf16.msra.mxu1 %v5102_v36 }
 0x2cb   : > { %5111 = vmatprep.subr.bf16.mxu1 %v6719_v55 }
 0x2ce   : > { %v1819_v22 = vpop.xlane.xlu0 %1818 }
 0x2cf   : > { %v1825_v47 = vpop.xlane.xlu1 %1824  ;;  %5302 = vrcp.f32 %v1819_v22 }
 0x2d0   : > { %5304 = vrcp.f32 %v1825_v47 }
 0x2d2   : > { %v1822_v0 = vpop.xlane.xlu0 %1821 }
 0x2d3   : > { %v1828_v30 = vpop.xlane.xlu1 %1827  ;;  %5306 = vrcp.f32 %v1822_v0 }
 0x2d4   : > { %5308 = vrcp.f32 %v1828_v30 }
 0x2d9   : > { %v5303_v7 = vpop.eup %5302 }
 0x2da   : > { %v5305_v53 = vpop.eup %5304  ;;  %v1857_v2 = vmul.f32 %v5303_v7, %v6473_v50 }
 0x2db   : > { %v1859_v38 = vmul.f32 %v5305_v53, %v6923_v24 }
 0x2dc   : > { %4928 = vmatprep.mubr.msk.f32.mxu0 %vm255_vm0, %v1857_v2 }
 0x2dd   : > { %v5307_v11 = vpop.eup %5306  ;;  %4935 = vmatprep.mubr.msk.f32.mxu1 %vm255_vm0, %v1859_v38 }
 0x2de   : > { %v5309_v9 = vpop.eup %5308  ;;  %v1858_v49 = vmul.f32 %v5307_v11, %v6924_v62 }
 0x2df   : > { %v1860_v5 = vmul.f32 %v5309_v9, %v6925_v23 }
 0x2e0   : > { %4929 = vmatmul.mubr.msk.f32.vlgmr.msra.gmra.mrb[22].mxu0 %vm255_vm0, %v1858_v49 }
 0x2e1   : > { %4936 = vmatmul.mubr.msk.f32.vlgmr.msra.gmra.mrb[22].mxu1 %vm255_vm0, %v1860_v5  ;;  %5109 = vmatpush3.bf16.msra.mxu0 %v6715_v21 }
 0x2e2   : > { %5113 = vmatpush3.bf16.msra.mxu1 %v6719_v55  ;;  %5115 = vmatprep.subr.bf16.mxu0 %v6723_v59 }
 0x2e3   : > { %5119 = vmatprep.subr.bf16.mxu1 %v6727_v41 }
 0x327   : > { %v4874_v50 = vpop.f32.mrb[14].mxu0 }
 0x328   : > { %v2778_v34 = vmul.f32 0.35355338, %v4874_v50  ;;  %v2675_v18 = vpop.f32.mrb[15].mxu0 }
 0x329   : > { %v2777_v28 = vmul.f32 0.35355338, %v2675_v18 }
 0x32a   : > { %v2836_v8 = vsel %vm255_vm0, %v2778_v34, -inf }
 0x32b   : > { %v2835_v63 = vsel %vm255_vm0, %v2777_v28, -inf }
 0x32c   : > { %v2837_v39 = vmax.f32 %v2835_v63, %v2836_v8 }
 0x32e   : > { %v2838_v6 = vrot.slane %v2837_v39, 4 }
 0x32f   : > { %v4881_v20 = vpop.f32.mrb[14].mxu1 }
 0x330   : > { %v2780_v25 = vmul.f32 0.35355338, %v4881_v20  ;;  %v2756_v31 = vpop.f32.mrb[15].mxu1  ;;  %v2839_v21 = vmax.f32 %v2837_v39, %v2838_v6 }
 0x331   : > { %v2779_v61 = vmul.f32 0.35355338, %v2756_v31 }
 0x332   : > { %v2845_v55 = vsel %vm255_vm0, %v2780_v25, -inf  ;;  %v2840_v57 = vrot.slane %v2839_v21, 2 }
 0x333   : > { %v2844_v27 = vsel %vm255_vm0, %v2779_v61, -inf }
 0x334   : > { %v2846_v33 = vmax.f32 %v2844_v27, %v2845_v55  ;;  %v2841_v1 = vmax.f32 %v2839_v21, %v2840_v57 }
 0x336   : > { %v2847_v3 = vrot.slane %v2846_v33, 4  ;;  %v2842_v58 = vrot.slane %v2841_v1, 1 }
 0x338   : > { %v2848_v10 = vmax.f32 %v2846_v33, %v2847_v3  ;;  %v2843_v51 = vmax.f32 %v2841_v1, %v2842_v58 }
 0x33a   : > { %v2849_v13 = vrot.slane %v2848_v10, 2  ;;  %v2865_v12 = vsub.f32 %v2777_v28, %v2843_v51  ;;  %v2866_v42 = vsub.f32 %v2778_v34, %v2843_v51 }
 0x33c   : > { %v2850_v29 = vmax.f32 %v2848_v10, %v2849_v13  ;;  %v2893_v56 = vmul.f32 1.442695, %v2865_v12  ;;  %v2895_v37 = vmul.f32 1.442695, %v2866_v42 }
 0x33e   : > { %v2851_v45 = vrot.slane %v2850_v29, 1  ;;  %5310 = vpow2.f32 %v2893_v56 }
 0x33f   : > { %5312 = vpow2.f32 %v2895_v37 }
 0x340   : > { %v2852_v44 = vmax.f32 %v2850_v29, %v2851_v45 }
 0x342   : > { %v2867_v17 = vsub.f32 %v2779_v61, %v2852_v44  ;;  %v2868_v52 = vsub.f32 %v2780_v25, %v2852_v44 }
 0x344   : > { %v2897_v36 = vmul.f32 1.442695, %v2867_v17  ;;  %v2899_v54 = vmul.f32 1.442695, %v2868_v52 }
 0x346   : > { %5314 = vpow2.f32 %v2897_v36 }
 0x347   : > { %5316 = vpow2.f32 %v2899_v54 }
 0x348   : > { %v5311_v40 = vpop.eup %5310 }
 0x349   : > { %v5313_v16 = vpop.eup %5312  ;;  %v2955_v14 = vsel %vm255_vm0, %v5311_v40, 0.0 }
 0x34a   : > { %v2956_v26 = vsel %vm255_vm0, %v5313_v16, 0.0 }
 0x34b   : > { %v2957_v4 = vadd.f32 %v2956_v26, %v2955_v14 }
 0x34d   : > { %v2958_v19 = vrot.slane %v2957_v4, 4 }
 0x34f   : > { %v2959_v46 = vadd.f32 %v2958_v19, %v2957_v4 }
 0x350   : > { %v5315_v48 = vpop.eup %5314 }
 0x351   : > { %v5317_v35 = vpop.eup %5316  ;;  %v2964_v60 = vsel %vm255_vm0, %v5315_v48, 0.0  ;;  %v2960_v43 = vrot.slane %v2959_v46, 2 }
 0x352   : > { %v2965_v22 = vsel %vm255_vm0, %v5317_v35, 0.0 }
 0x353   : > { %v2966_v47 = vadd.f32 %v2965_v22, %v2964_v60  ;;  %v2961_v0 = vadd.f32 %v2960_v43, %v2959_v46 }
 0x355   : > { %v2967_v30 = vrot.slane %v2966_v47, 4  ;;  %v2962_v7 = vrot.slane %v2961_v0, 1 }
 0x357   : > { %v2968_v53 = vadd.f32 %v2967_v30, %v2966_v47  ;;  %v2963_v2 = vadd.f32 %v2962_v7, %v2961_v0 }
 0x359   : > { %v2969_v24 = vrot.slane %v2968_v53, 2  ;;  %5318 = vrcp.f32 %v2963_v2 }
 0x35b   : > { %v2970_v38 = vadd.f32 %v2969_v24, %v2968_v53 }
 0x35d   : > { %v2971_v11 = vrot.slane %v2970_v38, 1 }
 0x35f   : > { %v2972_v9 = vadd.f32 %v2971_v11, %v2970_v38 }
 0x361   : > { %5320 = vrcp.f32 %v2972_v9 }
 0x363   : > { %v5319_v62 = vpop.eup %5318 }
 0x364   : > { %v2993_v49 = vmul.f32 %v5319_v62, %v5311_v40  ;;  %v2994_v23 = vmul.f32 %v5319_v62, %v5313_v16 }
 0x366   : > { %v5130_v5 = vpack.c.bf16 %v2994_v23, %v2993_v49 }
 0x36b   : > { %v5321_v50 = vpop.eup %5320 }
 0x36c   : > { %v2995_v34 = vmul.f32 %v5321_v50, %v5315_v48  ;;  %v2996_v18 = vmul.f32 %v5321_v50, %v5317_v35 }
 0x36e   : > { %v5134_v28 = vpack.c.bf16 %v2996_v18, %v2995_v34 }
 0x373   : > { %v4888_v8 = vpop.f32.mrb[16].mxu0 }
 0x374   : > { %v3069_v63 = vpop.f32.mrb[17].mxu0 }
 0x375   : > { %4942 = vmatprep.mubr.msk.f32.mxu0 %vm255_vm0, %v3069_v63 }
 0x376   : > { %4943 = vmatmul.mubr.msk.f32.vlgmr.msra.gmra.mrb[24].mxu0 %vm255_vm0, %v4888_v8 }
 0x377   : > { %5117 = vmatpush3.bf16.msra.mxu0 %v6723_v59 }
 0x378   : > { %5123 = vmatprep.subr.bf16.mxu0 %v6731_v32 }
 0x379   : > { %v4895_v39 = vpop.f32.mrb[16].mxu1 }
 0x37a   : > { %v3150_v20 = vpop.f32.mrb[17].mxu1 }
 0x37b   : > { %4949 = vmatprep.mubr.msk.f32.mxu1 %vm255_vm0, %v3150_v20 }
 0x37c   : > { %4950 = vmatmul.mubr.msk.f32.vlgmr.msra.gmra.mrb[24].mxu1 %vm255_vm0, %v4895_v39 }
 0x37d   : > { %5121 = vmatpush3.bf16.msra.mxu1 %v6727_v41 }
 0x37e   : > { %5127 = vmatprep.subr.bf16.mxu1 %v6733_v15 }
 0x384   : > { %v4902_v6 = vpop.f32.mrb[18].mxu0 }
 0x385   : > { %v3231_v25 = vpop.f32.mrb[19].mxu0 }
 0x386   : > { %v4909_v31 = vpop.f32.mrb[18].mxu1  ;;  %4956 = vmatprep.mubr.msk.f32.mxu0 %vm255_vm0, %v3231_v25 }
 0x387   : > { %v3312_v21 = vpop.f32.mrb[19].mxu1  ;;  %4957 = vmatmul.mubr.msk.f32.vlgmr.msra.gmra.mrb[26].mxu0 %vm255_vm0, %v4902_v6 }
 0x388   : > { %4963 = vmatprep.mubr.msk.f32.mxu1 %vm255_vm0, %v3312_v21  ;;  %5125 = vmatpush3.bf16.msra.mxu0 %v6731_v32 }
 0x389   : > { %4964 = vmatmul.mubr.msk.f32.vlgmr.msra.gmra.mrb[26].mxu1 %vm255_vm0, %v4909_v31  ;;  %5131 = vmatprep.subr.bf16.mxu0 %v5130_v5 }
 0x38a   : > { %5129 = vmatpush3.bf16.msra.mxu1 %v6733_v15 }
 0x38b   : > { %5135 = vmatprep.subr.bf16.mxu1 %v5134_v28 }
 0x399   : > { %v4916_v59 = vpop.f32.mrb[20].mxu0 }
 0x39a   : > { %v3393_v41 = vpop.f32.mrb[21].mxu0 }
 0x39b   : > { %4970 = vmatprep.mubr.msk.f32.mxu0 %vm255_vm0, %v3393_v41 }
 0x39c   : > { %v4923_v61 = vpop.f32.mrb[20].mxu1  ;;  %4971 = vmatmul.mubr.msk.f32.vlgmr.msra.gmra.mrb[28].mxu0 %vm255_vm0, %v4916_v59 }
 0x39d   : > { %v3474_v55 = vpop.f32.mrb[21].mxu1  ;;  %5133 = vmatpush3.bf16.msra.mxu0 %v5130_v5 }
 0x39e   : > { %4977 = vmatprep.mubr.msk.f32.mxu1 %vm255_vm0, %v3474_v55 }
 0x39f   : > { %4978 = vmatmul.mubr.msk.f32.vlgmr.msra.gmra.mrb[28].mxu1 %vm255_vm0, %v4923_v61 }
 0x3a0   : > { %5137 = vmatpush3.bf16.msra.mxu1 %v5134_v28 }
 0x3b3   : > { %v4930_v32 = vpop.f32.mrb[22].mxu0 }
 0x3b4   : > { %v4937_v57 = vpop.f32.mrb[22].mxu1  ;;  %v3555_v27 = vpop.f32.mrb[23].mxu0 }
 0x3b5   : > { %v3636_v15 = vpop.f32.mrb[23].mxu1  ;;  %4984 = vmatprep.mubr.msk.f32.mxu0 %vm255_vm0, %v3555_v27 }
 0x3b6   : > { %4991 = vmatprep.mubr.msk.f32.mxu1 %vm255_vm0, %v3636_v15  ;;  %4985 = vmatmul.mubr.msk.f32.vlgmr.msra.gmra.mrb[30].mxu0 %vm255_vm0, %v4930_v32 }
 0x3b7   : > { %4992 = vmatmul.mubr.msk.f32.vlgmr.msra.gmra.mrb[30].mxu1 %vm255_vm0, %v4937_v57 }
 0x449   : > { %v4944_v33 = vpop.f32.mrb[24].mxu0 }
 0x44a   : > { %4294 = vst.msk [vmem:[%s6806_s29 + $0x8] sm:$0xff] %vm255_vm0, %v4944_v33  ;;  %v3717_v1 = vpop.f32.mrb[25].mxu0 }
 0x44b   : > { %4293 = vst.msk [vmem:[%s6806_s29] sm:$0xff] %vm255_vm0, %v3717_v1 }
 0x44f   : > { %v4951_v3 = vpop.f32.mrb[24].mxu1 }
 0x450   : > { %4296 = vst.msk [vmem:[%s6806_s29 + $0x18] sm:$0xff] %vm255_vm0, %v4951_v3  ;;  %v3798_v58 = vpop.f32.mrb[25].mxu1 }
 0x451   : > { %4295 = vst.msk [vmem:[%s6806_s29 + $0x10] sm:$0xff] %vm255_vm0, %v3798_v58 }
 0x45a   : > { %v4958_v10 = vpop.f32.mrb[26].mxu0 }
 0x45b   : > { %4298 = vst.msk [vmem:[%s6806_s29 + $0x28] sm:$0xff] %vm255_vm0, %v4958_v10  ;;  %v3879_v51 = vpop.f32.mrb[27].mxu0 }
 0x45c   : > { %v4965_v13 = vpop.f32.mrb[26].mxu1  ;;  %4297 = vst.msk [vmem:[%s6806_s29 + $0x20] sm:$0xff] %vm255_vm0, %v3879_v51 }
 0x45d   : > { %4300 = vst.msk [vmem:[%s6806_s29 + $0x38] sm:$0xff] %vm255_vm0, %v4965_v13  ;;  %v3960_v12 = vpop.f32.mrb[27].mxu1 }
 0x45e   : > { %4299 = vst.msk [vmem:[%s6806_s29 + $0x30] sm:$0xff] %vm255_vm0, %v3960_v12 }
 0x46f   : > { %v4972_v42 = vpop.f32.mrb[28].mxu0 }
 0x470   : > { %4302 = vst.msk [vmem:[%s6806_s29 + $0x48] sm:$0xff] %vm255_vm0, %v4972_v42  ;;  %v4041_v29 = vpop.f32.mrb[29].mxu0 }
 0x471   : > { %4301 = vst.msk [vmem:[%s6806_s29 + $0x40] sm:$0xff] %vm255_vm0, %v4041_v29 }
 0x472   : > { %v4979_v56 = vpop.f32.mrb[28].mxu1 }
 0x473   : > { %4304 = vst.msk [vmem:[%s6806_s29 + $0x58] sm:$0xff] %vm255_vm0, %v4979_v56  ;;  %v4122_v37 = vpop.f32.mrb[29].mxu1 }
 0x474   : > { %4303 = vst.msk [vmem:[%s6806_s29 + $0x50] sm:$0xff] %vm255_vm0, %v4122_v37 }
 0x489   : > { %v4986_v45 = vpop.f32.mrb[30].mxu0 }
 0x48a   : > { %v4993_v44 = vpop.f32.mrb[30].mxu1  ;;  %4306 = vst.msk [vmem:[%s6806_s29 + $0x68] sm:$0xff] %vm255_vm0, %v4986_v45  ;;  %v4203_v17 = vpop.f32.mrb[31].mxu0 }
 0x48b   : > { %4308 = vst.msk [vmem:[%s6806_s29 + $0x78] sm:$0xff] %vm255_vm0, %v4993_v44  ;;  %v4284_v52 = vpop.f32.mrb[31].mxu1  ;;  %4305 = vst.msk [vmem:[%s6806_s29 + $0x60] sm:$0xff] %vm255_vm0, %v4203_v17 }
 0x48c   : > { %4307 = vst.msk [vmem:[%s6806_s29 + $0x70] sm:$0xff] %vm255_vm0, %v4284_v52 }
 0x48d   : > { %5403 = shalt.err (!%p5400_p3)
}
 0x48e   : > { %s5404_s23 = scalar_lea.hbm %s6837_s22, 2048  ;;  %s5408_s4 = scalar_lea.hbm %s6894_s3, 4096 }
 0x48f   : > { %p5405_p7 = scmp.ne.s32.totalorder %s6837_s22, %s5404_s23  ;;  %p5409_p8 = scmp.lt.u32.totalorder %s6837_s22, %s6894_s3 }
 0x490   : > { %p5410_p9 = scmp.lt.u32.totalorder %s5408_s4, %s5404_s23  ;;  %p5412_p10 = scmp.lt.u32.totalorder %s5404_s23, %s6837_s22 }
 0x491   : > { %p5406_p4 = pnand %p5405_p7, %p6926_p1 }
 0x492   : > { %p5411_p11 = por %p5410_p9, %p5409_p8 }
 0x493   : > { %p5407_p6 = pneg %p5406_p4 }
 0x494   : > { %p5413_p12 = por %p5412_p10, %p5411_p11 }
 0x496   : > { %p5414_p0 = pnand %p5413_p12, %p5407_p6 }
 0x498   : > { %5417 = shalt.err (!%p5414_p0)
}
 0x499   : > { %s5472_s28 = smov 128   ;;  %s5473_s29 = smov 8  }
 0x49a   : > { %5148 = dma.vmem_to_hbm [thread:$0]  (%p6926_p1), %s6839_s9, 2048, %s6837_s22, %s4310_s16, %s5472_s28, %s5472_s28, %s5473_s29  }
 0x49b PF: > { %s4338_s20 = sand.u32 1, %s5452_s12   ;;  %p6927_p5 = scmp.ne.s32.totalorder %s6902_s19, 0 }
 0x49c   : > { %p6928_p2 = scmp.ge.s32.totalorder %s5464_s15, 2  ;;  %s4339_s21 = scalar_lea.sflag [#allocation5], %s4338_s20 }
 0x49e   : > { %p5162_p13 = pnand %p6928_p2, %p6927_p5 }
 0x4a0   : > { %5447 = dma.done.wait (!%p5162_p13), %s4339_s21, 2048  }
 0x4a1   : > { %5449 = vsyncadd (!%p5162_p13), %s4339_s21, 4294965248  ;;  %p18_p3 = scmp.ge.s32.totalorder %s5569_s7, 4   ;;  %s6929_s12 = smov %s5456_s13 }
 0x4a2   : > { %s6930_s13 = smov %s5460_s14  ;;  %s6931_s14 = smov %s5585_s11 }
 0x4a3   : > { %s6932_s15 = smov %s5569_s7  ;;  %20 = sbr.rel (!%p18_p3) target bundleno = 7 (0x7), region = 112 }
 0x4aa   :  { %4344 = vsyncpa [#allocation4], 1 }
 0x4ab   :  { %4346 = vsyncpa [#allocation4 + $0x1], 1 }
 0x4ac   :  { %4347 = vsyncpa [#allocation5], 1 }
 0x4ad   :  { %4349 = vsyncpa [#allocation5 + $0x1], 1 }
 0x4ae   :  { %4350 = vsyncpa [#allocation6], 1 }
 0x4af   :  { %4352 = vsyncpa [#allocation6 + $0x1], 1 }
 0x4b0   :  { %4353 = vsyncpa [#allocation9], 1 }

</bundles_post_ra>
